<compile_context>
chip_gen: v5e
topology: v5e:2x2
jax: 0.10.0
libtpu: 0.0.40
codegen_flags: <defaults>
</compile_context>

<pallas_src>
import functools

import jax
import jax.numpy as jnp
from jax.experimental import pallas as pl
from jax.experimental.pallas import tpu as pltpu


def _vmem_capacity_bytes():
    """Physical VMEM per core; conservative fallback if the query is unavailable."""
    try:
        return int(pltpu.get_tpu_info().vmem_capacity_bytes)
    except Exception:
        return 64 << 20  # v7x per-core VMEM (smallest of the targets)


def _use_bf16_exp():
    """bf16 exp only where the EUP supports it (v6e / v7x); v5e & older stay f32."""
    kind = jax.devices()[0].device_kind.lower()
    return ("v6" in kind) or ("v7" in kind)


def _pick_kv_block(n, d, c, vmem_budget_bytes):
    """Largest KV block that divides n, leaves >= 2 grid steps and fits VMEM.

    The compiler-internal score intermediates are ~3 * N * t_kv * 4 B (s, the
    exp'd scores and the scaled copy); the resident buffers are x/out (N*d f32,
    double-buffered by the pipeline) plus the x1 (bf16) and acc (f32) scratch.
    """
    resident = n * (2 * 2 * d * 4 + c * 2 + c * 4)
    best_fit = None
    smallest_div = None
    for cand in (1024, 512, 256, 128, 64, 32, 16, 8):
        if n % cand or n // cand < 2:
            continue
        smallest_div = cand
        if best_fit is None and resident + 3 * n * cand * 4 <= vmem_budget_bytes:
            best_fit = cand
    if best_fit is not None:
        return best_fit
    if smallest_div is not None:
        return smallest_div
    return n


def _attention_kernel(c, t_kv, use_bf16_exp,
                      x_ref, w1_ref, b1_ref, w23_ref, b23_ref, w4_ref, b4_ref,
                      o_ref, x1_ref, acc_ref):
    """One KV-block step.

    x_ref     : (N, d)  f32   full flattened input (queries, KV source, residual)
    w1 / b1   : (d, c) bf16 / (1, c) f32     conv1 (query projection, once)
    w23 / b23 : (d, 2c) bf16 / (1, 2c) f32   conv2|conv3 fused (keys|values)
    w4 / b4   : (c, d) bf16 / (1, d) f32     conv4
    o_ref     : (N, d)  output, written at the last grid step
    x1_ref    : (N, c) bf16 scratch — resident query projection
    acc_ref   : (N, c) f32 scratch  — softmax(x1 x2^T) @ x3 accumulator
    """
    k = pl.program_id(0)
    bf16, f32 = jnp.bfloat16, jnp.float32

    @pl.when(k == 0)
    def _init():
        xq = x_ref[...].astype(bf16)
        x1 = jnp.dot(xq, w1_ref[...], preferred_element_type=f32) + b1_ref[...]
        x1_ref[...] = x1.astype(bf16)
        acc_ref[...] = jnp.zeros_like(acc_ref)

    # This step's KV rows, sliced from the already-resident input (streaming x a
    # second time would only duplicate HBM reads and burn a double buffer).
    row0 = pl.multiple_of(k * t_kv, t_kv)
    xkv = x_ref[pl.ds(row0, t_kv), :].astype(bf16)

    # Fused key|value projection for this block: (t_kv, 2c).  Weights arrive
    # pre-cast to bf16; the bias add and accumulation stay f32.
    x23 = jnp.dot(xkv, w23_ref[...], preferred_element_type=f32) + b23_ref[...]
    x2 = x23[:, :c].astype(bf16)    # keys   (t_kv, c)
    x3 = x23[:, c:].astype(bf16)    # values (t_kv, c)

    # Scores s = x1 @ x2^T: contract the channel axis of both operands so the
    # MXU consumes x2 directly (no XLU transpose / extra VMEM buffer).
    s = jax.lax.dot_general(x1_ref[...], x2, (((1,), (1,)), ((), ())),
                            preferred_element_type=f32)          # (N, t_kv)

    # nn.Softmax(0): normalize over the flattened B*H*W axis.  All N rows are
    # resident, so every key column is complete inside this block -> exact.
    # Normalization: t_kv approximate reciprocals (EUP) + one multiply fused
    # into the bf16 cast the p@V matmul needs anyway — the previous per-element
    # f32 divide (N*t_kv per step) competed with exp for the single EUP slot.
    m = jnp.max(s, axis=0, keepdims=True)                         # (1, t_kv) f32
    if use_bf16_exp:
        # v6e / v7x: bf16 EUP doubles exp throughput; stats stay f32.
        e = jnp.exp((s - m).astype(bf16))                         # (N, t_kv) bf16
        colsum = jnp.sum(e.astype(f32), axis=0, keepdims=True)    # (1, t_kv) f32
        inv = pl.reciprocal(colsum, approx=True)
        p = e * inv.astype(bf16)                                  # (N, t_kv) bf16
    else:
        # v5e (no bf16 EUP/VPU): exp and stats strictly f32.
        e = jnp.exp(s - m)
        colsum = jnp.sum(e, axis=0, keepdims=True)
        inv = pl.reciprocal(colsum, approx=True)
        p = (e * inv).astype(bf16)

    acc_ref[...] += jnp.dot(p, x3, preferred_element_type=f32)

    @pl.when(k == pl.num_programs(0) - 1)
    def _finalize():
        y = jnp.dot(acc_ref[...].astype(bf16), w4_ref[...],
                    preferred_element_type=f32) + b4_ref[...]
        # NOTE: d=4 makes this a lane-sparse masked vst; padding channels toward
        # 128 in the surrounding model would make it (and every elementwise op
        # on the (N, c) tensors) lane-dense.
        o_ref[...] = (y + x_ref[...]).astype(o_ref.dtype)


@functools.partial(jax.jit, static_argnames=("kv_block",))
def attention_forward(x_nchw, params, *, kv_block=None):
    """x_nchw: (B, d, H, W) float32.  Returns (B, d, H, W) float32."""
    B, d, H, W = x_nchw.shape
    N = B * H * W

    w1, b1, w2, b2, w3, b3, w4, b4 = params
    c = w1.shape[1]

    # TODO(synk): keep activations channels-last in the surrounding model so
    # these NCHW<->NHWC round trips (a full HBM read+write each way) go away.
    x_flat = jnp.transpose(x_nchw, (0, 2, 3, 1)).reshape(N, d)

    # Pre-cast the matmul weights to bf16 once (halves weight HBM traffic,
    # removes per-grid-step VPU casts); biases stay f32.
    w1b = w1.astype(jnp.bfloat16)
    w23b = jnp.concatenate([w2, w3], axis=1).astype(jnp.bfloat16)   # (d, 2c)
    b23 = jnp.concatenate([b2, b3], axis=1)                          # (1, 2c)
    w4b = w4.astype(jnp.bfloat16)

    # VMEM-aware tiling: fits v7x's 64 MiB, uses the headroom on v5e/v6e 128 MiB
    # (v5e's scoped default is only 16 MiB, so the explicit limit is mandatory).
    vmem_cap = _vmem_capacity_bytes()
    vmem_limit = max(32 << 20, min(int(0.8 * vmem_cap), 100 << 20))
    t_kv = kv_block if kv_block is not None else _pick_kv_block(
        N, d, c, int(0.7 * vmem_limit))
    assert N % t_kv == 0, "KV block must divide B*H*W"
    grid = (N // t_kv,)

    use_bf16_exp = _use_bf16_exp()

    # Advisory only: the matmul "FLOPs" are mostly MXU padding at c = d/2;
    # the kernel is EUP/VPU-bound (N^2 exps) and layout-bound, not MXU-bound.
    cost = pl.CostEstimate(
        flops=int(2 * N * d * 3 * c + 4 * N * N * c + 2 * N * c * d),
        transcendentals=int(N * N + N),
        bytes_accessed=int(4 * 2 * N * d + 2 * (4 * d * c + c * d)
                           + 4 * (3 * c + d)),
    )

    kernel = functools.partial(_attention_kernel, c, t_kv, use_bf16_exp)

    out_flat = pl.pallas_call(
        kernel,
        out_shape=jax.ShapeDtypeStruct((N, d), x_flat.dtype),
        grid_spec=pltpu.PrefetchScalarGridSpec(
            num_scalar_prefetch=0,
            grid=grid,
            in_specs=[
                pl.BlockSpec((N, d), lambda k: (0, 0)),        # x (resident)
                pl.BlockSpec((d, c), lambda k: (0, 0)),        # w1   (bf16)
                pl.BlockSpec((1, c), lambda k: (0, 0)),        # b1   (f32)
                pl.BlockSpec((d, 2 * c), lambda k: (0, 0)),    # w2|w3 (bf16)
                pl.BlockSpec((1, 2 * c), lambda k: (0, 0)),    # b2|b3 (f32)
                pl.BlockSpec((c, d), lambda k: (0, 0)),        # w4   (bf16)
                pl.BlockSpec((1, d), lambda k: (0, 0)),        # b4   (f32)
            ],
            out_specs=pl.BlockSpec((N, d), lambda k: (0, 0)),
            scratch_shapes=[
                pltpu.VMEM((N, c), jnp.bfloat16),              # x1 (resident)
                pltpu.VMEM((N, c), jnp.float32),               # accumulator
            ],
        ),
        # TODO(synk): on v7x, split the KV axis across the two TensorCores
        # (grid=(2, steps), ("parallel","arbitrary"), partial (2, N, c) sums +
        # a tiny epilogue); softmax(0) columns are independent so it is legal.
        compiler_params=pltpu.CompilerParams(
            dimension_semantics=("arbitrary",),                # KV axis = reduction
            vmem_limit_bytes=vmem_limit,
        ),
        cost_estimate=cost,
    )(x_flat, w1b, b1, w23b, b23, w4b, b4)

    # (N, d) -> (B, H, W, d) -> (B, d, H, W)
    return jnp.transpose(out_flat.reshape(B, H, W, d), (0, 3, 1, 2))


def init_params(key, d):
    """Deterministic synthetic params matching nn.Conv2d(d, c, 1) weight shapes."""
    c = round(d / 2)
    keys = jax.random.split(key, 8)
    scale_in = 1.0 / jnp.sqrt(d)
    scale_c = 1.0 / jnp.sqrt(c)
    # Conv2d weight (out, in, 1, 1) stored as matmul weight (in, out).
    w1 = jax.random.normal(keys[0], (d, c), jnp.float32) * scale_in
    b1 = jax.random.normal(keys[1], (1, c), jnp.float32) * scale_in
    w2 = jax.random.normal(keys[2], (d, c), jnp.float32) * scale_in
    b2 = jax.random.normal(keys[3], (1, c), jnp.float32) * scale_in
    w3 = jax.random.normal(keys[4], (d, c), jnp.float32) * scale_in
    b3 = jax.random.normal(keys[5], (1, c), jnp.float32) * scale_in
    w4 = jax.random.normal(keys[6], (c, d), jnp.float32) * scale_c
    b4 = jax.random.normal(keys[7], (1, d), jnp.float32) * scale_c
    return (w1, b1, w2, b2, w3, b3, w4, b4)


def _reference(x_nchw, params, mxu_dtype=jnp.float32, exp_dtype=jnp.float32):
    """Pure-JAX mirror of the PyTorch forward.

    mxu_dtype=float32, exp_dtype=float32 -> exact module semantics.
    mxu_dtype=bfloat16 (+ exp_dtype matching the kernel) -> the same operand
    rounding the kernel applies, for a tighter check (the kernel additionally
    uses an approximate reciprocal for the softmax column sums).
    """
    B, d, H, W = x_nchw.shape
    w1, b1, w2, b2, w3, b3, w4, b4 = params
    f32 = jnp.float32
    xf = jnp.transpose(x_nchw, (0, 2, 3, 1)).reshape(-1, d)
    xd = xf.astype(mxu_dtype)
    x1 = jnp.dot(xd, w1.astype(mxu_dtype), preferred_element_type=f32) + b1
    x2 = jnp.dot(xd, w2.astype(mxu_dtype), preferred_element_type=f32) + b2
    x3 = jnp.dot(xd, w3.astype(mxu_dtype), preferred_element_type=f32) + b3
    s = jax.lax.dot_general(x1.astype(mxu_dtype), x2.astype(mxu_dtype),
                            (((1,), (1,)), ((), ())), preferred_element_type=f32)
    m = jnp.max(s, axis=0, keepdims=True)
    e = jnp.exp((s - m).astype(exp_dtype)).astype(f32)
    p = e / jnp.sum(e, axis=0, keepdims=True)
    a = jnp.dot(p.astype(mxu_dtype), x3.astype(mxu_dtype),
                preferred_element_type=f32)
    y = jnp.dot(a.astype(mxu_dtype), w4.astype(mxu_dtype),
                preferred_element_type=f32) + b4
    out = y + xf
    return jnp.transpose(out.reshape(B, H, W, d), (0, 3, 1, 2))


def _rel_err(a, b):
    return jnp.sqrt(jnp.sum((a - b) ** 2)) / jnp.sqrt(jnp.sum(b ** 2))


if __name__ == "__main__":
    B, d, H, W = 2, 4, 16, 16
    key = jax.random.PRNGKey(0)
    kx, kp = jax.random.split(key)
    x = jax.random.normal(kx, (B, d, H, W), jnp.float32)
    params = init_params(kp, d)

    out = jax.block_until_ready(attention_forward(x, params))
    assert out.shape == (B, d, H, W)

    # Check vs. a reference mirroring the kernel's bf16 operand / exp rounding
    # (residual mismatch: approx column-sum reciprocal + intermediate roundings).
    exp_dtype = jnp.bfloat16 if _use_bf16_exp() else jnp.float32
    ref_matched = _reference(x, params, mxu_dtype=jnp.bfloat16, exp_dtype=exp_dtype)
    err_matched = float(_rel_err(out, ref_matched))
    assert err_matched < 2e-2, f"matched-reference rel err {err_matched}"

    # Looser check vs. the exact f32 module semantics (bf16 MXU operands and
    # the bf16/approx softmax path trade ~1e-2-level error for throughput).
    ref_f32 = _reference(x, params)
    err_f32 = float(_rel_err(out, ref_f32))
    assert err_f32 < 5e-2, f"f32-reference rel err {err_f32}"

    print("KERNEL_OK")
</pallas_src>

<mosaic_0001>
module attributes {stable_mosaic.version = 11 : i64} {
  func.func @_attention_kernel(%arg0: i32, %arg1: memref<512x4xf32, #tpu.memory_space<vmem>>, %arg2: memref<4x2xbf16, #tpu.memory_space<vmem>>, %arg3: memref<1x2xf32, #tpu.memory_space<vmem>>, %arg4: memref<4x4xbf16, #tpu.memory_space<vmem>>, %arg5: memref<1x4xf32, #tpu.memory_space<vmem>>, %arg6: memref<2x4xbf16, #tpu.memory_space<vmem>>, %arg7: memref<1x4xf32, #tpu.memory_space<vmem>>, %arg8: memref<512x4xf32, #tpu.memory_space<vmem>>, %arg9: memref<512x2xbf16, #tpu.memory_space<vmem>>, %arg10: memref<512x2xf32, #tpu.memory_space<vmem>>) attributes {dimension_semantics = [#tpu.dimension_semantics<arbitrary>], iteration_bounds = array<i64: 2>, scalar_prefetch = 0 : i64, scratch_operands = 2 : i64, tpu.core_type = #tpu.core_type<tc>, window_params = [{pipeline_mode = #tpu.pipeline_mode<synchronous>, transform_indices = @transform_0, window_bounds = array<i64: 512, 4>}, {pipeline_mode = #tpu.pipeline_mode<synchronous>, transform_indices = @transform_1, window_bounds = array<i64: 4, 2>}, {pipeline_mode = #tpu.pipeline_mode<synchronous>, transform_indices = @transform_2, window_bounds = array<i64: 1, 2>}, {pipeline_mode = #tpu.pipeline_mode<synchronous>, transform_indices = @transform_3, window_bounds = array<i64: 4, 4>}, {pipeline_mode = #tpu.pipeline_mode<synchronous>, transform_indices = @transform_4, window_bounds = array<i64: 1, 4>}, {pipeline_mode = #tpu.pipeline_mode<synchronous>, transform_indices = @transform_5, window_bounds = array<i64: 2, 4>}, {pipeline_mode = #tpu.pipeline_mode<synchronous>, transform_indices = @transform_6, window_bounds = array<i64: 1, 4>}, {pipeline_mode = #tpu.pipeline_mode<synchronous>, transform_indices = @transform_7, window_bounds = array<i64: 512, 4>}]} {
    %c0_i32 = arith.constant 0 : i32
    %0 = arith.cmpi eq, %arg0, %c0_i32 : i32
    %1 = arith.extui %0 : i1 to i32
    %c0_i32_0 = arith.constant 0 : i32
    %2 = arith.cmpi ne, %1, %c0_i32_0 : i32
    scf.if %2 {
      %c0_16 = arith.constant 0 : index
      %c0_17 = arith.constant 0 : index
      %37 = vector.load %arg1[%c0_16, %c0_17] : memref<512x4xf32, #tpu.memory_space<vmem>>, vector<512x4xf32>
      %38 = arith.truncf %37 : vector<512x4xf32> to vector<512x4xbf16>
      %c0_18 = arith.constant 0 : index
      %c0_19 = arith.constant 0 : index
      %39 = vector.load %arg2[%c0_18, %c0_19] : memref<4x2xbf16, #tpu.memory_space<vmem>>, vector<4x2xbf16>
      %cst_20 = arith.constant dense<0.000000e+00> : vector<512x2xf32>
      %40 = tpu.matmul %38, %39, %cst_20 {dimension_numbers = #tpu.dot_dimension_numbers<[1], [0], [0], [1], [0, 0, 1, 1], [], []>} : vector<512x4xbf16>, vector<4x2xbf16>, vector<512x2xf32> -> vector<512x2xf32>
      %c0_21 = arith.constant 0 : index
      %c0_22 = arith.constant 0 : index
      %41 = vector.load %arg3[%c0_21, %c0_22] : memref<1x2xf32, #tpu.memory_space<vmem>>, vector<1x2xf32>
      %42 = vector.broadcast %41 : vector<1x2xf32> to vector<512x2xf32>
      %43 = arith.addf %40, %42 : vector<512x2xf32>
      %44 = arith.truncf %43 : vector<512x2xf32> to vector<512x2xbf16>
      %c0_23 = arith.constant 0 : index
      %c0_24 = arith.constant 0 : index
      %45 = vector.load %arg9[%c0_23, %c0_24] : memref<512x2xbf16, #tpu.memory_space<vmem>>, vector<512x2xbf16>
      tpu.vector_store %arg9[%c0_23, %c0_24], %44 {strides = array<i32>} : memref<512x2xbf16, #tpu.memory_space<vmem>>, vector<512x2xbf16>,
      %cst_25 = arith.constant 0.000000e+00 : f32
      %46 = vector.broadcast %cst_25 : f32 to vector<512x2xf32>
      %c0_26 = arith.constant 0 : index
      %c0_27 = arith.constant 0 : index
      %47 = vector.load %arg10[%c0_26, %c0_27] : memref<512x2xf32, #tpu.memory_space<vmem>>, vector<512x2xf32>
      tpu.vector_store %arg10[%c0_26, %c0_27], %46 {strides = array<i32>} : memref<512x2xf32, #tpu.memory_space<vmem>>, vector<512x2xf32>,
    } else {
    }
    %c256_i32 = arith.constant 256 : i32
    %3 = arith.muli %arg0, %c256_i32 : i32
    %4 = tpu.assume_multiple %3, 256 : i32
    %5 = arith.index_cast %4 : i32 to index
    %c0 = arith.constant 0 : index
    %6 = vector.load %arg1[%5, %c0] : memref<512x4xf32, #tpu.memory_space<vmem>>, vector<256x4xf32>
    %7 = arith.truncf %6 : vector<256x4xf32> to vector<256x4xbf16>
    %c0_1 = arith.constant 0 : index
    %c0_2 = arith.constant 0 : index
    %8 = vector.load %arg4[%c0_1, %c0_2] : memref<4x4xbf16, #tpu.memory_space<vmem>>, vector<4x4xbf16>
    %cst = arith.constant dense<0.000000e+00> : vector<256x4xf32>
    %9 = tpu.matmul %7, %8, %cst {dimension_numbers = #tpu.dot_dimension_numbers<[1], [0], [0], [1], [0, 0, 1, 1], [], []>} : vector<256x4xbf16>, vector<4x4xbf16>, vector<256x4xf32> -> vector<256x4xf32>
    %c0_3 = arith.constant 0 : index
    %c0_4 = arith.constant 0 : index
    %10 = vector.load %arg5[%c0_3, %c0_4] : memref<1x4xf32, #tpu.memory_space<vmem>>, vector<1x4xf32>
    %11 = vector.broadcast %10 : vector<1x4xf32> to vector<256x4xf32>
    %12 = arith.addf %9, %11 : vector<256x4xf32>
    %13 = vector.extract_strided_slice %12 {offsets = [0, 0], sizes = [256, 2], strides = [1, 1]} : vector<256x4xf32> to vector<256x2xf32>
    %14 = arith.truncf %13 : vector<256x2xf32> to vector<256x2xbf16>
    %15 = vector.extract_strided_slice %12 {offsets = [0, 2], sizes = [256, 2], strides = [1, 1]} : vector<256x4xf32> to vector<256x2xf32>
    %16 = arith.truncf %15 : vector<256x2xf32> to vector<256x2xbf16>
    %c0_5 = arith.constant 0 : index
    %c0_6 = arith.constant 0 : index
    %17 = vector.load %arg9[%c0_5, %c0_6] : memref<512x2xbf16, #tpu.memory_space<vmem>>, vector<512x2xbf16>
    %cst_7 = arith.constant dense<0.000000e+00> : vector<512x256xf32>
    %18 = tpu.matmul %17, %14, %cst_7 {dimension_numbers = #tpu.dot_dimension_numbers<[1], [1], [0], [0], [0, 0, 1, 0], [], []>} : vector<512x2xbf16>, vector<256x2xbf16>, vector<512x256xf32> -> vector<512x256xf32>
    %cst_8 = arith.constant dense<0xFF800000> : vector<256xf32>
    %19 = vector.multi_reduction <maximumf>, %18, %cst_8 [0] : vector<512x256xf32> to vector<256xf32>
    %20 = vector.shape_cast %19 : vector<256xf32> to vector<1x256xf32>
    %21 = vector.broadcast %20 : vector<1x256xf32> to vector<512x256xf32>
    %22 = arith.subf %18, %21 : vector<512x256xf32>
    %23 = math.exp %22 : vector<512x256xf32>
    %cst_9 = arith.constant dense<0.000000e+00> : vector<256xf32>
    %24 = vector.multi_reduction <add>, %23, %cst_9 [0] : vector<512x256xf32> to vector<256xf32>
    %25 = vector.shape_cast %24 : vector<256xf32> to vector<1x256xf32>
    %26 = tpu.reciprocal %25 {approx = true} : vector<1x256xf32> -> vector<1x256xf32>
    %27 = vector.broadcast %26 : vector<1x256xf32> to vector<512x256xf32>
    %28 = arith.mulf %23, %27 : vector<512x256xf32>
    %29 = arith.truncf %28 : vector<512x256xf32> to vector<512x256xbf16>
    %c0_10 = arith.constant 0 : index
    %c0_11 = arith.constant 0 : index
    %30 = vector.load %arg10[%c0_10, %c0_11] : memref<512x2xf32, #tpu.memory_space<vmem>>, vector<512x2xf32>
    %cst_12 = arith.constant dense<0.000000e+00> : vector<512x2xf32>
    %31 = tpu.matmul %29, %16, %cst_12 {dimension_numbers = #tpu.dot_dimension_numbers<[1], [0], [0], [1], [0, 0, 1, 1], [], []>} : vector<512x256xbf16>, vector<256x2xbf16>, vector<512x2xf32> -> vector<512x2xf32>
    %32 = arith.addf %30, %31 : vector<512x2xf32>
    %c0_13 = arith.constant 0 : index
    %c0_14 = arith.constant 0 : index
    %33 = vector.load %arg10[%c0_13, %c0_14] : memref<512x2xf32, #tpu.memory_space<vmem>>, vector<512x2xf32>
    tpu.vector_store %arg10[%c0_13, %c0_14], %32 {strides = array<i32>} : memref<512x2xf32, #tpu.memory_space<vmem>>, vector<512x2xf32>,
    %c1_i32 = arith.constant 1 : i32
    %34 = arith.cmpi eq, %arg0, %c1_i32 : i32
    %35 = arith.extui %34 : i1 to i32
    %c0_i32_15 = arith.constant 0 : i32
    %36 = arith.cmpi ne, %35, %c0_i32_15 : i32
    scf.if %36 {
      %c0_16 = arith.constant 0 : index
      %c0_17 = arith.constant 0 : index
      %37 = vector.load %arg10[%c0_16, %c0_17] : memref<512x2xf32, #tpu.memory_space<vmem>>, vector<512x2xf32>
      %38 = arith.truncf %37 : vector<512x2xf32> to vector<512x2xbf16>
      %c0_18 = arith.constant 0 : index
      %c0_19 = arith.constant 0 : index
      %39 = vector.load %arg6[%c0_18, %c0_19] : memref<2x4xbf16, #tpu.memory_space<vmem>>, vector<2x4xbf16>
      %cst_20 = arith.constant dense<0.000000e+00> : vector<512x4xf32>
      %40 = tpu.matmul %38, %39, %cst_20 {dimension_numbers = #tpu.dot_dimension_numbers<[1], [0], [0], [1], [0, 0, 1, 1], [], []>} : vector<512x2xbf16>, vector<2x4xbf16>, vector<512x4xf32> -> vector<512x4xf32>
      %c0_21 = arith.constant 0 : index
      %c0_22 = arith.constant 0 : index
      %41 = vector.load %arg7[%c0_21, %c0_22] : memref<1x4xf32, #tpu.memory_space<vmem>>, vector<1x4xf32>
      %42 = vector.broadcast %41 : vector<1x4xf32> to vector<512x4xf32>
      %43 = arith.addf %40, %42 : vector<512x4xf32>
      %c0_23 = arith.constant 0 : index
      %c0_24 = arith.constant 0 : index
      %44 = vector.load %arg1[%c0_23, %c0_24] : memref<512x4xf32, #tpu.memory_space<vmem>>, vector<512x4xf32>
      %45 = arith.addf %43, %44 : vector<512x4xf32>
      %c0_25 = arith.constant 0 : index
      %c0_26 = arith.constant 0 : index
      %46 = vector.load %arg8[%c0_25, %c0_26] : memref<512x4xf32, #tpu.memory_space<vmem>>, vector<512x4xf32>
      tpu.vector_store %arg8[%c0_25, %c0_26], %45 {strides = array<i32>} : memref<512x4xf32, #tpu.memory_space<vmem>>, vector<512x4xf32>,
    } else {
    }
    return
  }
  func.func @transform_0(%arg0: i32) -> (i32, i32) {
    %c0_i32 = arith.constant 0 : i32
    %c0_i32_0 = arith.constant 0 : i32
    %c0_i32_1 = arith.constant 0 : i32
    return %c0_i32, %c0_i32_0 : i32, i32
  }
  func.func @transform_1(%arg0: i32) -> (i32, i32) {
    %c0_i32 = arith.constant 0 : i32
    %c0_i32_0 = arith.constant 0 : i32
    %c0_i32_1 = arith.constant 0 : i32
    return %c0_i32, %c0_i32_0 : i32, i32
  }
  func.func @transform_2(%arg0: i32) -> (i32, i32) {
    %c0_i32 = arith.constant 0 : i32
    %c0_i32_0 = arith.constant 0 : i32
    %c0_i32_1 = arith.constant 0 : i32
    return %c0_i32, %c0_i32_0 : i32, i32
  }
  func.func @transform_3(%arg0: i32) -> (i32, i32) {
    %c0_i32 = arith.constant 0 : i32
    %c0_i32_0 = arith.constant 0 : i32
    %c0_i32_1 = arith.constant 0 : i32
    return %c0_i32, %c0_i32_0 : i32, i32
  }
  func.func @transform_4(%arg0: i32) -> (i32, i32) {
    %c0_i32 = arith.constant 0 : i32
    %c0_i32_0 = arith.constant 0 : i32
    %c0_i32_1 = arith.constant 0 : i32
    return %c0_i32, %c0_i32_0 : i32, i32
  }
  func.func @transform_5(%arg0: i32) -> (i32, i32) {
    %c0_i32 = arith.constant 0 : i32
    %c0_i32_0 = arith.constant 0 : i32
    %c0_i32_1 = arith.constant 0 : i32
    return %c0_i32, %c0_i32_0 : i32, i32
  }
  func.func @transform_6(%arg0: i32) -> (i32, i32) {
    %c0_i32 = arith.constant 0 : i32
    %c0_i32_0 = arith.constant 0 : i32
    %c0_i32_1 = arith.constant 0 : i32
    return %c0_i32, %c0_i32_0 : i32, i32
  }
  func.func @transform_7(%arg0: i32) -> (i32, i32) {
    %c0_i32 = arith.constant 0 : i32
    %c0_i32_0 = arith.constant 0 : i32
    %c0_i32_1 = arith.constant 0 : i32
    return %c0_i32, %c0_i32_0 : i32, i32
  }
}

</mosaic_0001>

<bundles_post_ra>
// kernel: attention_forward.1
= control target key start
LH: loop header
LB: loop body
LE: loop exit
PB: predicated region body
PF: predicated region fallthrough
CT: control target
= control target key end

     0   :  { %s4410_s24 = smov 0   ;;  %s7089_s0 = inlined_call_operand.vmem [shape: f32[512,4], index: 0, kind: input, shape index: {}]   ;;  %s7090_s1 = inlined_call_operand.vmem [shape: bf16[4,2], index: 1, kind: input, shape index: {}]   ;;  %s7091_s2 = inlined_call_operand.vmem [shape: f32[1,2], index: 2, kind: input, shape index: {}]   ;;  %s7092_s3 = inlined_call_operand.vmem [shape: bf16[4,4], index: 3, kind: input, shape index: {}]   ;;  %s7093_s4 = inlined_call_operand.vmem [shape: f32[1,4], index: 4, kind: input, shape index: {}]   ;;  %s7094_s5 = inlined_call_operand.vmem [shape: bf16[2,4], index: 5, kind: input, shape index: {}]   ;;  %s7095_s6 = inlined_call_operand.vmem [shape: f32[1,4], index: 6, kind: input, shape index: {}]   ;;  %s7096_s7 = inlined_call_operand.vmem [shape: f32[512,4], index: 7, kind: output, shape index: {}]  }
   0x1 LB: > { %s4416_s25 = sadd.s32 4294967295, %s4366_s24   ;;  %p3768_p0 = scmp.ge.s32.totalorder %s4366_s24, 1  ;;  %s4366_s24 = sphi %s4410_s24, %s17_s24  }
   0x2   : > { %p222_p1 = scmp.lt.s32.totalorder %s4366_s24, 3 }
   0x4   : > { %p223_p2 = pnand %p3768_p0, %p222_p1 }
   0x6   : > { %226 = sbr.rel (%p223_p2) target bundleno = 2370 (0x942), region = 48 }
   0xb   : > { %p3769_p3 = scmp.ne.s32.totalorder %s4416_s25, 0 }
   0xd   : > { %248 = sbr.rel (%p3769_p3) target bundleno = 314 (0x13a), region = 52 }
  0x12   : > { %v345_v0 = vld [vmem:[%s7090_s1] sm:$0x3]  ;;  %vm447_vm0 = vcmask 1041408   ;;  %v250_v2 = vld [vmem:[%s7089_s0 + $0x8] sm:$0xff]  ;;  %vm350_vm1 = vcmask 31744   ;;  %v251_v14 = vld [vmem:[%s7089_s0 + $0x10] sm:$0xff] }
  0x13   : > { %v249_v1 = vld [vmem:[%s7089_s0] sm:$0xff]  ;;  %v449_v3 = vsel %vm447_vm0, %v345_v0, 0  ;;  %v266_v6 = vld [vmem:[%s7089_s0 + $0x88] sm:$0xff]  ;;  %v252_v15 = vld [vmem:[%s7089_s0 + $0x18] sm:$0xff]  ;;  %vm684_vm2 = vcmask 11264   ;;  %vm749_vm3 = vcmask 15360  }
  0x14   : > { %v313_v4 = vpack.c.bf16 %v250_v2, %v249_v1  ;;  %v265_v5 = vld [vmem:[%s7089_s0 + $0x80] sm:$0xff]  ;;  %458 = vmatpush.bf16.msra.mxu0 %v449_v3  ;;  %4078 = vmatpush.bf16.msra.mxu1 %v449_v3  ;;  %v282_v9 = vld [vmem:[%s7089_s0 + $0x108] sm:$0xff]  ;;  %v267_v16 = vld [vmem:[%s7089_s0 + $0x90] sm:$0xff]  ;;  %v314_v22 = vpack.c.bf16 %v252_v15, %v251_v14 }
  0x15   : > { %v281_v7 = vld [vmem:[%s7089_s0 + $0x100] sm:$0xff]  ;;  %v321_v8 = vpack.c.bf16 %v266_v6, %v265_v5  ;;  %v298_v11 = vld [vmem:[%s7089_s0 + $0x188] sm:$0xff]  ;;  %4079 = vmatpush.bf16.msra.mxu2 %v449_v3  ;;  %4080 = vmatpush.bf16.msra.mxu3 %v449_v3  ;;  %v268_v17 = vld [vmem:[%s7089_s0 + $0x98] sm:$0xff] }
  0x16   : > { %v297_v10 = vld [vmem:[%s7089_s0 + $0x180] sm:$0xff]  ;;  %v329_v12 = vpack.c.bf16 %v282_v9, %v281_v7  ;;  %v283_v18 = vld [vmem:[%s7089_s0 + $0x110] sm:$0xff]  ;;  %v284_v19 = vld [vmem:[%s7089_s0 + $0x118] sm:$0xff]  ;;  %v322_v23 = vpack.c.bf16 %v268_v17, %v267_v16 }
  0x17   : > { %v337_v13 = vpack.c.bf16 %v298_v11, %v297_v10  ;;  %3770 = vmatmul.msk.bf16.vlgmr.msra.gmra.mxu0 %vm350_vm1, %v313_v4  ;;  %3778 = vmatmul.msk.bf16.vlgmr.msra.gmra.mxu1 %vm350_vm1, %v321_v8  ;;  %v299_v20 = vld [vmem:[%s7089_s0 + $0x190] sm:$0xff]  ;;  %v300_v21 = vld [vmem:[%s7089_s0 + $0x198] sm:$0xff]  ;;  %v330_v24 = vpack.c.bf16 %v284_v19, %v283_v18  ;;  %v253_v26 = vld [vmem:[%s7089_s0 + $0x20] sm:$0xff] }
  0x18   : > { %3786 = vmatmul.msk.bf16.vlgmr.msra.gmra.mxu2 %vm350_vm1, %v329_v12  ;;  %v338_v25 = vpack.c.bf16 %v300_v21, %v299_v20  ;;  %v254_v27 = vld [vmem:[%s7089_s0 + $0x28] sm:$0xff]  ;;  %v269_v28 = vld [vmem:[%s7089_s0 + $0xa0] sm:$0xff]  ;;  %v255_v38 = vld [vmem:[%s7089_s0 + $0x30] sm:$0xff] }
  0x19   : > { %3794 = vmatmul.msk.bf16.vlgmr.msra.gmra.mxu3 %vm350_vm1, %v337_v13  ;;  %v270_v29 = vld [vmem:[%s7089_s0 + $0xa8] sm:$0xff]  ;;  %v285_v30 = vld [vmem:[%s7089_s0 + $0x120] sm:$0xff]  ;;  %v315_v34 = vpack.c.bf16 %v254_v27, %v253_v26  ;;  %v256_v39 = vld [vmem:[%s7089_s0 + $0x38] sm:$0xff] }
  0x1a   : > { %v286_v31 = vld [vmem:[%s7089_s0 + $0x128] sm:$0xff]  ;;  %v301_v32 = vld [vmem:[%s7089_s0 + $0x1a0] sm:$0xff]  ;;  %v323_v35 = vpack.c.bf16 %v270_v29, %v269_v28  ;;  %v271_v40 = vld [vmem:[%s7089_s0 + $0xb0] sm:$0xff]  ;;  %v316_v46 = vpack.c.bf16 %v256_v39, %v255_v38 }
  0x1b   : > { %v302_v33 = vld [vmem:[%s7089_s0 + $0x1a8] sm:$0xff]  ;;  %v331_v36 = vpack.c.bf16 %v286_v31, %v285_v30  ;;  %v272_v41 = vld [vmem:[%s7089_s0 + $0xb8] sm:$0xff]  ;;  %v287_v42 = vld [vmem:[%s7089_s0 + $0x130] sm:$0xff] }
  0x1c   : > { %v339_v37 = vpack.c.bf16 %v302_v33, %v301_v32  ;;  %v288_v43 = vld [vmem:[%s7089_s0 + $0x138] sm:$0xff]  ;;  %v303_v44 = vld [vmem:[%s7089_s0 + $0x1b0] sm:$0xff]  ;;  %v324_v47 = vpack.c.bf16 %v272_v41, %v271_v40  ;;  %v257_v50 = vld [vmem:[%s7089_s0 + $0x40] sm:$0xff] }
  0x1d   : > { %v304_v45 = vld [vmem:[%s7089_s0 + $0x1b8] sm:$0xff]  ;;  %v332_v48 = vpack.c.bf16 %v288_v43, %v287_v42  ;;  %v258_v51 = vld [vmem:[%s7089_s0 + $0x48] sm:$0xff]  ;;  %v273_v52 = vld [vmem:[%s7089_s0 + $0xc0] sm:$0xff] }
  0x1e   : > { %v340_v49 = vpack.c.bf16 %v304_v45, %v303_v44  ;;  %v274_v53 = vld [vmem:[%s7089_s0 + $0xc8] sm:$0xff]  ;;  %v289_v54 = vld [vmem:[%s7089_s0 + $0x140] sm:$0xff]  ;;  %v317_v58 = vpack.c.bf16 %v258_v51, %v257_v50  ;;  %v259_v62 = vld [vmem:[%s7089_s0 + $0x50] sm:$0xff] }
  0x1f   : > { %v290_v55 = vld [vmem:[%s7089_s0 + $0x148] sm:$0xff]  ;;  %v305_v56 = vld [vmem:[%s7089_s0 + $0x1c0] sm:$0xff]  ;;  %v325_v59 = vpack.c.bf16 %v274_v53, %v273_v52  ;;  %v260_v63 = vld [vmem:[%s7089_s0 + $0x58] sm:$0xff] }
  0x20   : > { %v306_v57 = vld [vmem:[%s7089_s0 + $0x1c8] sm:$0xff]  ;;  %v333_v60 = vpack.c.bf16 %v290_v55, %v289_v54  ;;  %v275_v0 = vld [vmem:[%s7089_s0 + $0xd0] sm:$0xff]  ;;  %v276_v1 = vld [vmem:[%s7089_s0 + $0xd8] sm:$0xff]  ;;  %v318_v6 = vpack.c.bf16 %v260_v63, %v259_v62 }
  0x21   : > { %v341_v61 = vpack.c.bf16 %v306_v57, %v305_v56  ;;  %v291_v2 = vld [vmem:[%s7089_s0 + $0x150] sm:$0xff]  ;;  %v292_v3 = vld [vmem:[%s7089_s0 + $0x158] sm:$0xff]  ;;  %v326_v7 = vpack.c.bf16 %v276_v1, %v275_v0  ;;  %v261_v10 = vld [vmem:[%s7089_s0 + $0x60] sm:$0xff] }
  0x22   : > { %v307_v4 = vld [vmem:[%s7089_s0 + $0x1d0] sm:$0xff]  ;;  %v308_v5 = vld [vmem:[%s7089_s0 + $0x1d8] sm:$0xff]  ;;  %v334_v8 = vpack.c.bf16 %v292_v3, %v291_v2  ;;  %v262_v11 = vld [vmem:[%s7089_s0 + $0x68] sm:$0xff] }
  0x23   : > { %v342_v9 = vpack.c.bf16 %v308_v5, %v307_v4  ;;  %v277_v12 = vld [vmem:[%s7089_s0 + $0xe0] sm:$0xff]  ;;  %v278_v13 = vld [vmem:[%s7089_s0 + $0xe8] sm:$0xff]  ;;  %v319_v18 = vpack.c.bf16 %v262_v11, %v261_v10  ;;  %v295_v26 = vld [vmem:[%s7089_s0 + $0x170] sm:$0xff] }
  0x24   : > { %v293_v14 = vld [vmem:[%s7089_s0 + $0x160] sm:$0xff]  ;;  %v294_v15 = vld [vmem:[%s7089_s0 + $0x168] sm:$0xff]  ;;  %v327_v19 = vpack.c.bf16 %v278_v13, %v277_v12  ;;  %v296_v27 = vld [vmem:[%s7089_s0 + $0x178] sm:$0xff] }
  0x25   : > { %v309_v16 = vld [vmem:[%s7089_s0 + $0x1e0] sm:$0xff]  ;;  %v310_v17 = vld [vmem:[%s7089_s0 + $0x1e8] sm:$0xff]  ;;  %v335_v20 = vpack.c.bf16 %v294_v15, %v293_v14  ;;  %v311_v28 = vld [vmem:[%s7089_s0 + $0x1f0] sm:$0xff]  ;;  %v336_v32 = vpack.c.bf16 %v296_v27, %v295_v26 }
  0x26   : > { %v343_v21 = vpack.c.bf16 %v310_v17, %v309_v16  ;;  %v312_v29 = vld [vmem:[%s7089_s0 + $0x1f8] sm:$0xff] }
  0x27   : > { %3771 = vmatmul.msk.bf16.gmra.mxu0 %vm350_vm1, %v314_v22  ;;  %3779 = vmatmul.msk.bf16.gmra.mxu1 %vm350_vm1, %v322_v23  ;;  %v263_v22 = vld [vmem:[%s7089_s0 + $0x70] sm:$0xff]  ;;  %v264_v23 = vld [vmem:[%s7089_s0 + $0x78] sm:$0xff]  ;;  %v344_v33 = vpack.c.bf16 %v312_v29, %v311_v28 }
  0x28   : > { %3787 = vmatmul.msk.bf16.gmra.mxu2 %vm350_vm1, %v330_v24  ;;  %v279_v24 = vld [vmem:[%s7089_s0 + $0xf0] sm:$0xff]  ;;  %v320_v30 = vpack.c.bf16 %v264_v23, %v263_v22 }
  0x29   : > { %3795 = vmatmul.msk.bf16.gmra.mxu3 %vm350_vm1, %v338_v25  ;;  %v280_v25 = vld [vmem:[%s7089_s0 + $0xf8] sm:$0xff] }
  0x2a   : > { %v328_v31 = vpack.c.bf16 %v280_v25, %v279_v24 }
  0x37   : > { %3772 = vmatmul.msk.bf16.gmra.mxu0 %vm350_vm1, %v315_v34  ;;  %3780 = vmatmul.msk.bf16.gmra.mxu1 %vm350_vm1, %v323_v35  ;;  %v4651_v34 = vld [vmem:[%s7091_s2] ss:$0 sm:$0xff] }
  0x38   : > { %3788 = vmatmul.msk.bf16.gmra.mxu2 %vm350_vm1, %v331_v36 }
  0x39   : > { %3796 = vmatmul.msk.bf16.gmra.mxu3 %vm350_vm1, %v339_v37 }
  0x47   : > { %3773 = vmatmul.msk.bf16.gmra.mxu0 %vm350_vm1, %v316_v46  ;;  %3781 = vmatmul.msk.bf16.gmra.mxu1 %vm350_vm1, %v324_v47 }
  0x48   : > { %3789 = vmatmul.msk.bf16.gmra.mxu2 %vm350_vm1, %v332_v48 }
  0x49   : > { %3797 = vmatmul.msk.bf16.gmra.mxu3 %vm350_vm1, %v340_v49 }
  0x57   : > { %3774 = vmatmul.msk.bf16.gmra.mxu0 %vm350_vm1, %v317_v58  ;;  %3782 = vmatmul.msk.bf16.gmra.mxu1 %vm350_vm1, %v325_v59 }
  0x58   : > { %3790 = vmatmul.msk.bf16.gmra.mxu2 %vm350_vm1, %v333_v60 }
  0x59   : > { %3798 = vmatmul.msk.bf16.gmra.mxu3 %vm350_vm1, %v341_v61 }
  0x67   : > { %3775 = vmatmul.msk.bf16.gmra.mxu0 %vm350_vm1, %v318_v6  ;;  %3783 = vmatmul.msk.bf16.gmra.mxu1 %vm350_vm1, %v326_v7 }
  0x68   : > { %3791 = vmatmul.msk.bf16.gmra.mxu2 %vm350_vm1, %v334_v8 }
  0x69   : > { %3799 = vmatmul.msk.bf16.gmra.mxu3 %vm350_vm1, %v342_v9 }
  0x77   : > { %3776 = vmatmul.msk.bf16.gmra.mxu0 %vm350_vm1, %v319_v18  ;;  %3784 = vmatmul.msk.bf16.gmra.mxu1 %vm350_vm1, %v327_v19 }
  0x78   : > { %3792 = vmatmul.msk.bf16.gmra.mxu2 %vm350_vm1, %v335_v20 }
  0x79   : > { %3800 = vmatmul.msk.bf16.gmra.mxu3 %vm350_vm1, %v343_v21 }
  0x87   : > { %3777 = vmatmul.msk.bf16.gmra.mxu0 %vm350_vm1, %v320_v30  ;;  %3785 = vmatmul.msk.bf16.gmra.mxu1 %vm350_vm1, %v328_v31 }
  0x88   : > { %3793 = vmatmul.msk.bf16.gmra.mxu2 %vm350_vm1, %v336_v32 }
  0x89   : > { %3801 = vmatmul.msk.bf16.gmra.mxu3 %vm350_vm1, %v344_v33 }
  0x94   : > { %v460_v35 = vpop.f32.mrf.mxu0  ;;  %v500_v36 = vpop.f32.mrf.mxu1 }
  0x95   : > { %v461_v37 = vadd.f32 %v4651_v34, %v460_v35  ;;  %v501_v38 = vadd.f32 %v4651_v34, %v500_v36 }
  0x97   : > { %v620_v39 = vpack.c.bf16 %v461_v37, %v461_v37  ;;  %v636_v40 = vpack.c.bf16 %v501_v38, %v501_v38 }
  0x99   : > { %685 = vst.msk [vmem:[#allocation2] sm:$0xf] %vm684_vm2, %v620_v39 }
  0x9a   : > { %701 = vst.msk [vmem:[#allocation2 + $0x40] sm:$0xf] %vm684_vm2, %v636_v40 }
  0x9b   : > { %v540_v41 = vpop.f32.mrf.mxu2 }
  0x9c   : > { %v580_v42 = vpop.f32.mrf.mxu3  ;;  %v541_v43 = vadd.f32 %v4651_v34, %v540_v41  ;;  %v462_v45 = vpop.f32.mrf.mxu0 }
  0x9d   : > { %v581_v44 = vadd.f32 %v4651_v34, %v580_v42  ;;  %v502_v46 = vpop.f32.mrf.mxu1  ;;  %v463_v47 = vadd.f32 %v4651_v34, %v462_v45 }
  0x9e   : > { %v503_v48 = vadd.f32 %v4651_v34, %v502_v46  ;;  %v652_v49 = vpack.c.bf16 %v541_v43, %v541_v43 }
  0x9f   : > { %v668_v50 = vpack.c.bf16 %v581_v44, %v581_v44  ;;  %v621_v51 = vpack.c.bf16 %v463_v47, %v463_v47 }
  0xa0   : > { %v637_v52 = vpack.c.bf16 %v503_v48, %v503_v48  ;;  %717 = vst.msk [vmem:[#allocation2 + $0x80] sm:$0xf] %vm684_vm2, %v652_v49 }
  0xa1   : > { %733 = vst.msk [vmem:[#allocation2 + $0xc0] sm:$0xf] %vm684_vm2, %v668_v50 }
  0xa2   : > { %686 = vst.msk [vmem:[#allocation2 + $0x4] sm:$0xf] %vm684_vm2, %v621_v51 }
  0xa3   : > { %702 = vst.msk [vmem:[#allocation2 + $0x44] sm:$0xf] %vm684_vm2, %v637_v52  ;;  %v542_v53 = vpop.f32.mrf.mxu2 }
  0xa4   : > { %v582_v54 = vpop.f32.mrf.mxu3  ;;  %v543_v55 = vadd.f32 %v4651_v34, %v542_v53  ;;  %v465_v57 = vpop.f32.mrf.mxu0 }
  0xa5   : > { %v583_v56 = vadd.f32 %v4651_v34, %v582_v54  ;;  %v505_v58 = vpop.f32.mrf.mxu1  ;;  %v466_v59 = vadd.f32 %v4651_v34, %v465_v57 }
  0xa6   : > { %v506_v60 = vadd.f32 %v4651_v34, %v505_v58  ;;  %v653_v61 = vpack.c.bf16 %v543_v55, %v543_v55 }
  0xa7   : > { %v669_v62 = vpack.c.bf16 %v583_v56, %v583_v56  ;;  %v622_v63 = vpack.c.bf16 %v466_v59, %v466_v59 }
  0xa8   : > { %v638_v0 = vpack.c.bf16 %v506_v60, %v506_v60  ;;  %718 = vst.msk [vmem:[#allocation2 + $0x84] sm:$0xf] %vm684_vm2, %v653_v61 }
  0xa9   : > { %734 = vst.msk [vmem:[#allocation2 + $0xc4] sm:$0xf] %vm684_vm2, %v669_v62 }
  0xaa   : > { %687 = vst.msk [vmem:[#allocation2 + $0x8] sm:$0xf] %vm684_vm2, %v622_v63 }
  0xab   : > { %703 = vst.msk [vmem:[#allocation2 + $0x48] sm:$0xf] %vm684_vm2, %v638_v0  ;;  %v545_v1 = vpop.f32.mrf.mxu2 }
  0xac   : > { %v585_v2 = vpop.f32.mrf.mxu3  ;;  %v546_v3 = vadd.f32 %v4651_v34, %v545_v1  ;;  %v467_v5 = vpop.f32.mrf.mxu0 }
  0xad   : > { %v586_v4 = vadd.f32 %v4651_v34, %v585_v2  ;;  %v507_v6 = vpop.f32.mrf.mxu1  ;;  %v468_v7 = vadd.f32 %v4651_v34, %v467_v5 }
  0xae   : > { %v508_v8 = vadd.f32 %v4651_v34, %v507_v6  ;;  %v654_v9 = vpack.c.bf16 %v546_v3, %v546_v3 }
  0xaf   : > { %v670_v10 = vpack.c.bf16 %v586_v4, %v586_v4  ;;  %v623_v11 = vpack.c.bf16 %v468_v7, %v468_v7 }
  0xb0   : > { %v639_v12 = vpack.c.bf16 %v508_v8, %v508_v8  ;;  %719 = vst.msk [vmem:[#allocation2 + $0x88] sm:$0xf] %vm684_vm2, %v654_v9 }
  0xb1   : > { %735 = vst.msk [vmem:[#allocation2 + $0xc8] sm:$0xf] %vm684_vm2, %v670_v10 }
  0xb2   : > { %688 = vst.msk [vmem:[#allocation2 + $0xc] sm:$0xf] %vm684_vm2, %v623_v11 }
  0xb3   : > { %704 = vst.msk [vmem:[#allocation2 + $0x4c] sm:$0xf] %vm684_vm2, %v639_v12  ;;  %v547_v13 = vpop.f32.mrf.mxu2 }
  0xb4   : > { %v587_v14 = vpop.f32.mrf.mxu3  ;;  %v548_v15 = vadd.f32 %v4651_v34, %v547_v13  ;;  %v470_v17 = vpop.f32.mrf.mxu0 }
  0xb5   : > { %v588_v16 = vadd.f32 %v4651_v34, %v587_v14  ;;  %v510_v18 = vpop.f32.mrf.mxu1  ;;  %v471_v19 = vadd.f32 %v4651_v34, %v470_v17 }
  0xb6   : > { %v511_v20 = vadd.f32 %v4651_v34, %v510_v18  ;;  %v655_v21 = vpack.c.bf16 %v548_v15, %v548_v15 }
  0xb7   : > { %v671_v22 = vpack.c.bf16 %v588_v16, %v588_v16  ;;  %v624_v23 = vpack.c.bf16 %v471_v19, %v471_v19 }
  0xb8   : > { %v640_v24 = vpack.c.bf16 %v511_v20, %v511_v20  ;;  %720 = vst.msk [vmem:[#allocation2 + $0x8c] sm:$0xf] %vm684_vm2, %v655_v21 }
  0xb9   : > { %736 = vst.msk [vmem:[#allocation2 + $0xcc] sm:$0xf] %vm684_vm2, %v671_v22 }
  0xba   : > { %689 = vst.msk [vmem:[#allocation2 + $0x10] sm:$0xf] %vm684_vm2, %v624_v23 }
  0xbb   : > { %705 = vst.msk [vmem:[#allocation2 + $0x50] sm:$0xf] %vm684_vm2, %v640_v24  ;;  %v550_v25 = vpop.f32.mrf.mxu2 }
  0xbc   : > { %v590_v26 = vpop.f32.mrf.mxu3  ;;  %v551_v27 = vadd.f32 %v4651_v34, %v550_v25  ;;  %v472_v29 = vpop.f32.mrf.mxu0 }
  0xbd   : > { %v591_v28 = vadd.f32 %v4651_v34, %v590_v26  ;;  %v512_v30 = vpop.f32.mrf.mxu1  ;;  %v473_v31 = vadd.f32 %v4651_v34, %v472_v29 }
  0xbe   : > { %v513_v32 = vadd.f32 %v4651_v34, %v512_v30  ;;  %v656_v33 = vpack.c.bf16 %v551_v27, %v551_v27 }
  0xbf   : > { %v672_v35 = vpack.c.bf16 %v591_v28, %v591_v28  ;;  %v625_v36 = vpack.c.bf16 %v473_v31, %v473_v31 }
  0xc0   : > { %v641_v37 = vpack.c.bf16 %v513_v32, %v513_v32  ;;  %721 = vst.msk [vmem:[#allocation2 + $0x90] sm:$0xf] %vm684_vm2, %v656_v33 }
  0xc1   : > { %737 = vst.msk [vmem:[#allocation2 + $0xd0] sm:$0xf] %vm684_vm2, %v672_v35 }
  0xc2   : > { %690 = vst.msk [vmem:[#allocation2 + $0x14] sm:$0xf] %vm684_vm2, %v625_v36 }
  0xc3   : > { %706 = vst.msk [vmem:[#allocation2 + $0x54] sm:$0xf] %vm684_vm2, %v641_v37  ;;  %v552_v38 = vpop.f32.mrf.mxu2 }
  0xc4   : > { %v592_v39 = vpop.f32.mrf.mxu3  ;;  %v553_v40 = vadd.f32 %v4651_v34, %v552_v38  ;;  %v475_v42 = vpop.f32.mrf.mxu0 }
  0xc5   : > { %v593_v41 = vadd.f32 %v4651_v34, %v592_v39  ;;  %v515_v43 = vpop.f32.mrf.mxu1  ;;  %v476_v44 = vadd.f32 %v4651_v34, %v475_v42 }
  0xc6   : > { %v516_v45 = vadd.f32 %v4651_v34, %v515_v43  ;;  %v657_v46 = vpack.c.bf16 %v553_v40, %v553_v40 }
  0xc7   : > { %v673_v47 = vpack.c.bf16 %v593_v41, %v593_v41  ;;  %v626_v48 = vpack.c.bf16 %v476_v44, %v476_v44 }
  0xc8   : > { %v642_v49 = vpack.c.bf16 %v516_v45, %v516_v45  ;;  %722 = vst.msk [vmem:[#allocation2 + $0x94] sm:$0xf] %vm684_vm2, %v657_v46 }
  0xc9   : > { %738 = vst.msk [vmem:[#allocation2 + $0xd4] sm:$0xf] %vm684_vm2, %v673_v47 }
  0xca   : > { %691 = vst.msk [vmem:[#allocation2 + $0x18] sm:$0xf] %vm684_vm2, %v626_v48 }
  0xcb   : > { %707 = vst.msk [vmem:[#allocation2 + $0x58] sm:$0xf] %vm684_vm2, %v642_v49  ;;  %v555_v50 = vpop.f32.mrf.mxu2 }
  0xcc   : > { %v595_v51 = vpop.f32.mrf.mxu3  ;;  %v556_v52 = vadd.f32 %v4651_v34, %v555_v50  ;;  %v477_v54 = vpop.f32.mrf.mxu0 }
  0xcd   : > { %v596_v53 = vadd.f32 %v4651_v34, %v595_v51  ;;  %v517_v55 = vpop.f32.mrf.mxu1  ;;  %v478_v56 = vadd.f32 %v4651_v34, %v477_v54 }
  0xce   : > { %v518_v57 = vadd.f32 %v4651_v34, %v517_v55  ;;  %v658_v58 = vpack.c.bf16 %v556_v52, %v556_v52 }
  0xcf   : > { %v674_v59 = vpack.c.bf16 %v596_v53, %v596_v53  ;;  %v627_v60 = vpack.c.bf16 %v478_v56, %v478_v56 }
  0xd0   : > { %v643_v61 = vpack.c.bf16 %v518_v57, %v518_v57  ;;  %723 = vst.msk [vmem:[#allocation2 + $0x98] sm:$0xf] %vm684_vm2, %v658_v58 }
  0xd1   : > { %739 = vst.msk [vmem:[#allocation2 + $0xd8] sm:$0xf] %vm684_vm2, %v674_v59 }
  0xd2   : > { %692 = vst.msk [vmem:[#allocation2 + $0x1c] sm:$0xf] %vm684_vm2, %v627_v60 }
  0xd3   : > { %708 = vst.msk [vmem:[#allocation2 + $0x5c] sm:$0xf] %vm684_vm2, %v643_v61  ;;  %v557_v62 = vpop.f32.mrf.mxu2 }
  0xd4   : > { %v597_v63 = vpop.f32.mrf.mxu3  ;;  %v558_v0 = vadd.f32 %v4651_v34, %v557_v62  ;;  %v480_v2 = vpop.f32.mrf.mxu0 }
  0xd5   : > { %v598_v1 = vadd.f32 %v4651_v34, %v597_v63  ;;  %v520_v3 = vpop.f32.mrf.mxu1  ;;  %v481_v4 = vadd.f32 %v4651_v34, %v480_v2 }
  0xd6   : > { %v521_v5 = vadd.f32 %v4651_v34, %v520_v3  ;;  %v659_v6 = vpack.c.bf16 %v558_v0, %v558_v0 }
  0xd7   : > { %v675_v7 = vpack.c.bf16 %v598_v1, %v598_v1  ;;  %v628_v8 = vpack.c.bf16 %v481_v4, %v481_v4  ;;  %v4368_v1 = vmov 0.0  }
  0xd8   : > { %v644_v9 = vpack.c.bf16 %v521_v5, %v521_v5  ;;  %724 = vst.msk [vmem:[#allocation2 + $0x9c] sm:$0xf] %vm684_vm2, %v659_v6 }
  0xd9   : > { %740 = vst.msk [vmem:[#allocation2 + $0xdc] sm:$0xf] %vm684_vm2, %v675_v7 }
  0xda   : > { %693 = vst.msk [vmem:[#allocation2 + $0x20] sm:$0xf] %vm684_vm2, %v628_v8 }
  0xdb   : > { %709 = vst.msk [vmem:[#allocation2 + $0x60] sm:$0xf] %vm684_vm2, %v644_v9  ;;  %v560_v10 = vpop.f32.mrf.mxu2 }
  0xdc   : > { %v600_v11 = vpop.f32.mrf.mxu3  ;;  %v561_v12 = vadd.f32 %v4651_v34, %v560_v10  ;;  %v482_v14 = vpop.f32.mrf.mxu0  ;;  %750 = vst.msk [vmem:[#allocation3] sm:$0xff] %vm749_vm3, %v4368_v1 }
  0xdd   : > { %v601_v13 = vadd.f32 %v4651_v34, %v600_v11  ;;  %v522_v15 = vpop.f32.mrf.mxu1  ;;  %v483_v16 = vadd.f32 %v4651_v34, %v482_v14  ;;  %751 = vst.msk [vmem:[#allocation3 + $0x8] sm:$0xff] %vm749_vm3, %v4368_v1 }
  0xde   : > { %v523_v17 = vadd.f32 %v4651_v34, %v522_v15  ;;  %v660_v18 = vpack.c.bf16 %v561_v12, %v561_v12  ;;  %752 = vst.msk [vmem:[#allocation3 + $0x10] sm:$0xff] %vm749_vm3, %v4368_v1 }
  0xdf   : > { %v676_v19 = vpack.c.bf16 %v601_v13, %v601_v13  ;;  %v629_v20 = vpack.c.bf16 %v483_v16, %v483_v16  ;;  %753 = vst.msk [vmem:[#allocation3 + $0x18] sm:$0xff] %vm749_vm3, %v4368_v1 }
  0xe0   : > { %v645_v21 = vpack.c.bf16 %v523_v17, %v523_v17  ;;  %725 = vst.msk [vmem:[#allocation2 + $0xa0] sm:$0xf] %vm684_vm2, %v660_v18 }
  0xe1   : > { %741 = vst.msk [vmem:[#allocation2 + $0xe0] sm:$0xf] %vm684_vm2, %v676_v19 }
  0xe2   : > { %694 = vst.msk [vmem:[#allocation2 + $0x24] sm:$0xf] %vm684_vm2, %v629_v20 }
  0xe3   : > { %710 = vst.msk [vmem:[#allocation2 + $0x64] sm:$0xf] %vm684_vm2, %v645_v21  ;;  %v562_v22 = vpop.f32.mrf.mxu2 }
  0xe4   : > { %v602_v23 = vpop.f32.mrf.mxu3  ;;  %v563_v24 = vadd.f32 %v4651_v34, %v562_v22  ;;  %v485_v26 = vpop.f32.mrf.mxu0  ;;  %754 = vst.msk [vmem:[#allocation3 + $0x20] sm:$0xff] %vm749_vm3, %v4368_v1 }
  0xe5   : > { %v603_v25 = vadd.f32 %v4651_v34, %v602_v23  ;;  %v525_v27 = vpop.f32.mrf.mxu1  ;;  %v486_v28 = vadd.f32 %v4651_v34, %v485_v26  ;;  %755 = vst.msk [vmem:[#allocation3 + $0x28] sm:$0xff] %vm749_vm3, %v4368_v1 }
  0xe6   : > { %v526_v29 = vadd.f32 %v4651_v34, %v525_v27  ;;  %v661_v30 = vpack.c.bf16 %v563_v24, %v563_v24  ;;  %756 = vst.msk [vmem:[#allocation3 + $0x30] sm:$0xff] %vm749_vm3, %v4368_v1 }
  0xe7   : > { %v677_v31 = vpack.c.bf16 %v603_v25, %v603_v25  ;;  %v630_v32 = vpack.c.bf16 %v486_v28, %v486_v28  ;;  %757 = vst.msk [vmem:[#allocation3 + $0x38] sm:$0xff] %vm749_vm3, %v4368_v1 }
  0xe8   : > { %v646_v33 = vpack.c.bf16 %v526_v29, %v526_v29  ;;  %726 = vst.msk [vmem:[#allocation2 + $0xa4] sm:$0xf] %vm684_vm2, %v661_v30 }
  0xe9   : > { %742 = vst.msk [vmem:[#allocation2 + $0xe4] sm:$0xf] %vm684_vm2, %v677_v31 }
  0xea   : > { %695 = vst.msk [vmem:[#allocation2 + $0x28] sm:$0xf] %vm684_vm2, %v630_v32 }
  0xeb   : > { %711 = vst.msk [vmem:[#allocation2 + $0x68] sm:$0xf] %vm684_vm2, %v646_v33  ;;  %v565_v35 = vpop.f32.mrf.mxu2 }
  0xec   : > { %v605_v36 = vpop.f32.mrf.mxu3  ;;  %v566_v37 = vadd.f32 %v4651_v34, %v565_v35  ;;  %v487_v39 = vpop.f32.mrf.mxu0  ;;  %758 = vst.msk [vmem:[#allocation3 + $0x40] sm:$0xff] %vm749_vm3, %v4368_v1 }
  0xed   : > { %v606_v38 = vadd.f32 %v4651_v34, %v605_v36  ;;  %v527_v40 = vpop.f32.mrf.mxu1  ;;  %v488_v41 = vadd.f32 %v4651_v34, %v487_v39  ;;  %759 = vst.msk [vmem:[#allocation3 + $0x48] sm:$0xff] %vm749_vm3, %v4368_v1 }
  0xee   : > { %v528_v42 = vadd.f32 %v4651_v34, %v527_v40  ;;  %v662_v43 = vpack.c.bf16 %v566_v37, %v566_v37  ;;  %760 = vst.msk [vmem:[#allocation3 + $0x50] sm:$0xff] %vm749_vm3, %v4368_v1 }
  0xef   : > { %v678_v44 = vpack.c.bf16 %v606_v38, %v606_v38  ;;  %v631_v45 = vpack.c.bf16 %v488_v41, %v488_v41  ;;  %761 = vst.msk [vmem:[#allocation3 + $0x58] sm:$0xff] %vm749_vm3, %v4368_v1 }
  0xf0   : > { %v647_v46 = vpack.c.bf16 %v528_v42, %v528_v42  ;;  %727 = vst.msk [vmem:[#allocation2 + $0xa8] sm:$0xf] %vm684_vm2, %v662_v43 }
  0xf1   : > { %743 = vst.msk [vmem:[#allocation2 + $0xe8] sm:$0xf] %vm684_vm2, %v678_v44 }
  0xf2   : > { %696 = vst.msk [vmem:[#allocation2 + $0x2c] sm:$0xf] %vm684_vm2, %v631_v45 }
  0xf3   : > { %712 = vst.msk [vmem:[#allocation2 + $0x6c] sm:$0xf] %vm684_vm2, %v647_v46  ;;  %v567_v47 = vpop.f32.mrf.mxu2 }
  0xf4   : > { %v607_v48 = vpop.f32.mrf.mxu3  ;;  %v568_v49 = vadd.f32 %v4651_v34, %v567_v47  ;;  %v490_v51 = vpop.f32.mrf.mxu0  ;;  %762 = vst.msk [vmem:[#allocation3 + $0x60] sm:$0xff] %vm749_vm3, %v4368_v1 }
  0xf5   : > { %v608_v50 = vadd.f32 %v4651_v34, %v607_v48  ;;  %v530_v52 = vpop.f32.mrf.mxu1  ;;  %v491_v53 = vadd.f32 %v4651_v34, %v490_v51  ;;  %763 = vst.msk [vmem:[#allocation3 + $0x68] sm:$0xff] %vm749_vm3, %v4368_v1 }
  0xf6   : > { %v531_v54 = vadd.f32 %v4651_v34, %v530_v52  ;;  %v663_v55 = vpack.c.bf16 %v568_v49, %v568_v49  ;;  %764 = vst.msk [vmem:[#allocation3 + $0x70] sm:$0xff] %vm749_vm3, %v4368_v1 }
  0xf7   : > { %v679_v56 = vpack.c.bf16 %v608_v50, %v608_v50  ;;  %v632_v57 = vpack.c.bf16 %v491_v53, %v491_v53  ;;  %765 = vst.msk [vmem:[#allocation3 + $0x78] sm:$0xff] %vm749_vm3, %v4368_v1 }
  0xf8   : > { %v648_v58 = vpack.c.bf16 %v531_v54, %v531_v54  ;;  %728 = vst.msk [vmem:[#allocation2 + $0xac] sm:$0xf] %vm684_vm2, %v663_v55 }
  0xf9   : > { %744 = vst.msk [vmem:[#allocation2 + $0xec] sm:$0xf] %vm684_vm2, %v679_v56 }
  0xfa   : > { %697 = vst.msk [vmem:[#allocation2 + $0x30] sm:$0xf] %vm684_vm2, %v632_v57 }
  0xfb   : > { %713 = vst.msk [vmem:[#allocation2 + $0x70] sm:$0xf] %vm684_vm2, %v648_v58  ;;  %v570_v59 = vpop.f32.mrf.mxu2 }
  0xfc   : > { %v610_v60 = vpop.f32.mrf.mxu3  ;;  %v571_v61 = vadd.f32 %v4651_v34, %v570_v59  ;;  %v492_v63 = vpop.f32.mrf.mxu0  ;;  %766 = vst.msk [vmem:[#allocation3 + $0x80] sm:$0xff] %vm749_vm3, %v4368_v1 }
  0xfd   : > { %v611_v62 = vadd.f32 %v4651_v34, %v610_v60  ;;  %v532_v0 = vpop.f32.mrf.mxu1  ;;  %v493_v2 = vadd.f32 %v4651_v34, %v492_v63  ;;  %767 = vst.msk [vmem:[#allocation3 + $0x88] sm:$0xff] %vm749_vm3, %v4368_v1 }
  0xfe   : > { %v533_v3 = vadd.f32 %v4651_v34, %v532_v0  ;;  %v664_v4 = vpack.c.bf16 %v571_v61, %v571_v61  ;;  %768 = vst.msk [vmem:[#allocation3 + $0x90] sm:$0xff] %vm749_vm3, %v4368_v1 }
  0xff   : > { %v680_v5 = vpack.c.bf16 %v611_v62, %v611_v62  ;;  %v633_v6 = vpack.c.bf16 %v493_v2, %v493_v2  ;;  %769 = vst.msk [vmem:[#allocation3 + $0x98] sm:$0xff] %vm749_vm3, %v4368_v1 }
 0x100   : > { %v649_v7 = vpack.c.bf16 %v533_v3, %v533_v3  ;;  %729 = vst.msk [vmem:[#allocation2 + $0xb0] sm:$0xf] %vm684_vm2, %v664_v4 }
 0x101   : > { %745 = vst.msk [vmem:[#allocation2 + $0xf0] sm:$0xf] %vm684_vm2, %v680_v5 }
 0x102   : > { %698 = vst.msk [vmem:[#allocation2 + $0x34] sm:$0xf] %vm684_vm2, %v633_v6 }
 0x103   : > { %714 = vst.msk [vmem:[#allocation2 + $0x74] sm:$0xf] %vm684_vm2, %v649_v7  ;;  %v572_v8 = vpop.f32.mrf.mxu2 }
 0x104   : > { %v612_v9 = vpop.f32.mrf.mxu3  ;;  %v573_v10 = vadd.f32 %v4651_v34, %v572_v8  ;;  %v495_v12 = vpop.f32.mrf.mxu0  ;;  %770 = vst.msk [vmem:[#allocation3 + $0xa0] sm:$0xff] %vm749_vm3, %v4368_v1 }
 0x105   : > { %v613_v11 = vadd.f32 %v4651_v34, %v612_v9  ;;  %v535_v13 = vpop.f32.mrf.mxu1  ;;  %v496_v14 = vadd.f32 %v4651_v34, %v495_v12  ;;  %771 = vst.msk [vmem:[#allocation3 + $0xa8] sm:$0xff] %vm749_vm3, %v4368_v1 }
 0x106   : > { %v536_v15 = vadd.f32 %v4651_v34, %v535_v13  ;;  %v665_v16 = vpack.c.bf16 %v573_v10, %v573_v10  ;;  %772 = vst.msk [vmem:[#allocation3 + $0xb0] sm:$0xff] %vm749_vm3, %v4368_v1 }
 0x107   : > { %v681_v17 = vpack.c.bf16 %v613_v11, %v613_v11  ;;  %v634_v18 = vpack.c.bf16 %v496_v14, %v496_v14  ;;  %773 = vst.msk [vmem:[#allocation3 + $0xb8] sm:$0xff] %vm749_vm3, %v4368_v1 }
 0x108   : > { %v650_v19 = vpack.c.bf16 %v536_v15, %v536_v15  ;;  %730 = vst.msk [vmem:[#allocation2 + $0xb4] sm:$0xf] %vm684_vm2, %v665_v16 }
 0x109   : > { %746 = vst.msk [vmem:[#allocation2 + $0xf4] sm:$0xf] %vm684_vm2, %v681_v17 }
 0x10a   : > { %699 = vst.msk [vmem:[#allocation2 + $0x38] sm:$0xf] %vm684_vm2, %v634_v18 }
 0x10b   : > { %715 = vst.msk [vmem:[#allocation2 + $0x78] sm:$0xf] %vm684_vm2, %v650_v19  ;;  %v575_v20 = vpop.f32.mrf.mxu2 }
 0x10c   : > { %v615_v21 = vpop.f32.mrf.mxu3  ;;  %v576_v22 = vadd.f32 %v4651_v34, %v575_v20  ;;  %v497_v24 = vpop.f32.mrf.mxu0  ;;  %774 = vst.msk [vmem:[#allocation3 + $0xc0] sm:$0xff] %vm749_vm3, %v4368_v1 }
 0x10d   : > { %v616_v23 = vadd.f32 %v4651_v34, %v615_v21  ;;  %v537_v25 = vpop.f32.mrf.mxu1  ;;  %v498_v26 = vadd.f32 %v4651_v34, %v497_v24  ;;  %775 = vst.msk [vmem:[#allocation3 + $0xc8] sm:$0xff] %vm749_vm3, %v4368_v1 }
 0x10e   : > { %v538_v27 = vadd.f32 %v4651_v34, %v537_v25  ;;  %v666_v28 = vpack.c.bf16 %v576_v22, %v576_v22  ;;  %776 = vst.msk [vmem:[#allocation3 + $0xd0] sm:$0xff] %vm749_vm3, %v4368_v1 }
 0x10f   : > { %v682_v29 = vpack.c.bf16 %v616_v23, %v616_v23  ;;  %v635_v30 = vpack.c.bf16 %v498_v26, %v498_v26  ;;  %777 = vst.msk [vmem:[#allocation3 + $0xd8] sm:$0xff] %vm749_vm3, %v4368_v1 }
 0x110   : > { %v651_v31 = vpack.c.bf16 %v538_v27, %v538_v27  ;;  %731 = vst.msk [vmem:[#allocation2 + $0xb8] sm:$0xf] %vm684_vm2, %v666_v28 }
 0x111   : > { %747 = vst.msk [vmem:[#allocation2 + $0xf8] sm:$0xf] %vm684_vm2, %v682_v29 }
 0x112   : > { %700 = vst.msk [vmem:[#allocation2 + $0x3c] sm:$0xf] %vm684_vm2, %v635_v30 }
 0x113   : > { %716 = vst.msk [vmem:[#allocation2 + $0x7c] sm:$0xf] %vm684_vm2, %v651_v31  ;;  %v577_v32 = vpop.f32.mrf.mxu2 }
 0x114   : > { %v617_v33 = vpop.f32.mrf.mxu3  ;;  %v578_v35 = vadd.f32 %v4651_v34, %v577_v32  ;;  %778 = vst.msk [vmem:[#allocation3 + $0xe0] sm:$0xff] %vm749_vm3, %v4368_v1 }
 0x115   : > { %v618_v36 = vadd.f32 %v4651_v34, %v617_v33  ;;  %779 = vst.msk [vmem:[#allocation3 + $0xe8] sm:$0xff] %vm749_vm3, %v4368_v1 }
 0x116   : > { %v667_v37 = vpack.c.bf16 %v578_v35, %v578_v35  ;;  %780 = vst.msk [vmem:[#allocation3 + $0xf0] sm:$0xff] %vm749_vm3, %v4368_v1 }
 0x117   : > { %v683_v38 = vpack.c.bf16 %v618_v36, %v618_v36  ;;  %781 = vst.msk [vmem:[#allocation3 + $0xf8] sm:$0xff] %vm749_vm3, %v4368_v1 }
 0x118   : > { %732 = vst.msk [vmem:[#allocation2 + $0xbc] sm:$0xf] %vm684_vm2, %v667_v37 }
 0x119   : > { %748 = vst.msk [vmem:[#allocation2 + $0xfc] sm:$0xf] %vm684_vm2, %v683_v38 }
 0x11a   : > { %782 = vst.msk [vmem:[#allocation3 + $0x100] sm:$0xff] %vm749_vm3, %v4368_v1 }
 0x11b   : > { %783 = vst.msk [vmem:[#allocation3 + $0x108] sm:$0xff] %vm749_vm3, %v4368_v1 }
 0x11c   : > { %784 = vst.msk [vmem:[#allocation3 + $0x110] sm:$0xff] %vm749_vm3, %v4368_v1 }
 0x11d   : > { %785 = vst.msk [vmem:[#allocation3 + $0x118] sm:$0xff] %vm749_vm3, %v4368_v1 }
 0x11e   : > { %786 = vst.msk [vmem:[#allocation3 + $0x120] sm:$0xff] %vm749_vm3, %v4368_v1 }
 0x11f   : > { %787 = vst.msk [vmem:[#allocation3 + $0x128] sm:$0xff] %vm749_vm3, %v4368_v1 }
 0x120   : > { %788 = vst.msk [vmem:[#allocation3 + $0x130] sm:$0xff] %vm749_vm3, %v4368_v1 }
 0x121   : > { %789 = vst.msk [vmem:[#allocation3 + $0x138] sm:$0xff] %vm749_vm3, %v4368_v1 }
 0x122   : > { %790 = vst.msk [vmem:[#allocation3 + $0x140] sm:$0xff] %vm749_vm3, %v4368_v1 }
 0x123   : > { %791 = vst.msk [vmem:[#allocation3 + $0x148] sm:$0xff] %vm749_vm3, %v4368_v1 }
 0x124   : > { %792 = vst.msk [vmem:[#allocation3 + $0x150] sm:$0xff] %vm749_vm3, %v4368_v1 }
 0x125   : > { %793 = vst.msk [vmem:[#allocation3 + $0x158] sm:$0xff] %vm749_vm3, %v4368_v1 }
 0x126   : > { %794 = vst.msk [vmem:[#allocation3 + $0x160] sm:$0xff] %vm749_vm3, %v4368_v1 }
 0x127   : > { %795 = vst.msk [vmem:[#allocation3 + $0x168] sm:$0xff] %vm749_vm3, %v4368_v1 }
 0x128   : > { %796 = vst.msk [vmem:[#allocation3 + $0x170] sm:$0xff] %vm749_vm3, %v4368_v1 }
 0x129   : > { %797 = vst.msk [vmem:[#allocation3 + $0x178] sm:$0xff] %vm749_vm3, %v4368_v1 }
 0x12a   : > { %798 = vst.msk [vmem:[#allocation3 + $0x180] sm:$0xff] %vm749_vm3, %v4368_v1 }
 0x12b   : > { %799 = vst.msk [vmem:[#allocation3 + $0x188] sm:$0xff] %vm749_vm3, %v4368_v1 }
 0x12c   : > { %800 = vst.msk [vmem:[#allocation3 + $0x190] sm:$0xff] %vm749_vm3, %v4368_v1 }
 0x12d   : > { %801 = vst.msk [vmem:[#allocation3 + $0x198] sm:$0xff] %vm749_vm3, %v4368_v1 }
 0x12e   : > { %802 = vst.msk [vmem:[#allocation3 + $0x1a0] sm:$0xff] %vm749_vm3, %v4368_v1 }
 0x12f   : > { %803 = vst.msk [vmem:[#allocation3 + $0x1a8] sm:$0xff] %vm749_vm3, %v4368_v1 }
 0x130   : > { %804 = vst.msk [vmem:[#allocation3 + $0x1b0] sm:$0xff] %vm749_vm3, %v4368_v1 }
 0x131   : > { %805 = vst.msk [vmem:[#allocation3 + $0x1b8] sm:$0xff] %vm749_vm3, %v4368_v1 }
 0x132   : > { %806 = vst.msk [vmem:[#allocation3 + $0x1c0] sm:$0xff] %vm749_vm3, %v4368_v1 }
 0x133   : > { %807 = vst.msk [vmem:[#allocation3 + $0x1c8] sm:$0xff] %vm749_vm3, %v4368_v1 }
 0x134   : > { %808 = vst.msk [vmem:[#allocation3 + $0x1d0] sm:$0xff] %vm749_vm3, %v4368_v1 }
 0x135   : > { %809 = vst.msk [vmem:[#allocation3 + $0x1d8] sm:$0xff] %vm749_vm3, %v4368_v1 }
 0x136   : > { %810 = vst.msk [vmem:[#allocation3 + $0x1e0] sm:$0xff] %vm749_vm3, %v4368_v1 }
 0x137   : > { %811 = vst.msk [vmem:[#allocation3 + $0x1e8] sm:$0xff] %vm749_vm3, %v4368_v1 }
 0x138   : > { %812 = vst.msk [vmem:[#allocation3 + $0x1f0] sm:$0xff] %vm749_vm3, %v4368_v1 }
 0x139   : > { %813 = vst.msk [vmem:[#allocation3 + $0x1f8] sm:$0xff] %vm749_vm3, %v4368_v1 }
 0x13a PF: > { %v864_v34 = vld [vmem:[%s7092_s3] sm:$0x3]  ;;  %vm918_vm4 = vcmask 1041408   ;;  %s3802_s11 = sshll.u32 %s4416_s25, 8  ;;  %vm869_vm5 = vcmask 31744   ;;  %vm1251_vm6 = vcmask 15360  }
 0x13b   : > { %v920_v39 = vsel %vm918_vm4, %v864_v34, 0  ;;  %s4916_s14 = scalar_lea.vmem %s7089_s0, %s3802_s11  ;;  %v4975_v28 = vld [vmem:[%s7093_s4] ss:$0 sm:$0xff]  ;;  %s4369_s17 = smov 126  }
 0x13c   : > { %4081 = vmatpush.bf16.msra.mxu1 %v920_v39  ;;  %4083 = vmatpush.bf16.msra.mxu3 %v920_v39  ;;  %v822_v40 = vld [vmem:[%s4916_s14 + $0x30] sm:$0xff]  ;;  %v823_v41 = vld [vmem:[%s4916_s14 + $0x38] sm:$0xff]  ;;  %v816_v48 = vld [vmem:[%s4916_s14] sm:$0xff]  ;;  %p4011_p4 = scmp.ne.s32.totalorder %s4416_s25, 1 }
 0x13d   : > { %v838_v42 = vld [vmem:[%s4916_s14 + $0xb0] sm:$0xff]  ;;  %v851_v43 = vpack.c.bf16 %v823_v41, %v822_v40  ;;  %v839_v44 = vld [vmem:[%s4916_s14 + $0xb8] sm:$0xff]  ;;  %4082 = vmatpush.bf16.msra.mxu2 %v920_v39  ;;  %929 = vmatpush.bf16.msra.mxu0 %v920_v39  ;;  %v817_v49 = vld [vmem:[%s4916_s14 + $0x8] sm:$0xff] }
 0x13e   : > { %v859_v45 = vpack.c.bf16 %v839_v44, %v838_v42  ;;  %v830_v46 = vld [vmem:[%s4916_s14 + $0x70] sm:$0xff]  ;;  %v831_v47 = vld [vmem:[%s4916_s14 + $0x78] sm:$0xff]  ;;  %v848_v51 = vpack.c.bf16 %v817_v49, %v816_v48  ;;  %v824_v52 = vld [vmem:[%s4916_s14 + $0x40] sm:$0xff] }
 0x13f   : > { %3806 = vmatmul.msk.bf16.vlgmr.msra.gmra.mxu1 %vm869_vm5, %v851_v43  ;;  %v855_v50 = vpack.c.bf16 %v831_v47, %v830_v46  ;;  %v825_v53 = vld [vmem:[%s4916_s14 + $0x48] sm:$0xff]  ;;  %v840_v54 = vld [vmem:[%s4916_s14 + $0xc0] sm:$0xff]  ;;  %v818_v59 = vld [vmem:[%s4916_s14 + $0x10] sm:$0xff] }
 0x140   : > { %3814 = vmatmul.msk.bf16.vlgmr.msra.gmra.mxu3 %vm869_vm5, %v859_v45  ;;  %3803 = vmatmul.msk.bf16.vlgmr.msra.gmra.mxu0 %vm869_vm5, %v848_v51  ;;  %v841_v55 = vld [vmem:[%s4916_s14 + $0xc8] sm:$0xff]  ;;  %v832_v56 = vld [vmem:[%s4916_s14 + $0x80] sm:$0xff]  ;;  %v852_v57 = vpack.c.bf16 %v825_v53, %v824_v52  ;;  %v819_v60 = vld [vmem:[%s4916_s14 + $0x18] sm:$0xff] }
 0x141   : > { %3810 = vmatmul.msk.bf16.vlgmr.msra.gmra.mxu2 %vm869_vm5, %v855_v50  ;;  %v833_v58 = vld [vmem:[%s4916_s14 + $0x88] sm:$0xff]  ;;  %v860_v61 = vpack.c.bf16 %v841_v55, %v840_v54  ;;  %v849_v63 = vpack.c.bf16 %v819_v60, %v818_v59  ;;  %v826_v0 = vld [vmem:[%s4916_s14 + $0x50] sm:$0xff]  ;;  %v827_v1 = vld [vmem:[%s4916_s14 + $0x58] sm:$0xff] }
 0x142   : > { %v856_v62 = vpack.c.bf16 %v833_v58, %v832_v56  ;;  %v842_v2 = vld [vmem:[%s4916_s14 + $0xd0] sm:$0xff]  ;;  %v843_v3 = vld [vmem:[%s4916_s14 + $0xd8] sm:$0xff]  ;;  %v853_v5 = vpack.c.bf16 %v827_v1, %v826_v0  ;;  %v820_v7 = vld [vmem:[%s4916_s14 + $0x20] sm:$0xff] }
 0x143   : > { %v834_v4 = vld [vmem:[%s4916_s14 + $0x90] sm:$0xff]  ;;  %v835_v6 = vld [vmem:[%s4916_s14 + $0x98] sm:$0xff]  ;;  %v821_v8 = vld [vmem:[%s4916_s14 + $0x28] sm:$0xff]  ;;  %v861_v9 = vpack.c.bf16 %v843_v3, %v842_v2 }
 0x144   : > { %v857_v10 = vpack.c.bf16 %v835_v6, %v834_v4  ;;  %v850_v11 = vpack.c.bf16 %v821_v8, %v820_v7  ;;  %v828_v12 = vld [vmem:[%s4916_s14 + $0x60] sm:$0xff]  ;;  %v829_v13 = vld [vmem:[%s4916_s14 + $0x68] sm:$0xff]  ;;  %v846_v21 = vld [vmem:[%s4916_s14 + $0xf0] sm:$0xff] }
 0x145   : > { %v844_v14 = vld [vmem:[%s4916_s14 + $0xe0] sm:$0xff]  ;;  %v845_v15 = vld [vmem:[%s4916_s14 + $0xe8] sm:$0xff]  ;;  %v854_v16 = vpack.c.bf16 %v829_v13, %v828_v12  ;;  %v847_v22 = vld [vmem:[%s4916_s14 + $0xf8] sm:$0xff] }
 0x146   : > { %v836_v17 = vld [vmem:[%s4916_s14 + $0xa0] sm:$0xff]  ;;  %v837_v18 = vld [vmem:[%s4916_s14 + $0xa8] sm:$0xff]  ;;  %v862_v19 = vpack.c.bf16 %v845_v15, %v844_v14  ;;  %v863_v23 = vpack.c.bf16 %v847_v22, %v846_v21 }
 0x147   : > { %v858_v20 = vpack.c.bf16 %v837_v18, %v836_v17 }
 0x14f   : > { %3807 = vmatmul.msk.bf16.gmra.mxu1 %vm869_vm5, %v852_v57 }
 0x150   : > { %3815 = vmatmul.msk.bf16.gmra.mxu3 %vm869_vm5, %v860_v61  ;;  %3804 = vmatmul.msk.bf16.gmra.mxu0 %vm869_vm5, %v849_v63 }
 0x151   : > { %3811 = vmatmul.msk.bf16.gmra.mxu2 %vm869_vm5, %v856_v62 }
 0x15f   : > { %3808 = vmatmul.msk.bf16.gmra.mxu1 %vm869_vm5, %v853_v5 }
 0x160   : > { %3816 = vmatmul.msk.bf16.gmra.mxu3 %vm869_vm5, %v861_v9  ;;  %3805 = vmatmul.msk.bf16.gmra.mxu0 %vm869_vm5, %v850_v11 }
 0x161   : > { %3812 = vmatmul.msk.bf16.gmra.mxu2 %vm869_vm5, %v857_v10 }
 0x16f   : > { %3809 = vmatmul.msk.bf16.gmra.mxu1 %vm869_vm5, %v854_v16 }
 0x170   : > { %3817 = vmatmul.msk.bf16.gmra.mxu3 %vm869_vm5, %v862_v19 }
 0x171   : > { %3813 = vmatmul.msk.bf16.gmra.mxu2 %vm869_vm5, %v858_v20 }
 0x180   : > { %3818 = vmatmul.msk.bf16.gmra.mxu3 %vm869_vm5, %v863_v23 }
 0x1bc   : > { %v4966_v24 = vpop.f32.mrf.mxu1 }
 0x1bd   : > { %v4980_v32 = vpop.f32.mrf.mxu0  ;;  %v947_v19 = vadd.f32 %v4975_v28, %v4966_v24 }
 0x1c3   : > { %v4968_v25 = vpop.f32.mrf.mxu3 }
 0x1c4   : > { %v4970_v26 = vpop.f32.mrf.mxu1  ;;  %v966_v27 = vpop.f32.mrf.mxu2 }
 0x1c5   : > { %v967_v31 = vadd.f32 %v4975_v28, %v966_v27  ;;  %v4989_v42 = vpop.f32.mrf.mxu0  ;;  %v949_v22 = vadd.f32 %v4975_v28, %v4970_v26 }
 0x1cb   : > { %v4977_v29 = vpop.f32.mrf.mxu3 }
 0x1cc   : > { %v951_v30 = vpop.f32.mrf.mxu1  ;;  %v968_v33 = vpop.f32.mrf.mxu2 }
 0x1cd   : > { %v969_v35 = vadd.f32 %v4975_v28, %v968_v33  ;;  %v952_v38 = vadd.f32 %v4975_v28, %v951_v30  ;;  %v936_v47 = vpop.f32.mrf.mxu0 }
 0x1ce   : > { %v937_v20 = vadd.f32 %v4975_v28, %v936_v47 }
 0x1cf   : > { %v1018_v36 = vpack.c.bf16 %v969_v35, %v967_v31 }
 0x1d1   : > { %2682 = vrot.lane.b32.xlu0 %v1018_v36, %s4369_s17  ;;  %v1370_v37 = vsel %vm1251_vm6, %v1018_v36, 0 }
 0x1d2   : > { %1396 = vmatpush.bf16.xpose.msrb.mxu1 %v1370_v37  ;;  %v1014_v37 = vpack.c.bf16 %v949_v22, %v947_v19 }
 0x1d3   : > { %v991_v34 = vpop.f32.mrf.mxu3 }
 0x1d4   : > { %v953_v39 = vpop.f32.mrf.mxu1  ;;  %v4987_v41 = vpop.f32.mrf.mxu2  ;;  %v992_v15 = vadd.f32 %v4975_v28, %v991_v34 }
 0x1d5   : > { %v954_v40 = vadd.f32 %v4975_v28, %v953_v39  ;;  %v938_v54 = vpop.f32.mrf.mxu0 }
 0x1d6   : > { %v939_v21 = vadd.f32 %v4975_v28, %v938_v54 }
 0x1d7   : > { %v1015_v43 = vpack.c.bf16 %v954_v40, %v952_v38  ;;  %v1358_v40 = vsel %vm1251_vm6, %v1014_v37, 0 }
 0x1d8   : > { %v1012_v24 = vpack.c.bf16 %v939_v21, %v937_v20  ;;  %v4055_v20 = vld [vmem:[#allocation2 + $0x48] sm:$0xff] }
 0x1d9   : > { %2676 = vrot.lane.b32.xlu2 %v1015_v43, %s4369_s17  ;;  %v1361_v27 = vsel %vm1251_vm6, %v1015_v43, 0  ;;  %v972_v43 = vadd.f32 %v4975_v28, %v4987_v41  ;;  %v987_v41 = vadd.f32 %v4975_v28, %v4968_v25 }
 0x1da   : > { %v1352_v54 = vsel %vm1251_vm6, %v1012_v24, 0 }
 0x1db   : > { %v993_v44 = vpop.f32.mrf.mxu3 }
 0x1dc   : > { %v956_v45 = vpop.f32.mrf.mxu1  ;;  %v4992_v46 = vpop.f32.mrf.mxu2  ;;  %v994_v13 = vadd.f32 %v4975_v28, %v993_v44 }
 0x1dd   : > { %v957_v48 = vadd.f32 %v4975_v28, %v956_v45  ;;  %v941_v61 = vpop.f32.mrf.mxu0  ;;  %v974_v44 = vadd.f32 %v4975_v28, %v4992_v46 }
 0x1de   : > { %v942_v10 = vadd.f32 %v4975_v28, %v941_v61  ;;  %v1023_v17 = vpack.c.bf16 %v994_v13, %v992_v15  ;;  %v4049_v61 = vld [vmem:[#allocation2 + $0x18] sm:$0xff] }
 0x1df   : > { %v1019_v47 = vpack.c.bf16 %v974_v44, %v972_v43  ;;  %v4053_v15 = vld [vmem:[#allocation2 + $0x38] sm:$0xff]  ;;  %v4059_v44 = vld [vmem:[#allocation2 + $0x68] sm:$0xff] }
 0x1e0   : > { %v1385_v25 = vsel %vm1251_vm6, %v1023_v17, 0 }
 0x1e3   : > { %v996_v49 = vpop.f32.mrf.mxu3 }
 0x1e4   : > { %v958_v50 = vpop.f32.mrf.mxu1  ;;  %v976_v53 = vpop.f32.mrf.mxu2  ;;  %v997_v6 = vadd.f32 %v4975_v28, %v996_v49 }
 0x1e5   : > { %v959_v51 = vadd.f32 %v4975_v28, %v958_v50  ;;  %v943_v8 = vpop.f32.mrf.mxu0  ;;  %v977_v26 = vadd.f32 %v4975_v28, %v976_v53  ;;  %v989_v50 = vadd.f32 %v4975_v28, %v4977_v29  ;;  %v934_v53 = vadd.f32 %v4975_v28, %v4989_v42 }
 0x1e6   : > { %v944_v12 = vadd.f32 %v4975_v28, %v943_v8 }
 0x1e7   : > { %v1016_v52 = vpack.c.bf16 %v959_v51, %v957_v48  ;;  %v1022_v46 = vpack.c.bf16 %v989_v50, %v987_v41  ;;  %v4060_v50 = vld [vmem:[#allocation2 + $0x70] sm:$0xff] }
 0x1e8   : > { %v1013_v16 = vpack.c.bf16 %v944_v12, %v942_v10 }
 0x1e9   : > { %2678 = vrot.lane.b32.xlu1 %v1016_v52, %s4369_s17  ;;  %v1364_v11 = vsel %vm1251_vm6, %v1016_v52, 0  ;;  %v932_v52 = vadd.f32 %v4975_v28, %v4980_v32  ;;  %v4047_v32 = vld [vmem:[#allocation2 + $0x8] sm:$0xff] }
 0x1ea   : > { %v1355_v48 = vsel %vm1251_vm6, %v1013_v16, 0 }
 0x1eb   : > { %v998_v55 = vpop.f32.mrf.mxu3  ;;  %v1011_v29 = vpack.c.bf16 %v934_v53, %v932_v52  ;;  %v4061_v53 = vld [vmem:[#allocation2 + $0x78] sm:$0xff] }
 0x1ec   : > { %v961_v56 = vpop.f32.mrf.mxu1  ;;  %v978_v57 = vpop.f32.mrf.mxu2  ;;  %v999_v1 = vadd.f32 %v4975_v28, %v998_v55 }
 0x1ed   : > { %v962_v58 = vadd.f32 %v4975_v28, %v961_v56  ;;  %v979_v34 = vadd.f32 %v4975_v28, %v978_v57  ;;  %v1349_v55 = vsel %vm1251_vm6, %v1011_v29, 0  ;;  %v4046_v56 = vld [vmem:[#allocation2] sm:$0xff]  ;;  %v1382_v57 = vsel %vm1251_vm6, %v1022_v46, 0 }
 0x1ee   : > { %v1024_v9 = vpack.c.bf16 %v999_v1, %v997_v6 }
 0x1ef   : > { %v1020_v45 = vpack.c.bf16 %v979_v34, %v977_v26  ;;  %v4058_v26 = vld [vmem:[#allocation2 + $0x60] sm:$0xff] }
 0x1f0   : > { %v1388_v51 = vsel %vm1251_vm6, %v1024_v9, 0 }
 0x1f1   : > { %v1376_v42 = vsel %vm1251_vm6, %v1020_v45, 0 }
 0x1f3   : > { %v1001_v59 = vpop.f32.mrf.mxu3 }
 0x1f4   : > { %v963_v60 = vpop.f32.mrf.mxu1  ;;  %v1002_v3 = vadd.f32 %v4975_v28, %v1001_v59  ;;  %v981_v5 = vpop.f32.mrf.mxu2  ;;  %v1373_v59 = vsel %vm1251_vm6, %v1019_v47, 0 }
 0x1f5   : > { %v964_v62 = vadd.f32 %v4975_v28, %v963_v60  ;;  %v982_v23 = vadd.f32 %v4975_v28, %v981_v5  ;;  %v4048_v60 = vld [vmem:[#allocation2 + $0x10] sm:$0xff] }
 0x1f7   : > { %v1017_v63 = vpack.c.bf16 %v964_v62, %v962_v58 }
 0x1f9   : > { %2680 = vrot.lane.b32.xlu0 %v1017_v63, %s4369_s17  ;;  %v1367_v0 = vsel %vm1251_vm6, %v1017_v63, 0 }
 0x1fa   : > { %1397 = vmatpush.bf16.xpose.msrb.mxu1 %v1367_v0  ;;  %v4050_v0 = vld [vmem:[#allocation2 + $0x20] sm:$0xff] }
 0x1fb   : > { %v1003_v2 = vpop.f32.mrf.mxu3 }
 0x1fc   : > { %v1004_v4 = vadd.f32 %v4975_v28, %v1003_v2  ;;  %v983_v18 = vpop.f32.mrf.mxu2  ;;  %v4051_v2 = vld [vmem:[#allocation2 + $0x28] sm:$0xff] }
 0x1fd   : > { %v984_v30 = vadd.f32 %v4975_v28, %v983_v18 }
 0x1fe   : > { %v1025_v7 = vpack.c.bf16 %v1004_v4, %v1002_v3 }
 0x1ff   : > { %v1021_v36 = vpack.c.bf16 %v984_v30, %v982_v23  ;;  %v4056_v23 = vld [vmem:[#allocation2 + $0x50] sm:$0xff] }
 0x200   : > { %2696 = vrot.lane.b32.xlu2 %v1025_v7, %s4369_s17  ;;  %v1391_v49 = vsel %vm1251_vm6, %v1025_v7, 0 }
 0x201   : > { %2694 = vrot.lane.b32.xlu0 %v1024_v9, %s4369_s17  ;;  %v4052_v9 = vld [vmem:[#allocation2 + $0x30] sm:$0xff] }
 0x202   : > { %1398 = vmatpush.bf16.xpose.msrb.mxu1 %v1364_v11 }
 0x203   : > { %v1006_v14 = vpop.f32.mrf.mxu3 }
 0x204   : > { %v1007_v33 = vadd.f32 %v4975_v28, %v1006_v14 }
 0x208   : > { %2692 = vrot.lane.b32.xlu2 %v1023_v17, %s4369_s17  ;;  %v4054_v17 = vld [vmem:[#allocation2 + $0x40] sm:$0xff] }
 0x209   : > { %2672 = vrot.lane.b32.xlu0 %v1013_v16, %s4369_s17 }
 0x20a   : > { %1399 = vmatpush.bf16.xpose.msrb.mxu1 %v1361_v27 }
 0x20b   : > { %v1008_v31 = vpop.f32.mrf.mxu3 }
 0x20c   : > { %v1009_v35 = vadd.f32 %v4975_v28, %v1008_v31  ;;  %v1379_v28 = vsel %vm1251_vm6, %v1021_v36, 0 }
 0x20e   : > { %v1026_v38 = vpack.c.bf16 %v1009_v35, %v1007_v33  ;;  %v4057_v33 = vld [vmem:[#allocation2 + $0x58] sm:$0xff] }
 0x210   : > { %2698 = vrot.lane.b32.xlu1 %v1026_v38, %s4369_s17  ;;  %v1394_v39 = vsel %vm1251_vm6, %v1026_v38, 0  ;;  %2670 = vrot.lane.b32.xlu2 %v1012_v24, %s4369_s17 }
 0x211   : > { %1565 = vmatpush.bf16.xpose.msrb.mxu2 %v1394_v39  ;;  %2688 = vrot.lane.b32.xlu0 %v1021_v36, %s4369_s17 }
 0x212   : > { %1400 = vmatpush.bf16.xpose.msrb.mxu1 %v1358_v40 }
 0x218   : > { %2674 = vrot.lane.b32.xlu1 %v1014_v37, %s4369_s17  ;;  %2686 = vrot.lane.b32.xlu2 %v1020_v45, %s4369_s17 }
 0x219   : > { %1566 = vmatpush.bf16.xpose.msrb.mxu2 %v1391_v49  ;;  %2684 = vrot.lane.b32.xlu0 %v1019_v47, %s4369_s17 }
 0x21a   : > { %1401 = vmatpush.bf16.xpose.msrb.mxu1 %v1355_v48 }
 0x220   : > { %2690 = vrot.lane.b32.xlu1 %v1022_v46, %s4369_s17 }
 0x221   : > { %1567 = vmatpush.bf16.xpose.msrb.mxu2 %v1388_v51 }
 0x222   : > { %1402 = vmatpush.bf16.xpose.msrb.mxu1 %v1352_v54 }
 0x228   : > { %2668 = vrot.lane.b32.xlu1 %v1011_v29, %s4369_s17 }
 0x229   : > { %1568 = vmatpush.bf16.xpose.msrb.mxu2 %v1385_v25 }
 0x22a   : > { %1403 = vmatpush.bf16.xpose.msrb.mxu1 %v1349_v55 }
 0x231   : > { %1569 = vmatpush.bf16.xpose.msrb.mxu2 %v1382_v57  ;;  %3947 = vmatmul.msk.bf16.vlgmr.msrb.gmra.mxu1 %vm1251_vm6, %v4046_v56 }
 0x233   : > { %v2677_v1 = vpop.permute.xlu2 %2676 }
 0x239   : > { %1570 = vmatpush.bf16.xpose.msrb.mxu2 %v1379_v28 }
 0x241   : > { %1571 = vmatpush.bf16.xpose.msrb.mxu2 %v1376_v42  ;;  %3948 = vmatmul.msk.bf16.gmra.mxu1 %vm1251_vm6, %v4047_v32 }
 0x243   : > { %v2683_v58 = vpop.permute.xlu0 %2682 }
 0x244   : > { %2716 = vmatpush.bf16.msrb.mxu3 %v2683_v58  ;;  %v4063_v58 = vld [vmem:[#allocation2 + $0x88] sm:$0xff] }
 0x249   : > { %1572 = vmatpush.bf16.xpose.msrb.mxu2 %v1373_v59 }
 0x250   : > { %3979 = vmatmul.msk.bf16.vlgmr.msrb.gmra.mxu2 %vm1251_vm6, %v4046_v56  ;;  %v4062_v56 = vld [vmem:[#allocation2 + $0x80] sm:$0xff] }
 0x251   : > { %3949 = vmatmul.msk.bf16.gmra.mxu1 %vm1251_vm6, %v4048_v60 }
 0x25a   : > { %v2697_v3 = vpop.permute.xlu2 %2696 }
 0x25b   : > { %v2679_v63 = vpop.permute.xlu1 %2678 }
 0x260   : > { %3980 = vmatmul.msk.bf16.gmra.mxu2 %vm1251_vm6, %v4047_v32 }
 0x261   : > { %3950 = vmatmul.msk.bf16.gmra.mxu1 %vm1251_vm6, %v4049_v61 }
 0x262   : > { %v2693_v6 = vpop.permute.xlu2 %2692 }
 0x26a   : > { %v2671_v10 = vpop.permute.xlu2 %2670 }
 0x26b   : > { %v2681_v62 = vpop.permute.xlu0 %2680 }
 0x26c   : > { %2717 = vmatpush.bf16.msrb.mxu3 %v2681_v62 }
 0x270   : > { %3981 = vmatmul.msk.bf16.gmra.mxu2 %vm1251_vm6, %v4048_v60  ;;  %2718 = vmatpush.bf16.msrb.mxu3 %v2679_v63  ;;  %v4064_v63 = vld [vmem:[#allocation2 + $0x90] sm:$0xff] }
 0x271   : > { %3951 = vmatmul.msk.bf16.gmra.mxu1 %vm1251_vm6, %v4050_v0 }
 0x272   : > { %v2687_v13 = vpop.permute.xlu2 %2686 }
 0x273   : > { %v2695_v4 = vpop.permute.xlu0 %2694 }
 0x274   : > { %2719 = vmatpush.bf16.msrb.mxu3 %v2677_v1 }
 0x27b   : > { %v2673_v7 = vpop.permute.xlu0 %2672 }
 0x280   : > { %3982 = vmatmul.msk.bf16.gmra.mxu2 %vm1251_vm6, %v4049_v61 }
 0x281   : > { %3952 = vmatmul.msk.bf16.gmra.mxu1 %vm1251_vm6, %v4051_v2 }
 0x282   : > { %v2699_v5 = vpop.permute.xlu1 %2698 }
 0x283   : > { %2885 = vmatpush.bf16.msrb.mxu0 %v2699_v5  ;;  %v2689_v12 = vpop.permute.xlu0 %2688 }
 0x287   : > { %2886 = vmatpush.bf16.msrb.mxu0 %v2697_v3 }
 0x28a   : > { %v2675_v8 = vpop.permute.xlu1 %2674 }
 0x28b   : > { %2720 = vmatpush.bf16.msrb.mxu3 %v2675_v8  ;;  %2887 = vmatpush.bf16.msrb.mxu0 %v2695_v4  ;;  %v2685_v16 = vpop.permute.xlu0 %2684  ;;  %v4065_v4 = vld [vmem:[#allocation2 + $0x98] sm:$0xff] }
 0x28f   : > { %2721 = vmatpush.bf16.msrb.mxu3 %v2673_v7  ;;  %2888 = vmatpush.bf16.msrb.mxu0 %v2693_v6 }
 0x290   : > { %3983 = vmatmul.msk.bf16.gmra.mxu2 %vm1251_vm6, %v4050_v0 }
 0x291   : > { %3953 = vmatmul.msk.bf16.gmra.mxu1 %vm1251_vm6, %v4052_v9 }
 0x292   : > { %v2691_v11 = vpop.permute.xlu1 %2690 }
 0x293   : > { %2722 = vmatpush.bf16.msrb.mxu3 %v2671_v10  ;;  %2889 = vmatpush.bf16.msrb.mxu0 %v2691_v11 }
 0x297   : > { %2890 = vmatpush.bf16.msrb.mxu0 %v2689_v12 }
 0x29a   : > { %v2669_v14 = vpop.permute.xlu1 %2668 }
 0x29b   : > { %2723 = vmatpush.bf16.msrb.mxu3 %v2669_v14  ;;  %2891 = vmatpush.bf16.msrb.mxu0 %v2687_v13  ;;  %v4067_v14 = vld [vmem:[#allocation2 + $0xa8] sm:$0xff] }
 0x29f   : > { %2892 = vmatpush.bf16.msrb.mxu0 %v2685_v16 }
 0x2a0   : > { %3984 = vmatmul.msk.bf16.gmra.mxu2 %vm1251_vm6, %v4051_v2 }
 0x2a1   : > { %3954 = vmatmul.msk.bf16.gmra.mxu1 %vm1251_vm6, %v4053_v15 }
 0x2ae   : > { %v5073_v18 = vpop.f32.mrf.mxu1 }
 0x2af   : > { %7262 = vst [vmem:[#allocation4_spill] sm:$0xff] %v5073_v18 }
 0x2b0   : > { %3985 = vmatmul.msk.bf16.gmra.mxu2 %vm1251_vm6, %v4052_v9  ;;  %v4066_v9 = vld [vmem:[#allocation2 + $0xa0] sm:$0xff] }
 0x2b1   : > { %3955 = vmatmul.msk.bf16.gmra.mxu1 %vm1251_vm6, %v4054_v17 }
 0x2b6   : > { %v5077_v19 = vpop.f32.mrf.mxu1 }
 0x2be   : > { %v5079_v21 = vpop.f32.mrf.mxu1 }
 0x2bf   : > { %7263 = vst [vmem:[#allocation5_spill] sm:$0xff] %v5079_v21 }
 0x2c0   : > { %3986 = vmatmul.msk.bf16.gmra.mxu2 %vm1251_vm6, %v4053_v15 }
 0x2c1   : > { %3956 = vmatmul.msk.bf16.gmra.mxu1 %vm1251_vm6, %v4055_v20 }
 0x2c6   : > { %v5083_v22 = vpop.f32.mrf.mxu1 }
 0x2ce   : > { %v5085_v27 = vpop.f32.mrf.mxu1 }
 0x2d0   : > { %3987 = vmatmul.msk.bf16.gmra.mxu2 %vm1251_vm6, %v4054_v17 }
 0x2d1   : > { %3957 = vmatmul.msk.bf16.gmra.mxu1 %vm1251_vm6, %v4056_v23 }
 0x2d3   : > { %v5089_v30 = vpop.f32.mrf.mxu2 }
 0x2d4   : > { %7264 = vst [vmem:[#allocation6_spill] sm:$0xff] %v5089_v30 }
 0x2d6   : > { %v5091_v31 = vpop.f32.mrf.mxu1 }
 0x2d7   : > { %7265 = vst [vmem:[#allocation7_spill] sm:$0xff] %v5091_v31 }
 0x2db   : > { %v5093_v24 = vpop.f32.mrf.mxu2 }
 0x2dc   : > { %7266 = vst [vmem:[#allocation8_spill] sm:$0xff] %v5093_v24 }
 0x2de   : > { %v5095_v35 = vpop.f32.mrf.mxu1 }
 0x2e0   : > { %3988 = vmatmul.msk.bf16.gmra.mxu2 %vm1251_vm6, %v4055_v20 }
 0x2e1   : > { %3958 = vmatmul.msk.bf16.gmra.mxu1 %vm1251_vm6, %v4057_v33 }
 0x2e3   : > { %v5099_v36 = vpop.f32.mrf.mxu2 }
 0x2e4   : > { %7267 = vst [vmem:[#allocation9_spill] sm:$0xff] %v5099_v36 }
 0x2e6   : > { %v5101_v37 = vpop.f32.mrf.mxu1 }
 0x2eb   : > { %v5103_v38 = vpop.f32.mrf.mxu2 }
 0x2ec   : > { %7268 = vst [vmem:[#allocation10_spill] sm:$0xff] %v5103_v38 }
 0x2ee   : > { %v5105_v34 = vpop.f32.mrf.mxu1 }
 0x2f0   : > { %3989 = vmatmul.msk.bf16.gmra.mxu2 %vm1251_vm6, %v4056_v23  ;;  %v4068_v23 = vld [vmem:[#allocation2 + $0xb0] sm:$0xff] }
 0x2f1   : > { %3959 = vmatmul.msk.bf16.gmra.mxu1 %vm1251_vm6, %v4058_v26 }
 0x2f3   : > { %v5109_v39 = vpop.f32.mrf.mxu2 }
 0x2f4   : > { %7269 = vst [vmem:[#allocation11_spill] sm:$0xff] %v5109_v39 }
 0x2f6   : > { %v5111_v40 = vpop.f32.mrf.mxu1 }
 0x2fb   : > { %v5113_v43 = vpop.f32.mrf.mxu2 }
 0x2fc   : > { %7270 = vst [vmem:[#allocation12_spill] sm:$0xff] %v5113_v43 }
 0x2fe   : > { %v5115_v45 = vpop.f32.mrf.mxu1 }
 0x300   : > { %3990 = vmatmul.msk.bf16.gmra.mxu2 %vm1251_vm6, %v4057_v33 }
 0x301   : > { %3960 = vmatmul.msk.bf16.gmra.mxu1 %vm1251_vm6, %v4059_v44 }
 0x303   : > { %v5119_v47 = vpop.f32.mrf.mxu2 }
 0x304   : > { %7271 = vst [vmem:[#allocation13_spill] sm:$0xff] %v5119_v47 }
 0x306   : > { %v5121_v48 = vpop.f32.mrf.mxu1 }
 0x307   : > { %7272 = vst [vmem:[#allocation14_spill] sm:$0xff] %v5121_v48 }
 0x30b   : > { %v5123_v49 = vpop.f32.mrf.mxu2 }
 0x30c   : > { %7273 = vst [vmem:[#allocation15_spill] sm:$0xff] %v5123_v49 }
 0x30e   : > { %v5125_v41 = vpop.f32.mrf.mxu1 }
 0x30f   : > { %7274 = vst [vmem:[#allocation16_spill] sm:$0xff] %v5125_v41 }
 0x310   : > { %3991 = vmatmul.msk.bf16.gmra.mxu2 %vm1251_vm6, %v4058_v26 }
 0x311   : > { %3961 = vmatmul.msk.bf16.gmra.mxu1 %vm1251_vm6, %v4060_v50 }
 0x313   : > { %v5129_v46 = vpop.f32.mrf.mxu2 }
 0x314   : > { %7275 = vst [vmem:[#allocation17_spill] sm:$0xff] %v5129_v46 }
 0x316   : > { %v5131_v51 = vpop.f32.mrf.mxu1 }
 0x31b   : > { %v5133_v52 = vpop.f32.mrf.mxu2 }
 0x31c   : > { %7276 = vst [vmem:[#allocation18_spill] sm:$0xff] %v5133_v52 }
 0x31e   : > { %v5135_v54 = vpop.f32.mrf.mxu1 }
 0x320   : > { %3992 = vmatmul.msk.bf16.gmra.mxu2 %vm1251_vm6, %v4059_v44 }
 0x321   : > { %3962 = vmatmul.msk.bf16.gmra.mxu1 %vm1251_vm6, %v4061_v53 }
 0x323   : > { %v5139_v29 = vpop.f32.mrf.mxu2 }
 0x324   : > { %7277 = vst [vmem:[#allocation19_spill] sm:$0xff] %v5139_v29 }
 0x326   : > { %v5141_v25 = vpop.f32.mrf.mxu1 }
 0x32b   : > { %v5143_v55 = vpop.f32.mrf.mxu2 }
 0x32c   : > { %7278 = vst [vmem:[#allocation20_spill] sm:$0xff] %v5143_v55 }
 0x32e   : > { %v5145_v57 = vpop.f32.mrf.mxu1 }
 0x330   : > { %3993 = vmatmul.msk.bf16.gmra.mxu2 %vm1251_vm6, %v4060_v50 }
 0x331   : > { %3963 = vmatmul.msk.bf16.gmra.mxu1 %vm1251_vm6, %v4062_v56 }
 0x333   : > { %v5149_v28 = vpop.f32.mrf.mxu2 }
 0x334   : > { %7279 = vst [vmem:[#allocation21_spill] sm:$0xff] %v5149_v28 }
 0x336   : > { %v5151_v32 = vpop.f32.mrf.mxu1 }
 0x33b   : > { %v5153_v42 = vpop.f32.mrf.mxu2 }
 0x33c   : > { %7280 = vst [vmem:[#allocation22_spill] sm:$0xff] %v5153_v42 }
 0x33e   : > { %v5155_v59 = vpop.f32.mrf.mxu1 }
 0x340   : > { %3994 = vmatmul.msk.bf16.gmra.mxu2 %vm1251_vm6, %v4061_v53  ;;  %v4069_v53 = vld [vmem:[#allocation2 + $0xb8] sm:$0xff] }
 0x341   : > { %3964 = vmatmul.msk.bf16.gmra.mxu1 %vm1251_vm6, %v4063_v58 }
 0x343   : > { %v5159_v60 = vpop.f32.mrf.mxu2 }
 0x344   : > { %7281 = vst [vmem:[#allocation23_spill] sm:$0xff] %v5159_v60 }
 0x346   : > { %v5161_v61 = vpop.f32.mrf.mxu1 }
 0x34b   : > { %v5163_v62 = vpop.f32.mrf.mxu2 }
 0x34c   : > { %7282 = vst [vmem:[#allocation24_spill] sm:$0xff] %v5163_v62  ;;  %v4075_v62 = vld [vmem:[#allocation2 + $0xe8] sm:$0xff] }
 0x34e   : > { %v5165_v0 = vpop.f32.mrf.mxu1 }
 0x34f   : > { %7283 = vst [vmem:[#allocation25_spill] sm:$0xff] %v5165_v0 }
 0x350   : > { %3995 = vmatmul.msk.bf16.gmra.mxu2 %vm1251_vm6, %v4062_v56 }
 0x351   : > { %3965 = vmatmul.msk.bf16.gmra.mxu1 %vm1251_vm6, %v4064_v63 }
 0x353   : > { %v5169_v1 = vpop.f32.mrf.mxu2 }
 0x354   : > { %7284 = vst [vmem:[#allocation26_spill] sm:$0xff] %v5169_v1 }
 0x356   : > { %v5171_v2 = vpop.f32.mrf.mxu1 }
 0x357   : > { %7285 = vst [vmem:[#allocation27_spill] sm:$0xff] %v5171_v2 }
 0x35b   : > { %v5173_v3 = vpop.f32.mrf.mxu2 }
 0x35c   : > { %7286 = vst [vmem:[#allocation28_spill] sm:$0xff] %v5173_v3  ;;  %v4074_v3 = vld [vmem:[#allocation2 + $0xe0] sm:$0xff] }
 0x35e   : > { %v5175_v5 = vpop.f32.mrf.mxu1 }
 0x35f   : > { %7287 = vst [vmem:[#allocation29_spill] sm:$0xff] %v5175_v5 }
 0x360   : > { %3996 = vmatmul.msk.bf16.gmra.mxu2 %vm1251_vm6, %v4063_v58 }
 0x361   : > { %3966 = vmatmul.msk.bf16.gmra.mxu1 %vm1251_vm6, %v4065_v4 }
 0x363   : > { %v5179_v6 = vpop.f32.mrf.mxu2 }
 0x364   : > { %7288 = vst [vmem:[#allocation30_spill] sm:$0xff] %v5179_v6 }
 0x366   : > { %v5181_v7 = vpop.f32.mrf.mxu1 }
 0x36b   : > { %v5183_v8 = vpop.f32.mrf.mxu2 }
 0x36c   : > { %7289 = vst [vmem:[#allocation31_spill] sm:$0xff] %v5183_v8  ;;  %v4073_v8 = vld [vmem:[#allocation2 + $0xd8] sm:$0xff] }
 0x36e   : > { %v5185_v10 = vpop.f32.mrf.mxu1 }
 0x370   : > { %3997 = vmatmul.msk.bf16.gmra.mxu2 %vm1251_vm6, %v4064_v63 }
 0x371   : > { %3967 = vmatmul.msk.bf16.gmra.mxu1 %vm1251_vm6, %v4066_v9 }
 0x373   : > { %v5189_v11 = vpop.f32.mrf.mxu2 }
 0x374   : > { %7290 = vst [vmem:[#allocation32_spill] sm:$0xff] %v5189_v11 }
 0x376   : > { %v5191_v12 = vpop.f32.mrf.mxu1 }
 0x37b   : > { %v5193_v13 = vpop.f32.mrf.mxu2 }
 0x37c   : > { %7291 = vst [vmem:[#allocation33_spill] sm:$0xff] %v5193_v13  ;;  %v4072_v13 = vld [vmem:[#allocation2 + $0xd0] sm:$0xff] }
 0x37e   : > { %v5195_v15 = vpop.f32.mrf.mxu1 }
 0x380   : > { %3998 = vmatmul.msk.bf16.gmra.mxu2 %vm1251_vm6, %v4065_v4 }
 0x381   : > { %3968 = vmatmul.msk.bf16.gmra.mxu1 %vm1251_vm6, %v4067_v14 }
 0x383   : > { %v5199_v16 = vpop.f32.mrf.mxu2 }
 0x384   : > { %7292 = vst [vmem:[#allocation34_spill] sm:$0xff] %v5199_v16 }
 0x386   : > { %v5201_v17 = vpop.f32.mrf.mxu1 }
 0x38b   : > { %v5203_v20 = vpop.f32.mrf.mxu2 }
 0x38c   : > { %7293 = vst [vmem:[#allocation35_spill] sm:$0xff] %v5203_v20  ;;  %v4071_v20 = vld [vmem:[#allocation2 + $0xc8] sm:$0xff] }
 0x38e   : > { %v5205_v33 = vpop.f32.mrf.mxu1 }
 0x390   : > { %3999 = vmatmul.msk.bf16.gmra.mxu2 %vm1251_vm6, %v4066_v9  ;;  %v4070_v9 = vld [vmem:[#allocation2 + $0xc0] sm:$0xff] }
 0x391   : > { %3969 = vmatmul.msk.bf16.gmra.mxu1 %vm1251_vm6, %v4068_v23 }
 0x393   : > { %v5209_v26 = vpop.f32.mrf.mxu2 }
 0x394   : > { %7294 = vst [vmem:[#allocation36_spill] sm:$0xff] %v5209_v26 }
 0x396   : > { %v5211_v44 = vpop.f32.mrf.mxu1 }
 0x39b   : > { %v5213_v50 = vpop.f32.mrf.mxu2 }
 0x39c   : > { %7295 = vst [vmem:[#allocation37_spill] sm:$0xff] %v5213_v50 }
 0x39e   : > { %v5215_v56 = vpop.f32.mrf.mxu1 }
 0x3a0   : > { %4000 = vmatmul.msk.bf16.gmra.mxu2 %vm1251_vm6, %v4067_v14 }
 0x3a1   : > { %3970 = vmatmul.msk.bf16.gmra.mxu1 %vm1251_vm6, %v4069_v53 }
 0x3a3   : > { %v5219_v58 = vpop.f32.mrf.mxu2 }
 0x3a4   : > { %7296 = vst [vmem:[#allocation38_spill] sm:$0xff] %v5219_v58 }
 0x3a6   : > { %v5221_v63 = vpop.f32.mrf.mxu1 }
 0x3a7   : > { %7297 = vst [vmem:[#allocation39_spill] sm:$0xff] %v5221_v63 }
 0x3ab   : > { %v5223_v4 = vpop.f32.mrf.mxu2 }
 0x3ac   : > { %7298 = vst [vmem:[#allocation40_spill] sm:$0xff] %v5223_v4 }
 0x3ae   : > { %v5225_v16 = vpop.f32.mrf.mxu1 }
 0x3af   : > { %7299 = vst [vmem:[#allocation41_spill] sm:$0xff] %v5225_v16 }
 0x3b0   : > { %4001 = vmatmul.msk.bf16.gmra.mxu2 %vm1251_vm6, %v4068_v23 }
 0x3b1   : > { %3971 = vmatmul.msk.bf16.gmra.mxu1 %vm1251_vm6, %v4070_v9 }
 0x3b3   : > { %v5229_v26 = vpop.f32.mrf.mxu2 }
 0x3b4   : > { %7300 = vst [vmem:[#allocation42_spill] sm:$0xff] %v5229_v26 }
 0x3b6   : > { %v5231_v50 = vpop.f32.mrf.mxu1 }
 0x3bb   : > { %v5233_v14 = vpop.f32.mrf.mxu2 }
 0x3bc   : > { %7301 = vst [vmem:[#allocation43_spill] sm:$0xff] %v5233_v14 }
 0x3be   : > { %v5235_v11 = vpop.f32.mrf.mxu1 }
 0x3c0   : > { %4002 = vmatmul.msk.bf16.gmra.mxu2 %vm1251_vm6, %v4069_v53 }
 0x3c1   : > { %3972 = vmatmul.msk.bf16.gmra.mxu1 %vm1251_vm6, %v4071_v20 }
 0x3c3   : > { %v5239_v58 = vpop.f32.mrf.mxu2 }
 0x3c4   : > { %7302 = vst [vmem:[#allocation44_spill] sm:$0xff] %v5239_v58 }
 0x3c6   : > { %v5241_v4 = vpop.f32.mrf.mxu1 }
 0x3cb   : > { %v5243_v23 = vpop.f32.mrf.mxu2 }
 0x3cc   : > { %7303 = vst [vmem:[#allocation45_spill] sm:$0xff] %v5243_v23 }
 0x3ce   : > { %v5245_v6 = vpop.f32.mrf.mxu1 }
 0x3d0   : > { %4003 = vmatmul.msk.bf16.gmra.mxu2 %vm1251_vm6, %v4070_v9 }
 0x3d1   : > { %3973 = vmatmul.msk.bf16.gmra.mxu1 %vm1251_vm6, %v4072_v13 }
 0x3d3   : > { %v5249_v26 = vpop.f32.mrf.mxu2 }
 0x3d4   : > { %7304 = vst [vmem:[#allocation46_spill] sm:$0xff] %v5249_v26 }
 0x3d6   : > { %v5251_v14 = vpop.f32.mrf.mxu1 }
 0x3db   : > { %v5253_v53 = vpop.f32.mrf.mxu2 }
 0x3dc   : > { %7305 = vst [vmem:[#allocation47_spill] sm:$0xff] %v5253_v53 }
 0x3de   : > { %v5255_v1 = vpop.f32.mrf.mxu1 }
 0x3e0   : > { %4004 = vmatmul.msk.bf16.gmra.mxu2 %vm1251_vm6, %v4071_v20 }
 0x3e1   : > { %3974 = vmatmul.msk.bf16.gmra.mxu1 %vm1251_vm6, %v4073_v8 }
 0x3e3   : > { %v5259_v58 = vpop.f32.mrf.mxu2 }
 0x3e4   : > { %7306 = vst [vmem:[#allocation48_spill] sm:$0xff] %v5259_v58 }
 0x3e6   : > { %v5261_v23 = vpop.f32.mrf.mxu1 }
 0x3e7   : > { %7307 = vst [vmem:[#allocation49_spill] sm:$0xff] %v5261_v23 }
 0x3eb   : > { %v5263_v9 = vpop.f32.mrf.mxu2 }
 0x3ec   : > { %7308 = vst [vmem:[#allocation50_spill] sm:$0xff] %v5263_v9 }
 0x3ee   : > { %v5265_v60 = vpop.f32.mrf.mxu1 }
 0x3ef   : > { %7309 = vst [vmem:[#allocation51_spill] sm:$0xff] %v5265_v60 }
 0x3f0   : > { %4005 = vmatmul.msk.bf16.gmra.mxu2 %vm1251_vm6, %v4072_v13  ;;  %v4076_v13 = vld [vmem:[#allocation2 + $0xf0] sm:$0xff] }
 0x3f1   : > { %3975 = vmatmul.msk.bf16.gmra.mxu1 %vm1251_vm6, %v4074_v3 }
 0x3f3   : > { %v5269_v26 = vpop.f32.mrf.mxu2 }
 0x3f4   : > { %7310 = vst [vmem:[#allocation52_spill] sm:$0xff] %v5269_v26 }
 0x3f6   : > { %v5271_v53 = vpop.f32.mrf.mxu1 }
 0x3f7   : > { %7311 = vst [vmem:[#allocation53_spill] sm:$0xff] %v5271_v53 }
 0x3fb   : > { %v5273_v20 = vpop.f32.mrf.mxu2 }
 0x3fc   : > { %7312 = vst [vmem:[#allocation54_spill] sm:$0xff] %v5273_v20 }
 0x3fe   : > { %v5275_v28 = vpop.f32.mrf.mxu1 }
 0x3ff   : > { %7313 = vst [vmem:[#allocation55_spill] sm:$0xff] %v5275_v28 }
 0x400   : > { %4006 = vmatmul.msk.bf16.gmra.mxu2 %vm1251_vm6, %v4073_v8  ;;  %v4077_v8 = vld [vmem:[#allocation2 + $0xf8] sm:$0xff] }
 0x401   : > { %3976 = vmatmul.msk.bf16.gmra.mxu1 %vm1251_vm6, %v4075_v62 }
 0x403   : > { %v5279_v58 = vpop.f32.mrf.mxu2 }
 0x404   : > { %7314 = vst [vmem:[#allocation56_spill] sm:$0xff] %v5279_v58 }
 0x406   : > { %v5281_v9 = vpop.f32.mrf.mxu1 }
 0x407   : > { %7315 = vst [vmem:[#allocation57_spill] sm:$0xff] %v5281_v9 }
 0x40b   : > { %v5285_v55 = vpop.f32.mrf.mxu2 }
 0x40c   : > { %7317 = vst [vmem:[#allocation59_spill] sm:$0xff] %v5285_v55 }
 0x40e   : > { %v5283_v42 = vpop.f32.mrf.mxu1 }
 0x40f   : > { %7316 = vst [vmem:[#allocation58_spill] sm:$0xff] %v5283_v42 }
 0x410   : > { %4007 = vmatmul.msk.bf16.gmra.mxu2 %vm1251_vm6, %v4074_v3 }
 0x411   : > { %3977 = vmatmul.msk.bf16.gmra.mxu1 %vm1251_vm6, %v4076_v13 }
 0x413   : > { %v5291_v20 = vpop.f32.mrf.mxu2 }
 0x414   : > { %7319 = vst [vmem:[#allocation61_spill] sm:$0xff] %v5291_v20 }
 0x416   : > { %v5289_v26 = vpop.f32.mrf.mxu1 }
 0x417   : > { %7318 = vst [vmem:[#allocation60_spill] sm:$0xff] %v5289_v26 }
 0x41b   : > { %v5297_v58 = vpop.f32.mrf.mxu2 }
 0x41c   : > { %7321 = vst [vmem:[#allocation63_spill] sm:$0xff] %v5297_v58 }
 0x41e   : > { %v5293_v29 = vpop.f32.mrf.mxu1 }
 0x41f   : > { %7320 = vst [vmem:[#allocation62_spill] sm:$0xff] %v5293_v29 }
 0x420   : > { %4008 = vmatmul.msk.bf16.gmra.mxu2 %vm1251_vm6, %v4075_v62 }
 0x421   : > { %3978 = vmatmul.msk.bf16.gmra.mxu1 %vm1251_vm6, %v4077_v8 }
 0x423   : > { %v5301_v55 = vpop.f32.mrf.mxu2 }
 0x424   : > { %7323 = vst [vmem:[#allocation65_spill] sm:$0xff] %v5301_v55 }
 0x426   : > { %v5299_v52 = vpop.f32.mrf.mxu1 }
 0x427   : > { %7322 = vst [vmem:[#allocation64_spill] sm:$0xff] %v5299_v52 }
 0x42b   : > { %v5308_v20 = vpop.f32.mrf.mxu2 }
 0x42c   : > { %7326 = vst [vmem:[#allocation68_spill] sm:$0xff] %v5308_v20 }
 0x42e   : > { %v5303_v3 = vpop.f32.mrf.mxu1 }
 0x42f   : > { %7324 = vst [vmem:[#allocation66_spill] sm:$0xff] %v5303_v3 }
 0x430   : > { %4009 = vmatmul.msk.bf16.gmra.mxu2 %vm1251_vm6, %v4076_v13 }
 0x433   : > { %v5313_v62 = vpop.f32.mrf.mxu2 }
 0x434   : > { %7328 = vst [vmem:[#allocation70_spill] sm:$0xff] %v5313_v62 }
 0x436   : > { %v5306_v46 = vpop.f32.mrf.mxu1 }
 0x437   : > { %7325 = vst [vmem:[#allocation67_spill] sm:$0xff] %v5306_v46 }
 0x43b   : > { %v5317_v58 = vpop.f32.mrf.mxu2 }
 0x43c   : > { %7330 = vst [vmem:[#allocation72_spill] sm:$0xff] %v5317_v58  ;;  %v1735_v58 = vmax.f32 %v5077_v19, %v5083_v22 }
 0x43e   : > { %v5310_v49 = vpop.f32.mrf.mxu1 }
 0x43f   : > { %7327 = vst [vmem:[#allocation69_spill] sm:$0xff] %v5310_v49 }
 0x440   : > { %4010 = vmatmul.msk.bf16.gmra.mxu2 %vm1251_vm6, %v4077_v8  ;;  %v1734_v8 = vmax.f32 %v5073_v18, %v5079_v21 }
 0x442   : > { %v1736_v38 = vmax.f32 %v1734_v8, %v5085_v27 }
 0x443   : > { %v5321_v55 = vpop.f32.mrf.mxu2 }
 0x444   : > { %7332 = vst [vmem:[#allocation74_spill] sm:$0xff] %v5321_v55  ;;  %v1737_v55 = vmax.f32 %v1735_v58, %v5091_v31  ;;  %v1738_v36 = vmax.f32 %v1736_v38, %v5095_v35 }
 0x446   : > { %v5315_v47 = vpop.f32.mrf.mxu1 }
 0x447   : > { %7329 = vst [vmem:[#allocation71_spill] sm:$0xff] %v5315_v47 }
 0x44b   : > { %v5327_v24 = vpop.f32.mrf.mxu2 }
 0x44c   : > { %7335 = vst [vmem:[#allocation77_spill] sm:$0xff] %v5327_v24  ;;  %v1739_v24 = vmax.f32 %v1737_v55, %v5101_v37 }
 0x44e   : > { %v5319_v43 = vpop.f32.mrf.mxu1 }
 0x44f   : > { %7331 = vst [vmem:[#allocation73_spill] sm:$0xff] %v5319_v43 }
 0x453   : > { %v5333_v62 = vpop.f32.mrf.mxu2 }
 0x454   : > { %7337 = vst [vmem:[#allocation79_spill] sm:$0xff] %v5333_v62 }
 0x456   : > { %v5323_v39 = vpop.f32.mrf.mxu1 }
 0x457   : > { %7333 = vst [vmem:[#allocation75_spill] sm:$0xff] %v5323_v39 }
 0x45b   : > { %v5347_v18 = vpop.f32.mrf.mxu2 }
 0x45e   : > { %v5325_v13 = vpop.f32.mrf.mxu1 }
 0x45f   : > { %7334 = vst [vmem:[#allocation76_spill] sm:$0xff] %v5325_v13  ;;  %v1741_v13 = vmax.f32 %v1739_v24, %v5111_v40 }
 0x461   : > { %v1743_v62 = vmax.f32 %v1741_v13, %v5121_v48 }
 0x463   : > { %v1745_v58 = vmax.f32 %v1743_v62, %v5131_v51 }
 0x465   : > { %v1747_v55 = vmax.f32 %v1745_v58, %v5141_v25 }
 0x466   : > { %v5329_v20 = vpop.f32.mrf.mxu1 }
 0x467   : > { %7336 = vst [vmem:[#allocation78_spill] sm:$0xff] %v5329_v20  ;;  %v1740_v20 = vmax.f32 %v1738_v36, %v5105_v34  ;;  %v1749_v24 = vmax.f32 %v1747_v55, %v5151_v32 }
 0x469   : > { %v1742_v21 = vmax.f32 %v1740_v20, %v5115_v45  ;;  %v1751_v13 = vmax.f32 %v1749_v24, %v5161_v61 }
 0x46b   : > { %v1744_v8 = vmax.f32 %v1742_v21, %v5125_v41  ;;  %v1753_v21 = vmax.f32 %v1751_v13, %v5171_v2  ;;  %v5361_v41 = vpop.f32.mrf.mxu2 }
 0x46d   : > { %v1746_v38 = vmax.f32 %v1744_v8, %v5135_v54  ;;  %v1755_v58 = vmax.f32 %v1753_v21, %v5181_v7 }
 0x46e   : > { %v5339_v30 = vpop.f32.mrf.mxu1 }
 0x46f   : > { %7338 = vst [vmem:[#allocation80_spill] sm:$0xff] %v5339_v30  ;;  %v1748_v36 = vmax.f32 %v1746_v38, %v5145_v57  ;;  %v1757_v55 = vmax.f32 %v1755_v58, %v5191_v12 }
 0x471   : > { %v1750_v20 = vmax.f32 %v1748_v36, %v5155_v59  ;;  %v1759_v24 = vmax.f32 %v1757_v55, %v5201_v17 }
 0x473   : > { %v1752_v48 = vmax.f32 %v1750_v20, %v5165_v0  ;;  %v1761_v13 = vmax.f32 %v1759_v24, %v5211_v44 }
 0x475   : > { %v1754_v8 = vmax.f32 %v1752_v48, %v5175_v5  ;;  %v1763_v48 = vmax.f32 %v1761_v13, %v5221_v63  ;;  %v5377_v5 = vpop.f32.mrf.mxu2 }
 0x476   : > { %v5351_v31 = vpop.f32.mrf.mxu1 }
 0x477   : > { %7339 = vst [vmem:[#allocation81_spill] sm:$0xff] %v5351_v31  ;;  %v1756_v38 = vmax.f32 %v1754_v8, %v5185_v10  ;;  %v1765_v8 = vmax.f32 %v1763_v48, %v5231_v50 }
 0x479   : > { %v1758_v36 = vmax.f32 %v1756_v38, %v5195_v15  ;;  %v1767_v38 = vmax.f32 %v1765_v8, %v5241_v4 }
 0x47b   : > { %v1760_v20 = vmax.f32 %v1758_v36, %v5205_v33  ;;  %v1769_v36 = vmax.f32 %v1767_v38, %v5251_v14 }
 0x47d   : > { %v1762_v0 = vmax.f32 %v1760_v20, %v5215_v56  ;;  %v1771_v13 = vmax.f32 %v1769_v36, %v5261_v23 }
 0x47e   : > { %v5363_v62 = vpop.f32.mrf.mxu1 }
 0x47f   : > { %7340 = vst [vmem:[#allocation82_spill] sm:$0xff] %v5363_v62  ;;  %v1764_v21 = vmax.f32 %v1762_v0, %v5225_v16  ;;  %v1773_v0 = vmax.f32 %v1771_v13, %v5271_v53  ;;  %v5391_v16 = vpop.f32.mrf.mxu2 }
 0x481   : > { %v1766_v58 = vmax.f32 %v1764_v21, %v5235_v11  ;;  %v1775_v21 = vmax.f32 %v1773_v0, %v5281_v9 }
 0x483   : > { %v1768_v55 = vmax.f32 %v1766_v58, %v5245_v6  ;;  %v1777_v58 = vmax.f32 %v1775_v21, %v5289_v26  ;;  %v7345_v26 = vld [vmem:[#allocation76_spill] sm:$0xff] }
 0x485   : > { %v1770_v20 = vmax.f32 %v1768_v55, %v5255_v1  ;;  %v1779_v36 = vmax.f32 %v1777_v58, %v5299_v52  ;;  %v7353_v52 = vld [vmem:[#allocation12_spill] sm:$0xff] }
 0x486   : > { %v5373_v2 = vpop.f32.mrf.mxu1 }
 0x487   : > { %7341 = vst [vmem:[#allocation83_spill] sm:$0xff] %v5373_v2  ;;  %v1772_v63 = vmax.f32 %v1770_v20, %v5265_v60  ;;  %v1781_v13 = vmax.f32 %v1779_v36, %v5306_v46 }
 0x489   : > { %v1774_v48 = vmax.f32 %v1772_v63, %v5275_v28  ;;  %v1783_v63 = vmax.f32 %v1781_v13, %v5315_v47  ;;  %v5405_v28 = vpop.f32.mrf.mxu2 }
 0x48b   : > { %v1776_v8 = vmax.f32 %v1774_v48, %v5283_v42  ;;  %v1785_v48 = vmax.f32 %v1783_v63, %v5323_v39  ;;  %v7355_v42 = vld [vmem:[#allocation15_spill] sm:$0xff] }
 0x48d   : > { %v1778_v55 = vmax.f32 %v1776_v8, %v5293_v29  ;;  %v7346_v29 = vld [vmem:[#allocation78_spill] sm:$0xff] }
 0x48e   : > { %v5385_v24 = vpop.f32.mrf.mxu1  ;;  %v1787_v58 = vmax.f32 %v1785_v48, %v7346_v29 }
 0x48f   : > { %7342 = vst [vmem:[#allocation84_spill] sm:$0xff] %v5385_v24  ;;  %v1780_v20 = vmax.f32 %v1778_v55, %v5303_v3  ;;  %v7352_v3 = vld [vmem:[#allocation11_spill] sm:$0xff] }
 0x490   : > { %v1789_v36 = vmax.f32 %v1787_v58, %v5351_v31  ;;  %v7348_v31 = vld [vmem:[#allocation9_spill] sm:$0xff] }
 0x491   : > { %v1782_v53 = vmax.f32 %v1780_v20, %v5310_v49  ;;  %v5417_v47 = vpop.f32.mrf.mxu2 }
 0x492   : > { %v1791_v13 = vmax.f32 %v1789_v36, %v5373_v2  ;;  %v7364_v2 = vld [vmem:[#allocation28_spill] sm:$0xff] }
 0x493   : > { %v1784_v0 = vmax.f32 %v1782_v53, %v5319_v43  ;;  %v7350_v43 = vld [vmem:[#allocation10_spill] sm:$0xff] }
 0x495   : > { %v1786_v8 = vmax.f32 %v1784_v0, %v7345_v26  ;;  %v7349_v26 = vld [vmem:[#allocation6_spill] sm:$0xff] }
 0x496   : > { %v5397_v38 = vpop.f32.mrf.mxu1 }
 0x497   : > { %7343 = vst [vmem:[#allocation85_spill] sm:$0xff] %v5397_v38  ;;  %v1788_v55 = vmax.f32 %v1786_v8, %v5339_v30  ;;  %v1793_v63 = vmax.f32 %v1791_v13, %v5397_v38  ;;  %v7351_v13 = vld [vmem:[#allocation8_spill] sm:$0xff] }
 0x498   : > { %v1804_v49 = vmax.f32 %v7351_v13, %v7350_v43  ;;  %v7359_v43 = vld [vmem:[#allocation20_spill] sm:$0xff] }
 0x499   : > { %v1790_v20 = vmax.f32 %v1788_v55, %v5363_v62  ;;  %v5425_v30 = vpop.f32.mrf.mxu2 }
 0x49b   : > { %v1792_v53 = vmax.f32 %v1790_v20, %v5385_v24  ;;  %v1803_v20 = vmax.f32 %v7349_v26, %v7348_v31  ;;  %v7358_v31 = vld [vmem:[#allocation19_spill] sm:$0xff] }
 0x49e   : > { %v5409_v21 = vpop.f32.mrf.mxu1 }
 0x49f   : > { %7344 = vst [vmem:[#allocation86_spill] sm:$0xff] %v5409_v21  ;;  %v1794_v0 = vmax.f32 %v1792_v53, %v5409_v21  ;;  %v1805_v53 = vmax.f32 %v1803_v20, %v7352_v3 }
 0x4a1   : > { %v5427_v62 = vpop.f32.mrf.mxu2 }
 0x4a6   : > { %v5421_v39 = vpop.f32.mrf.mxu1 }
 0x4a7   : > { %7347 = vst [vmem:[#allocation87_spill] sm:$0xff] %v5421_v39  ;;  %v1795_v48 = vmax.f32 %v1793_v63, %v5421_v39  ;;  %v1806_v63 = vmax.f32 %v1804_v49, %v7353_v52  ;;  %v7365_v49 = vld [vmem:[#allocation26_spill] sm:$0xff]  ;;  %v7369_v39 = vld [vmem:[#allocation32_spill] sm:$0xff] }
 0x4a9   : > { %v1796_v29 = vmax.f32 %v1794_v0, %v1795_v48  ;;  %v7354_v0 = vld [vmem:[#allocation13_spill] sm:$0xff]  ;;  %v1808_v9 = vmax.f32 %v1806_v63, %v7355_v42  ;;  %v5441_v23 = vpop.f32.mrf.mxu2 }
 0x4aa   : > { %v1807_v48 = vmax.f32 %v1805_v53, %v7354_v0  ;;  %v7360_v53 = vld [vmem:[#allocation22_spill] sm:$0xff]  ;;  %v7368_v42 = vld [vmem:[#allocation33_spill] sm:$0xff] }
 0x4ab   : > { %v1797_v8 = vrot.slane %v1796_v29, 4 }
 0x4ad   : > { %v1798_v58 = vmax.f32 %v1796_v29, %v1797_v8  ;;  %v7356_v8 = vld [vmem:[#allocation17_spill] sm:$0xff] }
 0x4ae   : > { %v1809_v60 = vmax.f32 %v1807_v48, %v7356_v8  ;;  %v7366_v8 = vld [vmem:[#allocation31_spill] sm:$0xff] }
 0x4af   : > { %v1799_v55 = vrot.slane %v1798_v58, 2 }
 0x4b0   : > { %v1811_v26 = vmax.f32 %v1809_v60, %v7358_v31  ;;  %v7361_v60 = vld [vmem:[#allocation21_spill] sm:$0xff]  ;;  %v7363_v31 = vld [vmem:[#allocation23_spill] sm:$0xff] }
 0x4b1   : > { %v1800_v36 = vmax.f32 %v1798_v58, %v1799_v55  ;;  %v7357_v58 = vld [vmem:[#allocation18_spill] sm:$0xff]  ;;  %v5462_v38 = vpop.f32.mrf.mxu2 }
 0x4b2   : > { %v1810_v55 = vmax.f32 %v1808_v9, %v7357_v58  ;;  %v1813_v48 = vmax.f32 %v1811_v26, %v7361_v60  ;;  %v7371_v60 = vld [vmem:[#allocation34_spill] sm:$0xff] }
 0x4b3   : > { %v1801_v46 = vrot.slane %v1800_v36, 1 }
 0x4b4   : > { %v1812_v13 = vmax.f32 %v1810_v55, %v7359_v43  ;;  %v7362_v55 = vld [vmem:[#allocation24_spill] sm:$0xff]  ;;  %v1815_v20 = vmax.f32 %v1813_v48, %v7363_v31 }
 0x4b5   : > { %v5437_v29 = vmax.f32 %v1800_v36, %v1801_v46  ;;  %v7367_v36 = vld [vmem:[#allocation30_spill] sm:$0xff]  ;;  %v7373_v31 = vld [vmem:[#allocation36_spill] sm:$0xff] }
 0x4b6   : > { %v1814_v63 = vmax.f32 %v1812_v13, %v7360_v53  ;;  %v1817_v24 = vmax.f32 %v1815_v20, %v7365_v49  ;;  %v7370_v53 = vld [vmem:[#allocation35_spill] sm:$0xff]  ;;  %v7375_v49 = vld [vmem:[#allocation38_spill] sm:$0xff] }
 0x4b8   : > { %v1816_v43 = vmax.f32 %v1814_v63, %v7362_v55  ;;  %v1819_v21 = vmax.f32 %v1817_v24, %v7367_v36  ;;  %v7372_v55 = vld [vmem:[#allocation37_spill] sm:$0xff]  ;;  %v7377_v24 = vld [vmem:[#allocation43_spill] sm:$0xff] }
 0x4ba   : > { %v1818_v58 = vmax.f32 %v1816_v43, %v7364_v2  ;;  %v1821_v13 = vmax.f32 %v1819_v21, %v7369_v39  ;;  %v7374_v2 = vld [vmem:[#allocation40_spill] sm:$0xff]  ;;  %v1874_v21 = vsub.f32 %v5077_v19, %v5437_v29  ;;  %v1878_v19 = vsub.f32 %v5083_v22, %v5437_v29 }
 0x4bb   : > { %v7385_v39 = vld [vmem:[#allocation48_spill] sm:$0xff] }
 0x4bc   : > { %v1820_v46 = vmax.f32 %v1818_v58, %v7366_v8  ;;  %v1823_v63 = vmax.f32 %v1821_v13, %v7371_v60  ;;  %v7376_v8 = vld [vmem:[#allocation4_spill] sm:$0xff]  ;;  %v7383_v60 = vld [vmem:[#allocation46_spill] sm:$0xff]  ;;  %v2012_v22 = vmul.f32 1.442695, %v1878_v19  ;;  %v1886_v19 = vsub.f32 %v5101_v37, %v5437_v29  ;;  %v7400_v37 = vld [vmem:[#allocation77_spill] sm:$0xff] }
 0x4bd   : > { %v1872_v0 = vsub.f32 %v7376_v8, %v5437_v29  ;;  %v2004_v8 = vmul.f32 1.442695, %v1874_v21  ;;  %v7387_v21 = vld [vmem:[#allocation52_spill] sm:$0xff] }
 0x4be   : > { %v1822_v9 = vmax.f32 %v1820_v46, %v7368_v42  ;;  %v1825_v43 = vmax.f32 %v1823_v63, %v7373_v31  ;;  %v5478_v46 = vpop.f32.mrf.mxu2 }
 0x4bf   : > { %v2000_v31 = vmul.f32 1.442695, %v1872_v0  ;;  %v1880_v0 = vsub.f32 %v5085_v27, %v5437_v29 }
 0x4c0   : > { %v1824_v26 = vmax.f32 %v1822_v9, %v7370_v53  ;;  %v1827_v58 = vmax.f32 %v1825_v43, %v7375_v49  ;;  %v7378_v9 = vld [vmem:[#allocation42_spill] sm:$0xff]  ;;  %v7379_v53 = vld [vmem:[#allocation45_spill] sm:$0xff] }
 0x4c1   : > { %v7382_v43 = vld [vmem:[#allocation5_spill] sm:$0xff]  ;;  %4099 = vpow2.f32 %v2000_v31  ;;  %v7391_v31 = vld [vmem:[#allocation63_spill] sm:$0xff]  ;;  %v2016_v27 = vmul.f32 1.442695, %v1880_v0 }
 0x4c2   : > { %v1826_v48 = vmax.f32 %v1824_v26, %v7372_v55  ;;  %v1829_v13 = vmax.f32 %v1827_v58, %v7378_v9  ;;  %v7380_v55 = vld [vmem:[#allocation44_spill] sm:$0xff]  ;;  %v1876_v49 = vsub.f32 %v7382_v43, %v5437_v29  ;;  %4101 = vpow2.f32 %v2004_v8  ;;  %v7393_v8 = vld [vmem:[#allocation61_spill] sm:$0xff] }
 0x4c4   : > { %v1828_v20 = vmax.f32 %v1826_v48, %v7374_v2  ;;  %v1831_v63 = vmax.f32 %v1829_v13, %v7380_v55  ;;  %v7381_v48 = vld [vmem:[#allocation47_spill] sm:$0xff]  ;;  %v2008_v13 = vmul.f32 1.442695, %v1876_v49 }
 0x4c6   : > { %v1830_v36 = vmax.f32 %v1828_v20, %v7377_v24  ;;  %v1833_v20 = vmax.f32 %v1831_v63, %v7383_v60  ;;  %v7384_v24 = vld [vmem:[#allocation50_spill] sm:$0xff]  ;;  %v7388_v63 = vld [vmem:[#allocation59_spill] sm:$0xff]  ;;  %v7390_v60 = vld [vmem:[#allocation56_spill] sm:$0xff]  ;;  %4103 = vpow2.f32 %v2008_v13 }
 0x4c7   : > { %v5504_v49 = vpop.eup %4099  ;;  %4105 = vpow2.f32 %v2012_v22  ;;  %v7401_v22 = vld [vmem:[#allocation74_spill] sm:$0xff] }
 0x4c8   : > { %v1832_v26 = vmax.f32 %v1830_v36, %v7379_v53  ;;  %v1835_v58 = vmax.f32 %v1833_v20, %v7385_v39  ;;  %v7386_v36 = vld [vmem:[#allocation54_spill] sm:$0xff]  ;;  %7392 = vst [vmem:[#allocation11_spill] sm:$0xff] %v5504_v49  ;;  %4107 = vpow2.f32 %v2016_v27 }
 0x4ca   : > { %v1834_v2 = vmax.f32 %v1832_v26, %v7381_v48  ;;  %v5494_v26 = vpop.f32.mrf.mxu2  ;;  %v1837_v43 = vmax.f32 %v1835_v58, %v7387_v21  ;;  %v5507_v58 = vpop.eup %4101 }
 0x4cb   : > { %7394 = vst [vmem:[#allocation12_spill] sm:$0xff] %v5507_v58 }
 0x4cc   : > { %v1836_v42 = vmax.f32 %v1834_v2, %v7384_v24  ;;  %v7389_v2 = vld [vmem:[#allocation7_spill] sm:$0xff]  ;;  %v1839_v20 = vmax.f32 %v1837_v43, %v7390_v60 }
 0x4cd   : > { %v1882_v24 = vsub.f32 %v7389_v2, %v5437_v29  ;;  %v7396_v2 = vld [vmem:[#allocation65_spill] sm:$0xff] }
 0x4ce   : > { %v1838_v53 = vmax.f32 %v1836_v42, %v7386_v36  ;;  %v1884_v42 = vsub.f32 %v5095_v35, %v5437_v29  ;;  %v1841_v36 = vmax.f32 %v1839_v20, %v7393_v8  ;;  %v1888_v35 = vsub.f32 %v5105_v34, %v5437_v29  ;;  %v7398_v20 = vld [vmem:[#allocation70_spill] sm:$0xff] }
 0x4cf   : > { %v2020_v43 = vmul.f32 1.442695, %v1882_v24 }
 0x4d0   : > { %v1840_v48 = vmax.f32 %v1838_v53, %v7388_v63  ;;  %v7395_v53 = vld [vmem:[#allocation68_spill] sm:$0xff]  ;;  %v2024_v0 = vmul.f32 1.442695, %v1884_v42 }
 0x4d1   : > { %4109 = vpow2.f32 %v2020_v43 }
 0x4d2   : > { %v1842_v39 = vmax.f32 %v1840_v48, %v7391_v31  ;;  %v1843_v48 = vmax.f32 %v1841_v36, %v7396_v2  ;;  %v7397_v31 = vld [vmem:[#allocation72_spill] sm:$0xff]  ;;  %v5516_v13 = vpop.f32.mrf.mxu2  ;;  %v1890_v36 = vsub.f32 %v5111_v40, %v5437_v29  ;;  %4111 = vpow2.f32 %v2024_v0 }
 0x4d3   : > { %v7406_v0 = vld [vmem:[#allocation16_spill] sm:$0xff] }
 0x4d4   : > { %v1844_v63 = vmax.f32 %v1842_v39, %v7395_v53  ;;  %v1845_v8 = vmax.f32 %v1843_v48, %v7398_v20  ;;  %v2256_v39 = vadd.f32 %v5507_v58, %v5504_v49  ;;  %v5521_v53 = vpop.eup %4103  ;;  %v1892_v58 = vsub.f32 %v5115_v45, %v5437_v29 }
 0x4d5   : > { %7399 = vst [vmem:[#allocation4_spill] sm:$0xff] %v5521_v53  ;;  %v5528_v27 = vpop.eup %4105  ;;  %v2032_v49 = vmul.f32 1.442695, %v1888_v35 }
 0x4d6   : > { %v1846_v60 = vmax.f32 %v1844_v63, %v7397_v31  ;;  %v2028_v63 = vmul.f32 1.442695, %v1886_v19  ;;  %v1847_v34 = vmax.f32 %v1845_v8, %v7401_v22  ;;  %v2257_v42 = vadd.f32 %v5521_v53, %v2256_v39  ;;  %7402 = vst [vmem:[#allocation42_spill] sm:$0xff] %v5528_v27  ;;  %v7403_v31 = vld [vmem:[#allocation79_spill] sm:$0xff]  ;;  %v5535_v40 = vpop.eup %4107  ;;  %v7404_v8 = vld [vmem:[#allocation14_spill] sm:$0xff] }
 0x4d7   : > { %v1894_v43 = vsub.f32 %v7404_v8, %v5437_v29  ;;  %v2036_v39 = vmul.f32 1.442695, %v1890_v36  ;;  %v5542_v45 = vpop.eup %4109 }
 0x4d8   : > { %v1848_v24 = vmax.f32 %v1846_v60, %v7400_v37  ;;  %v1849_v60 = vmax.f32 %v1847_v34, %v7403_v31  ;;  %v2258_v37 = vadd.f32 %v5528_v27, %v2257_v42  ;;  %4113 = vpow2.f32 %v2028_v63  ;;  %7405 = vst [vmem:[#allocation44_spill] sm:$0xff] %v5542_v45  ;;  %v5551_v36 = vpop.eup %4111 }
 0x4d9   : > { %v1896_v34 = vsub.f32 %v7406_v0, %v5437_v29  ;;  %4115 = vpow2.f32 %v2032_v49  ;;  %v2040_v42 = vmul.f32 1.442695, %v1892_v58 }
 0x4da   : > { %v1850_v48 = vmax.f32 %v1848_v24, %v5347_v18  ;;  %v1851_v24 = vmax.f32 %v1849_v60, %v5361_v41  ;;  %v2259_v53 = vadd.f32 %v5535_v40, %v2258_v37  ;;  %v5547_v27 = vpop.f32.mrf.mxu2  ;;  %v1898_v37 = vsub.f32 %v5131_v51, %v5437_v29 }
 0x4db   : > { %4117 = vpow2.f32 %v2036_v39 }
 0x4dc   : > { %v1852_v19 = vmax.f32 %v1850_v48, %v5377_v5  ;;  %v1853_v48 = vmax.f32 %v1851_v24, %v5391_v16  ;;  %v2260_v63 = vadd.f32 %v5542_v45, %v2259_v53  ;;  %v1900_v53 = vsub.f32 %v5135_v54, %v5437_v29 }
 0x4dd   : > { %4119 = vpow2.f32 %v2040_v42  ;;  %v2048_v24 = vmul.f32 1.442695, %v1896_v34  ;;  %v2052_v39 = vmul.f32 1.442695, %v1898_v37  ;;  %v1904_v34 = vsub.f32 %v5145_v57, %v5437_v29 }
 0x4de   : > { %v1854_v35 = vmax.f32 %v1852_v19, %v5405_v28  ;;  %v2044_v19 = vmul.f32 1.442695, %v1894_v43  ;;  %v1855_v8 = vmax.f32 %v1853_v48, %v5417_v47  ;;  %v2261_v49 = vadd.f32 %v5551_v36, %v2260_v63  ;;  %v5558_v58 = vpop.eup %4113 }
 0x4df   : > { %v5565_v51 = vpop.eup %4115  ;;  %v1902_v43 = vsub.f32 %v5141_v25, %v5437_v29  ;;  %v2056_v42 = vmul.f32 1.442695, %v1900_v53  ;;  %v1906_v25 = vsub.f32 %v5151_v32, %v5437_v29 }
 0x4e0   : > { %v1856_v60 = vmax.f32 %v1854_v35, %v5425_v30  ;;  %v1857_v35 = vmax.f32 %v1855_v8, %v5427_v62  ;;  %v2262_v45 = vadd.f32 %v5558_v58, %v2261_v49  ;;  %4121 = vpow2.f32 %v2044_v19 }
 0x4e1   : > { %v5572_v54 = vpop.eup %4117  ;;  %4123 = vpow2.f32 %v2048_v24  ;;  %v1908_v24 = vsub.f32 %v5155_v59, %v5437_v29  ;;  %v7410_v59 = vld [vmem:[#allocation25_spill] sm:$0xff] }
 0x4e2   : > { %v1858_v0 = vmax.f32 %v1856_v60, %v5441_v23  ;;  %v1859_v63 = vmax.f32 %v1857_v35, %v5462_v38  ;;  %v2263_v60 = vadd.f32 %v5565_v51, %v2262_v45  ;;  %7407 = vst [vmem:[#allocation5_spill] sm:$0xff] %v5572_v54  ;;  %v5577_v49 = vpop.f32.mrf.mxu2  ;;  %4125 = vpow2.f32 %v2052_v39 }
 0x4e3   : > { %v5582_v19 = vpop.eup %4119  ;;  %v2060_v45 = vmul.f32 1.442695, %v1902_v43  ;;  %4127 = vpow2.f32 %v2056_v42  ;;  %v1910_v43 = vsub.f32 %v5161_v61, %v5437_v29  ;;  %v2068_v39 = vmul.f32 1.442695, %v1906_v25 }
 0x4e4   : > { %v1860_v48 = vmax.f32 %v1858_v0, %v5478_v46  ;;  %v2264_v37 = vadd.f32 %v5572_v54, %v2263_v60  ;;  %7408 = vst [vmem:[#allocation52_spill] sm:$0xff] %v5582_v19  ;;  %v1861_v0 = vmax.f32 %v1859_v63, %v5494_v26  ;;  %v1912_v42 = vsub.f32 %v7410_v59, %v5437_v29 }
 0x4e5   : > { %4129 = vpow2.f32 %v2060_v45  ;;  %v2076_v61 = vmul.f32 1.442695, %v1910_v43  ;;  %v1918_v59 = vsub.f32 %v5181_v7, %v5437_v29 }
 0x4e6   : > { %v1862_v8 = vmax.f32 %v1860_v48, %v5516_v13  ;;  %v2265_v57 = vadd.f32 %v5582_v19, %v2264_v37  ;;  %v5587_v53 = vpop.eup %4121  ;;  %v2064_v48 = vmul.f32 1.442695, %v1904_v34  ;;  %v1863_v32 = vmax.f32 %v1861_v0, %v5547_v27 }
 0x4e7   : > { %7409 = vst [vmem:[#allocation7_spill] sm:$0xff] %v5587_v53  ;;  %v5593_v54 = vpop.eup %4123  ;;  %v2072_v34 = vmul.f32 1.442695, %v1908_v24  ;;  %v2092_v7 = vmul.f32 1.442695, %v1918_v59 }
 0x4e8   : > { %v1864_v35 = vmax.f32 %v1862_v8, %v5577_v49  ;;  %v2266_v60 = vadd.f32 %v5587_v53, %v2265_v57  ;;  %v5598_v37 = vpop.eup %4125  ;;  %4131 = vpow2.f32 %v2064_v48  ;;  %v7412_v53 = vld [vmem:[#allocation27_spill] sm:$0xff]  ;;  %v2080_v48 = vmul.f32 1.442695, %v1912_v42 }
 0x4e9   : > { %v5603_v57 = vpop.eup %4127  ;;  %v1914_v19 = vsub.f32 %v7412_v53, %v5437_v29  ;;  %4133 = vpow2.f32 %v2068_v39 }
 0x4ea   : > { %v1865_v63 = vmax.f32 %v1863_v32, %v1864_v35  ;;  %v2267_v8 = vadd.f32 %v5593_v54, %v2266_v60  ;;  %7411 = vst [vmem:[#allocation65_spill] sm:$0xff] %v5603_v57  ;;  %v7413_v32 = vld [vmem:[#allocation29_spill] sm:$0xff]  ;;  %4135 = vpow2.f32 %v2072_v34 }
 0x4eb   : > { %v5608_v35 = vpop.eup %4129  ;;  %v1916_v60 = vsub.f32 %v7413_v32, %v5437_v29  ;;  %4137 = vpow2.f32 %v2076_v61  ;;  %v2084_v53 = vmul.f32 1.442695, %v1914_v19  ;;  %v1922_v32 = vsub.f32 %v5191_v12, %v5437_v29 }
 0x4ec   : > { %v2268_v0 = vadd.f32 %v5598_v37, %v2267_v8  ;;  %v1866_v25 = vrot.slane %v1865_v63, 4  ;;  %4139 = vpow2.f32 %v2080_v48 }
 0x4ed   : > { %v2088_v34 = vmul.f32 1.442695, %v1916_v60  ;;  %4141 = vpow2.f32 %v2084_v53  ;;  %v2100_v12 = vmul.f32 1.442695, %v1922_v32 }
 0x4ee   : > { %v2269_v45 = vadd.f32 %v5603_v57, %v2268_v0  ;;  %v5613_v8 = vpop.eup %4131  ;;  %v1867_v43 = vmax.f32 %v1865_v63, %v1866_v25  ;;  %v1920_v57 = vsub.f32 %v5185_v10, %v5437_v29  ;;  %v1924_v25 = vsub.f32 %v5195_v15, %v5437_v29 }
 0x4ef   : > { %7414 = vst [vmem:[#allocation70_spill] sm:$0xff] %v5613_v8  ;;  %v5618_v0 = vpop.eup %4133  ;;  %4143 = vpow2.f32 %v2088_v34 }
 0x4f0   : > { %v2270_v24 = vadd.f32 %v5608_v35, %v2269_v45  ;;  %7415 = vst [vmem:[#allocation74_spill] sm:$0xff] %v5618_v0  ;;  %v5623_v45 = vpop.eup %4135  ;;  %v1868_v19 = vrot.slane %v1867_v43, 2  ;;  %v2096_v10 = vmul.f32 1.442695, %v1920_v57  ;;  %4145 = vpow2.f32 %v2092_v7 }
 0x4f1   : > { %7416 = vst [vmem:[#allocation79_spill] sm:$0xff] %v5623_v45  ;;  %v5628_v61 = vpop.eup %4137  ;;  %v2104_v15 = vmul.f32 1.442695, %v1924_v25 }
 0x4f2   : > { %v2271_v39 = vadd.f32 %v5613_v8, %v2270_v24  ;;  %7417 = vst [vmem:[#allocation14_spill] sm:$0xff] %v5628_v61  ;;  %v5633_v48 = vpop.eup %4139  ;;  %v1926_v24 = vsub.f32 %v5201_v17, %v5437_v29  ;;  %v1869_v59 = vmax.f32 %v1867_v43, %v1868_v19  ;;  %4147 = vpow2.f32 %v2096_v10 }
 0x4f3   : > { %7418 = vst [vmem:[#allocation16_spill] sm:$0xff] %v5633_v48  ;;  %4149 = vpow2.f32 %v2100_v12  ;;  %v1932_v19 = vsub.f32 %v5215_v56, %v5437_v29 }
 0x4f4   : > { %v2272_v42 = vadd.f32 %v5618_v0, %v2271_v39  ;;  %v5638_v39 = vpop.eup %4141  ;;  %v2108_v17 = vmul.f32 1.442695, %v1926_v24  ;;  %v1870_v32 = vrot.slane %v1869_v59, 1  ;;  %4151 = vpow2.f32 %v2104_v15 }
 0x4f5   : > { %7419 = vst [vmem:[#allocation25_spill] sm:$0xff] %v5638_v39  ;;  %v5643_v34 = vpop.eup %4143  ;;  %v1938_v15 = vsub.f32 %v5231_v50, %v5437_v29  ;;  %v1944_v50 = vsub.f32 %v5245_v6, %v5437_v29 }
 0x4f6   : > { %v2273_v63 = vadd.f32 %v5623_v45, %v2272_v42  ;;  %v1928_v42 = vsub.f32 %v5205_v33, %v5437_v29  ;;  %7420 = vst [vmem:[#allocation27_spill] sm:$0xff] %v5643_v34  ;;  %v5648_v7 = vpop.eup %4145  ;;  %4153 = vpow2.f32 %v2108_v17  ;;  %v5657_v24 = vmax.f32 %v1869_v59, %v1870_v32 }
 0x4f7   : > { %7421 = vst [vmem:[#allocation29_spill] sm:$0xff] %v5648_v7  ;;  %v2144_v6 = vmul.f32 1.442695, %v1944_v50 }
 0x4f8   : > { %v2274_v60 = vadd.f32 %v5628_v61, %v2273_v63  ;;  %v1930_v63 = vsub.f32 %v5211_v44, %v5437_v29  ;;  %v2112_v33 = vmul.f32 1.442695, %v1928_v42  ;;  %v5653_v10 = vpop.eup %4147  ;;  %v2120_v42 = vmul.f32 1.442695, %v1932_v19 }
 0x4f9   : > { %7422 = vst [vmem:[#allocation88_spill] sm:$0xff] %v5653_v10 }
 0x4fa   : > { %v2275_v53 = vadd.f32 %v5633_v48, %v2274_v60  ;;  %v7423_v60 = vld [vmem:[#allocation39_spill] sm:$0xff]  ;;  %v2116_v44 = vmul.f32 1.442695, %v1930_v63  ;;  %4155 = vpow2.f32 %v2112_v33  ;;  %v1940_v33 = vsub.f32 %v5235_v11, %v5437_v29 }
 0x4fc   : > { %v2276_v57 = vadd.f32 %v5638_v39, %v2275_v53  ;;  %v1934_v53 = vsub.f32 %v7423_v60, %v5437_v29  ;;  %4157 = vpow2.f32 %v2116_v44  ;;  %v1942_v44 = vsub.f32 %v5241_v4, %v5437_v29 }
 0x4fd   : > { %4159 = vpow2.f32 %v2120_v42  ;;  %v2136_v11 = vmul.f32 1.442695, %v1940_v33 }
 0x4fe   : > { %v2277_v43 = vadd.f32 %v5643_v34, %v2276_v57  ;;  %v5660_v57 = vpop.eup %4149  ;;  %v7425_v34 = vld [vmem:[#allocation41_spill] sm:$0xff]  ;;  %v2124_v63 = vmul.f32 1.442695, %v1934_v53  ;;  %v2140_v4 = vmul.f32 1.442695, %v1942_v44 }
 0x4ff   : > { %7424 = vst [vmem:[#allocation39_spill] sm:$0xff] %v5660_v57  ;;  %v1936_v56 = vsub.f32 %v7425_v34, %v5437_v29 }
 0x500   : > { %v2278_v25 = vadd.f32 %v5648_v7, %v2277_v43  ;;  %v5667_v7 = vpop.eup %4151  ;;  %4161 = vpow2.f32 %v2124_v63 }
 0x501   : > { %7426 = vst [vmem:[#allocation41_spill] sm:$0xff] %v5667_v7  ;;  %v5678_v19 = vpop.eup %4153 }
 0x502   : > { %v2279_v12 = vadd.f32 %v5653_v10, %v2278_v25  ;;  %7427 = vst [vmem:[#allocation89_spill] sm:$0xff] %v5678_v19  ;;  %v2128_v25 = vmul.f32 1.442695, %v1936_v56  ;;  %v5683_v53 = vpop.eup %4155 }
 0x503   : > { %7428 = vst [vmem:[#allocation90_spill] sm:$0xff] %v5683_v53  ;;  %v5688_v34 = vpop.eup %4157 }
 0x504   : > { %v2280_v43 = vadd.f32 %v5660_v57, %v2279_v12  ;;  %v2132_v12 = vmul.f32 1.442695, %v1938_v15  ;;  %7429 = vst [vmem:[#allocation91_spill] sm:$0xff] %v5688_v34  ;;  %4163 = vpow2.f32 %v2128_v25  ;;  %v5693_v42 = vpop.eup %4159 }
 0x505   : > { %7430 = vst [vmem:[#allocation92_spill] sm:$0xff] %v5693_v42 }
 0x506   : > { %v2281_v32 = vadd.f32 %v5667_v7, %v2280_v43  ;;  %4165 = vpow2.f32 %v2132_v12  ;;  %v5698_v63 = vpop.eup %4161 }
 0x507   : > { %7431 = vst [vmem:[#allocation93_spill] sm:$0xff] %v5698_v63  ;;  %4167 = vpow2.f32 %v2136_v11 }
 0x508   : > { %v2282_v60 = vadd.f32 %v5678_v19, %v2281_v32  ;;  %v1946_v32 = vsub.f32 %v5251_v14, %v5437_v29  ;;  %4169 = vpow2.f32 %v2140_v4 }
 0x509   : > { %4171 = vpow2.f32 %v2144_v6 }
 0x50a   : > { %v2283_v43 = vadd.f32 %v5683_v53, %v2282_v60  ;;  %v1948_v60 = vsub.f32 %v5255_v1, %v5437_v29  ;;  %v5703_v25 = vpop.eup %4163  ;;  %v2148_v14 = vmul.f32 1.442695, %v1946_v32 }
 0x50b   : > { %7432 = vst [vmem:[#allocation94_spill] sm:$0xff] %v5703_v25 }
 0x50c   : > { %v2284_v56 = vadd.f32 %v5688_v34, %v2283_v43  ;;  %v7433_v43 = vld [vmem:[#allocation49_spill] sm:$0xff]  ;;  %v5708_v12 = vpop.eup %4165  ;;  %v2152_v1 = vmul.f32 1.442695, %v1948_v60  ;;  %4173 = vpow2.f32 %v2148_v14 }
 0x50d   : > { %v1950_v17 = vsub.f32 %v7433_v43, %v5437_v29  ;;  %7434 = vst [vmem:[#allocation49_spill] sm:$0xff] %v5708_v12  ;;  %v5713_v11 = vpop.eup %4167 }
 0x50e   : > { %v2285_v15 = vadd.f32 %v5693_v42, %v2284_v56  ;;  %v7435_v56 = vld [vmem:[#allocation51_spill] sm:$0xff]  ;;  %v5718_v4 = vpop.eup %4169  ;;  %4175 = vpow2.f32 %v2152_v1 }
 0x50f   : > { %v1952_v59 = vsub.f32 %v7435_v56, %v5437_v29  ;;  %7436 = vst [vmem:[#allocation51_spill] sm:$0xff] %v5713_v11  ;;  %v2156_v43 = vmul.f32 1.442695, %v1950_v17  ;;  %v5723_v6 = vpop.eup %4171  ;;  %v7442_v17 = vld [vmem:[#allocation58_spill] sm:$0xff] }
 0x510   : > { %v2286_v33 = vadd.f32 %v5698_v63, %v2285_v15  ;;  %v7437_v15 = vld [vmem:[#allocation53_spill] sm:$0xff]  ;;  %v1960_v14 = vsub.f32 %v7442_v17, %v5437_v29 }
 0x511   : > { %v1954_v63 = vsub.f32 %v7437_v15, %v5437_v29  ;;  %7438 = vst [vmem:[#allocation53_spill] sm:$0xff] %v5718_v4  ;;  %v2160_v56 = vmul.f32 1.442695, %v1952_v59  ;;  %4177 = vpow2.f32 %v2156_v43  ;;  %v7447_v43 = vld [vmem:[#allocation8_spill] sm:$0xff] }
 0x512   : > { %v2287_v44 = vadd.f32 %v5703_v25, %v2286_v33  ;;  %v7439_v33 = vld [vmem:[#allocation55_spill] sm:$0xff]  ;;  %v1875_v17 = vsub.f32 %v7447_v43, %v5657_v24 }
 0x513   : > { %v1956_v25 = vsub.f32 %v7439_v33, %v5437_v29  ;;  %7440 = vst [vmem:[#allocation55_spill] sm:$0xff] %v5723_v6  ;;  %v2164_v15 = vmul.f32 1.442695, %v1954_v63  ;;  %v7444_v33 = vld [vmem:[#allocation60_spill] sm:$0xff]  ;;  %4179 = vpow2.f32 %v2160_v56 }
 0x514   : > { %v2288_v50 = vadd.f32 %v5708_v12, %v2287_v44  ;;  %v7441_v44 = vld [vmem:[#allocation57_spill] sm:$0xff]  ;;  %v1962_v1 = vsub.f32 %v7444_v33, %v5437_v29  ;;  %v2006_v43 = vmul.f32 1.442695, %v1875_v17  ;;  %v1881_v17 = vsub.f32 %v7352_v3, %v5657_v24 }
 0x515   : > { %v1958_v12 = vsub.f32 %v7441_v44, %v5437_v29  ;;  %v2168_v59 = vmul.f32 1.442695, %v1956_v25  ;;  %4181 = vpow2.f32 %v2164_v15  ;;  %v7449_v25 = vld [vmem:[#allocation62_spill] sm:$0xff] }
 0x516   : > { %v2289_v32 = vadd.f32 %v5713_v11, %v2288_v50  ;;  %v5730_v11 = vpop.eup %4173  ;;  %v2180_v56 = vmul.f32 1.442695, %v1962_v1  ;;  %v7453_v1 = vld [vmem:[#allocation10_spill] sm:$0xff] }
 0x517   : > { %7443 = vst [vmem:[#allocation57_spill] sm:$0xff] %v5730_v11  ;;  %v5737_v44 = vpop.eup %4175  ;;  %v2172_v63 = vmul.f32 1.442695, %v1958_v12  ;;  %4183 = vpow2.f32 %v2168_v59  ;;  %v7451_v12 = vld [vmem:[#allocation9_spill] sm:$0xff]  ;;  %v1879_v59 = vsub.f32 %v7453_v1, %v5657_v24 }
 0x518   : > { %v2290_v60 = vadd.f32 %v5718_v4, %v2289_v32  ;;  %v7445_v4 = vld [vmem:[#allocation6_spill] sm:$0xff]  ;;  %7446 = vst [vmem:[#allocation58_spill] sm:$0xff] %v5737_v44  ;;  %v5742_v34 = vpop.eup %4177  ;;  %v1877_v15 = vsub.f32 %v7451_v12, %v5657_v24  ;;  %v1883_v12 = vsub.f32 %v7353_v52, %v5657_v24 }
 0x519   : > { %v1873_v42 = vsub.f32 %v7445_v4, %v5657_v24  ;;  %7448 = vst [vmem:[#allocation60_spill] sm:$0xff] %v5742_v34  ;;  %4185 = vpow2.f32 %v2172_v63  ;;  %v2014_v1 = vmul.f32 1.442695, %v1879_v59 }
 0x51a   : > { %v2291_v50 = vadd.f32 %v5723_v6, %v2290_v60  ;;  %v2176_v60 = vmul.f32 1.442695, %v1960_v14 }
 0x51b   : > { %v2002_v4 = vmul.f32 1.442695, %v1873_v42 }
 0x51c   : > { %v2292_v32 = vadd.f32 %v5730_v11, %v2291_v50  ;;  %v1964_v50 = vsub.f32 %v7449_v25, %v5437_v29  ;;  %v5747_v11 = vpop.eup %4179  ;;  %4187 = vpow2.f32 %v2176_v60  ;;  %v7454_v25 = vld [vmem:[#allocation64_spill] sm:$0xff]  ;;  %v2010_v60 = vmul.f32 1.442695, %v1877_v15  ;;  %v7460_v15 = vld [vmem:[#allocation13_spill] sm:$0xff] }
 0x51d   : > { %7450 = vst [vmem:[#allocation6_spill] sm:$0xff] %v5747_v11  ;;  %4189 = vpow2.f32 %v2180_v56 }
 0x51e   : > { %v2293_v6 = vadd.f32 %v5737_v44, %v2292_v32  ;;  %v5752_v32 = vpop.eup %4181  ;;  %v2184_v42 = vmul.f32 1.442695, %v1964_v50  ;;  %4191 = vpow2.f32 %v2002_v4  ;;  %v7458_v50 = vld [vmem:[#allocation66_spill] sm:$0xff] }
 0x51f   : > { %7452 = vst [vmem:[#allocation8_spill] sm:$0xff] %v5752_v32  ;;  %v5759_v63 = vpop.eup %4183  ;;  %4193 = vpow2.f32 %v2006_v43  ;;  %v1968_v4 = vsub.f32 %v7458_v50, %v5437_v29  ;;  %v2018_v43 = vmul.f32 1.442695, %v1881_v17  ;;  %v7463_v17 = vld [vmem:[#allocation17_spill] sm:$0xff] }
 0x520   : > { %v2294_v33 = vadd.f32 %v5742_v34, %v2293_v6  ;;  %v1966_v6 = vsub.f32 %v7454_v25, %v5437_v29  ;;  %7455 = vst [vmem:[#allocation62_spill] sm:$0xff] %v5759_v63  ;;  %v5764_v56 = vpop.eup %4185  ;;  %4195 = vpow2.f32 %v2184_v42  ;;  %v7462_v42 = vld [vmem:[#allocation67_spill] sm:$0xff] }
 0x521   : > { %7456 = vst [vmem:[#allocation9_spill] sm:$0xff] %v5764_v56  ;;  %4197 = vpow2.f32 %v2010_v60  ;;  %v1889_v60 = vsub.f32 %v7463_v17, %v5657_v24 }
 0x522   : > { %v2295_v14 = vadd.f32 %v5747_v11, %v2294_v33  ;;  %v5768_v25 = vpop.eup %4187  ;;  %v7461_v11 = vld [vmem:[#allocation15_spill] sm:$0xff]  ;;  %4199 = vpow2.f32 %v2014_v1  ;;  %v7465_v1 = vld [vmem:[#allocation18_spill] sm:$0xff] }
 0x523   : > { %7457 = vst [vmem:[#allocation10_spill] sm:$0xff] %v5768_v25  ;;  %v5773_v3 = vpop.eup %4189  ;;  %v1887_v50 = vsub.f32 %v7461_v11, %v5657_v24  ;;  %v2034_v19 = vmul.f32 1.442695, %v1889_v60 }
 0x524   : > { %v2296_v34 = vadd.f32 %v5752_v32, %v2295_v14  ;;  %v2188_v14 = vmul.f32 1.442695, %v1966_v6  ;;  %7459 = vst [vmem:[#allocation64_spill] sm:$0xff] %v5773_v3  ;;  %v2022_v6 = vmul.f32 1.442695, %v1883_v12 }
 0x526   : > { %v2297_v33 = vadd.f32 %v5759_v63, %v2296_v34  ;;  %v1885_v34 = vsub.f32 %v7460_v15, %v5657_v24  ;;  %v5777_v63 = vpop.eup %4191  ;;  %4201 = vpow2.f32 %v2188_v14  ;;  %v1891_v14 = vsub.f32 %v7465_v1, %v5657_v24 }
 0x527   : > { %v5780_v59 = vpop.eup %4193  ;;  %4203 = vpow2.f32 %v2018_v43 }
 0x528   : > { %v2298_v32 = vadd.f32 %v5764_v56, %v2297_v33  ;;  %v1970_v33 = vsub.f32 %v7462_v42, %v5437_v29  ;;  %v2192_v56 = vmul.f32 1.442695, %v1968_v4  ;;  %v2026_v44 = vmul.f32 1.442695, %v1885_v34 }
 0x529   : > { %4205 = vpow2.f32 %v2022_v6  ;;  %v2030_v4 = vmul.f32 1.442695, %v1887_v50 }
 0x52a   : > { %v2299_v52 = vadd.f32 %v5768_v25, %v2298_v32  ;;  %v5789_v32 = vpop.eup %4195  ;;  %v2325_v25 = vadd.f32 %v5780_v59, %v5777_v63  ;;  %4207 = vpow2.f32 %v2192_v56  ;;  %v2196_v43 = vmul.f32 1.442695, %v1970_v33  ;;  %v7469_v56 = vld [vmem:[#allocation20_spill] sm:$0xff] }
 0x52b   : > { %7464 = vst [vmem:[#allocation66_spill] sm:$0xff] %v5789_v32  ;;  %v5793_v11 = vpop.eup %4197  ;;  %4209 = vpow2.f32 %v2026_v44  ;;  %v1895_v33 = vsub.f32 %v7469_v56, %v5657_v24 }
 0x52c   : > { %v2300_v15 = vadd.f32 %v5773_v3, %v2299_v52  ;;  %v7466_v52 = vld [vmem:[#allocation69_spill] sm:$0xff]  ;;  %v2326_v34 = vadd.f32 %v5793_v11, %v2325_v25  ;;  %v5801_v17 = vpop.eup %4199  ;;  %v7467_v3 = vld [vmem:[#allocation19_spill] sm:$0xff]  ;;  %4211 = vpow2.f32 %v2030_v4  ;;  %v2038_v25 = vmul.f32 1.442695, %v1891_v14 }
 0x52d   : > { %v1972_v42 = vsub.f32 %v7466_v52, %v5437_v29  ;;  %v1893_v53 = vsub.f32 %v7467_v3, %v5657_v24  ;;  %v7470_v52 = vld [vmem:[#allocation71_spill] sm:$0xff]  ;;  %4213 = vpow2.f32 %v2196_v43  ;;  %v7473_v43 = vld [vmem:[#allocation22_spill] sm:$0xff] }
 0x52e   : > { %v2301_v12 = vadd.f32 %v5789_v32, %v2300_v15  ;;  %v5805_v15 = vpop.eup %4201  ;;  %v2327_v1 = vadd.f32 %v5801_v17, %v2326_v34  ;;  %v1974_v32 = vsub.f32 %v7470_v52, %v5437_v29  ;;  %v7471_v34 = vld [vmem:[#allocation21_spill] sm:$0xff]  ;;  %4215 = vpow2.f32 %v2034_v19 }
 0x52f   : > { %7468 = vst [vmem:[#allocation13_spill] sm:$0xff] %v5805_v15  ;;  %v5808_v6 = vpop.eup %4203  ;;  %v2200_v3 = vmul.f32 1.442695, %v1972_v42  ;;  %v1897_v7 = vsub.f32 %v7471_v34, %v5657_v24  ;;  %v2042_v57 = vmul.f32 1.442695, %v1893_v53  ;;  %v1899_v42 = vsub.f32 %v7473_v43, %v5657_v24  ;;  %v7474_v52 = vld [vmem:[#allocation73_spill] sm:$0xff] }
 0x530   : > { %v2302_v50 = vadd.f32 %v5805_v15, %v2301_v12  ;;  %v2328_v44 = vadd.f32 %v5808_v6, %v2327_v1  ;;  %v5816_v60 = vpop.eup %4205  ;;  %4217 = vpow2.f32 %v2038_v25  ;;  %v2046_v1 = vmul.f32 1.442695, %v1895_v33 }
 0x531   : > { %v5820_v12 = vpop.eup %4207  ;;  %v1976_v15 = vsub.f32 %v7474_v52, %v5437_v29  ;;  %4219 = vpow2.f32 %v2200_v3  ;;  %v2204_v34 = vmul.f32 1.442695, %v1974_v32  ;;  %v2050_v39 = vmul.f32 1.442695, %v1897_v7  ;;  %v7477_v3 = vld [vmem:[#allocation24_spill] sm:$0xff]  ;;  %v7478_v52 = vld [vmem:[#allocation75_spill] sm:$0xff] }
 0x532   : > { %7472 = vst [vmem:[#allocation15_spill] sm:$0xff] %v5820_v12  ;;  %v2329_v56 = vadd.f32 %v5816_v60, %v2328_v44  ;;  %v5823_v4 = vpop.eup %4209  ;;  %v2303_v14 = vadd.f32 %v5820_v12, %v2302_v50  ;;  %v7475_v44 = vld [vmem:[#allocation23_spill] sm:$0xff]  ;;  %4221 = vpow2.f32 %v2042_v57  ;;  %v1903_v32 = vsub.f32 %v7477_v3, %v5657_v24 }
 0x533   : > { %v5831_v53 = vpop.eup %4211  ;;  %v1901_v10 = vsub.f32 %v7475_v44, %v5657_v24  ;;  %4223 = vpow2.f32 %v2046_v1  ;;  %v1978_v12 = vsub.f32 %v7478_v52, %v5437_v29  ;;  %v2208_v44 = vmul.f32 1.442695, %v1976_v15  ;;  %v7482_v52 = vld [vmem:[#allocation76_spill] sm:$0xff] }
 0x534   : > { %v2330_v19 = vadd.f32 %v5823_v4, %v2329_v56  ;;  %v5835_v50 = vpop.eup %4213  ;;  %v2054_v56 = vmul.f32 1.442695, %v1899_v42  ;;  %4225 = vpow2.f32 %v2204_v34  ;;  %v7481_v34 = vld [vmem:[#allocation28_spill] sm:$0xff] }
 0x535   : > { %7476 = vst [vmem:[#allocation67_spill] sm:$0xff] %v5835_v50  ;;  %v5838_v25 = vpop.eup %4215  ;;  %v2304_v33 = vadd.f32 %v5835_v50, %v2303_v14  ;;  %4227 = vpow2.f32 %v2050_v39  ;;  %v2058_v61 = vmul.f32 1.442695, %v1901_v10  ;;  %v1907_v15 = vsub.f32 %v7481_v34, %v5657_v24 }
 0x536   : > { %v2331_v43 = vadd.f32 %v5831_v53, %v2330_v19  ;;  %v5846_v57 = vpop.eup %4217  ;;  %v7479_v19 = vld [vmem:[#allocation26_spill] sm:$0xff]  ;;  %4229 = vpow2.f32 %v2054_v56  ;;  %v1980_v50 = vsub.f32 %v7482_v52, %v5437_v29 }
 0x537   : > { %v1905_v48 = vsub.f32 %v7479_v19, %v5657_v24  ;;  %v5850_v14 = vpop.eup %4219  ;;  %4231 = vpow2.f32 %v2208_v44  ;;  %v2212_v19 = vmul.f32 1.442695, %v1978_v12  ;;  %v7487_v44 = vld [vmem:[#allocation31_spill] sm:$0xff]  ;;  %v7488_v52 = vld [vmem:[#allocation78_spill] sm:$0xff] }
 0x538   : > { %v2332_v7 = vadd.f32 %v5838_v25, %v2331_v43  ;;  %7480 = vst [vmem:[#allocation17_spill] sm:$0xff] %v5850_v14  ;;  %v5853_v1 = vpop.eup %4221  ;;  %v2305_v42 = vadd.f32 %v5850_v14, %v2304_v33  ;;  %v2062_v43 = vmul.f32 1.442695, %v1903_v32  ;;  %4233 = vpow2.f32 %v2058_v61 }
 0x539   : > { %v5861_v10 = vpop.eup %4223  ;;  %v2066_v0 = vmul.f32 1.442695, %v1905_v48  ;;  %v1911_v12 = vsub.f32 %v7487_v44, %v5657_v24  ;;  %v1982_v14 = vsub.f32 %v7488_v52, %v5437_v29  ;;  %v7494_v52 = vld [vmem:[#allocation80_spill] sm:$0xff] }
 0x53a   : > { %v2333_v3 = vadd.f32 %v5846_v57, %v2332_v7  ;;  %7483 = vst [vmem:[#allocation18_spill] sm:$0xff] %v5861_v10  ;;  %v7484_v7 = vld [vmem:[#allocation30_spill] sm:$0xff]  ;;  %v5865_v33 = vpop.eup %4225  ;;  %4235 = vpow2.f32 %v2062_v43 }
 0x53b   : > { %v1909_v45 = vsub.f32 %v7484_v7, %v5657_v24  ;;  %7485 = vst [vmem:[#allocation69_spill] sm:$0xff] %v5865_v33  ;;  %v5868_v56 = vpop.eup %4227  ;;  %v2306_v32 = vadd.f32 %v5865_v33, %v2305_v42  ;;  %4237 = vpow2.f32 %v2212_v19  ;;  %v2216_v7 = vmul.f32 1.442695, %v1980_v50  ;;  %v7493_v19 = vld [vmem:[#allocation33_spill] sm:$0xff] }
 0x53c   : > { %v2334_v39 = vadd.f32 %v5853_v1, %v2333_v3  ;;  %7486 = vst [vmem:[#allocation19_spill] sm:$0xff] %v5868_v56  ;;  %v2070_v3 = vmul.f32 1.442695, %v1907_v15  ;;  %v5876_v48 = vpop.eup %4229  ;;  %4239 = vpow2.f32 %v2066_v0  ;;  %v1915_v50 = vsub.f32 %v7493_v19, %v5657_v24 }
 0x53d   : > { %7489 = vst [vmem:[#allocation20_spill] sm:$0xff] %v5876_v48  ;;  %v5880_v42 = vpop.eup %4231  ;;  %v1984_v33 = vsub.f32 %v7494_v52, %v5437_v29  ;;  %v7500_v52 = vld [vmem:[#allocation81_spill] sm:$0xff] }
 0x53e   : > { %v2335_v34 = vadd.f32 %v5861_v10, %v2334_v39  ;;  %v7490_v39 = vld [vmem:[#allocation32_spill] sm:$0xff]  ;;  %v2074_v10 = vmul.f32 1.442695, %v1909_v45  ;;  %7491 = vst [vmem:[#allocation71_spill] sm:$0xff] %v5880_v42  ;;  %v5883_v43 = vpop.eup %4233  ;;  %v2307_v15 = vadd.f32 %v5880_v42, %v2306_v32  ;;  %4241 = vpow2.f32 %v2070_v3 }
 0x53f   : > { %v1913_v8 = vsub.f32 %v7490_v39, %v5657_v24  ;;  %7492 = vst [vmem:[#allocation21_spill] sm:$0xff] %v5883_v43  ;;  %4243 = vpow2.f32 %v2216_v7  ;;  %v2220_v39 = vmul.f32 1.442695, %v1982_v14  ;;  %v7499_v7 = vld [vmem:[#allocation35_spill] sm:$0xff]  ;;  %v1986_v42 = vsub.f32 %v7500_v52, %v5437_v29  ;;  %v7505_v52 = vld [vmem:[#allocation82_spill] sm:$0xff] }
 0x540   : > { %v2336_v61 = vadd.f32 %v5868_v56, %v2335_v34  ;;  %v2078_v34 = vmul.f32 1.442695, %v1911_v12  ;;  %v5891_v45 = vpop.eup %4235  ;;  %4245 = vpow2.f32 %v2074_v10  ;;  %v1919_v14 = vsub.f32 %v7499_v7, %v5657_v24 }
 0x541   : > { %7495 = vst [vmem:[#allocation22_spill] sm:$0xff] %v5891_v45  ;;  %v2082_v56 = vmul.f32 1.442695, %v1913_v8  ;;  %v5895_v32 = vpop.eup %4237 }
 0x542   : > { %v2337_v44 = vadd.f32 %v5876_v48, %v2336_v61  ;;  %v7496_v61 = vld [vmem:[#allocation34_spill] sm:$0xff]  ;;  %7497 = vst [vmem:[#allocation73_spill] sm:$0xff] %v5895_v32  ;;  %v5898_v3 = vpop.eup %4239  ;;  %v2308_v12 = vadd.f32 %v5895_v32, %v2307_v15  ;;  %4247 = vpow2.f32 %v2078_v34  ;;  %v1988_v32 = vsub.f32 %v7505_v52, %v5437_v29 }
 0x543   : > { %v1917_v48 = vsub.f32 %v7496_v61, %v5657_v24  ;;  %7498 = vst [vmem:[#allocation23_spill] sm:$0xff] %v5898_v3  ;;  %4249 = vpow2.f32 %v2220_v39  ;;  %v2224_v61 = vmul.f32 1.442695, %v1984_v33  ;;  %v7504_v39 = vld [vmem:[#allocation37_spill] sm:$0xff] }
 0x544   : > { %v2338_v0 = vadd.f32 %v5883_v43, %v2337_v44  ;;  %v2086_v44 = vmul.f32 1.442695, %v1915_v50  ;;  %v5906_v10 = vpop.eup %4241  ;;  %4251 = vpow2.f32 %v2082_v56  ;;  %v1923_v33 = vsub.f32 %v7504_v39, %v5657_v24 }
 0x545   : > { %7501 = vst [vmem:[#allocation24_spill] sm:$0xff] %v5906_v10  ;;  %v2090_v43 = vmul.f32 1.442695, %v1917_v48  ;;  %v5910_v15 = vpop.eup %4243  ;;  %v2232_v52 = vmul.f32 1.442695, %v1988_v32 }
 0x546   : > { %v2339_v19 = vadd.f32 %v5891_v45, %v2338_v0  ;;  %v7502_v0 = vld [vmem:[#allocation36_spill] sm:$0xff]  ;;  %7503 = vst [vmem:[#allocation75_spill] sm:$0xff] %v5910_v15  ;;  %v5913_v34 = vpop.eup %4245  ;;  %v2309_v50 = vadd.f32 %v5910_v15, %v2308_v12  ;;  %4253 = vpow2.f32 %v2086_v44 }
 0x547   : > { %v1921_v45 = vsub.f32 %v7502_v0, %v5657_v24  ;;  %4255 = vpow2.f32 %v2224_v61  ;;  %v2228_v0 = vmul.f32 1.442695, %v1986_v42  ;;  %v7508_v61 = vld [vmem:[#allocation40_spill] sm:$0xff] }
 0x548   : > { %v2340_v8 = vadd.f32 %v5898_v3, %v2339_v19  ;;  %v2094_v19 = vmul.f32 1.442695, %v1919_v14  ;;  %v5921_v48 = vpop.eup %4247  ;;  %4257 = vpow2.f32 %v2090_v43  ;;  %v1927_v42 = vsub.f32 %v7508_v61, %v5657_v24 }
 0x549   : > { %v2098_v3 = vmul.f32 1.442695, %v1921_v45  ;;  %v5925_v12 = vpop.eup %4249  ;;  %v1929_v43 = vsub.f32 %v7378_v9, %v5657_v24 }
 0x54a   : > { %v2341_v7 = vadd.f32 %v5906_v10, %v2340_v8  ;;  %v7506_v8 = vld [vmem:[#allocation38_spill] sm:$0xff]  ;;  %7507 = vst [vmem:[#allocation26_spill] sm:$0xff] %v5925_v12  ;;  %v5928_v44 = vpop.eup %4251  ;;  %v2310_v14 = vadd.f32 %v5925_v12, %v2309_v50  ;;  %4259 = vpow2.f32 %v2094_v19 }
 0x54b   : > { %v1925_v10 = vsub.f32 %v7506_v8, %v5657_v24  ;;  %4261 = vpow2.f32 %v2228_v0  ;;  %v2110_v0 = vmul.f32 1.442695, %v1927_v42 }
 0x54c   : > { %v2342_v56 = vadd.f32 %v5913_v34, %v2341_v7  ;;  %v2102_v7 = vmul.f32 1.442695, %v1923_v33  ;;  %v5934_v8 = vpop.eup %4253  ;;  %4263 = vpow2.f32 %v2098_v3  ;;  %v7512_v33 = vld [vmem:[#allocation43_spill] sm:$0xff] }
 0x54d   : > { %7509 = vst [vmem:[#allocation28_spill] sm:$0xff] %v5934_v8  ;;  %v2106_v45 = vmul.f32 1.442695, %v1925_v10  ;;  %v1931_v32 = vsub.f32 %v7512_v33, %v5657_v24 }
 0x54e   : > { %v2343_v39 = vadd.f32 %v5921_v48, %v2342_v56  ;;  %v5938_v56 = vpop.eup %4255  ;;  %4265 = vpow2.f32 %v2102_v7 }
 0x54f   : > { %7510 = vst [vmem:[#allocation76_spill] sm:$0xff] %v5938_v56  ;;  %v5941_v12 = vpop.eup %4257  ;;  %v2311_v19 = vadd.f32 %v5938_v56, %v2310_v14  ;;  %4267 = vpow2.f32 %v2232_v52  ;;  %v7518_v52 = vld [vmem:[#allocation45_spill] sm:$0xff] }
 0x550   : > { %v2344_v15 = vadd.f32 %v5928_v44, %v2343_v39  ;;  %7511 = vst [vmem:[#allocation30_spill] sm:$0xff] %v5941_v12  ;;  %v7513_v39 = vld [vmem:[#allocation83_spill] sm:$0xff]  ;;  %v5950_v10 = vpop.eup %4259  ;;  %4269 = vpow2.f32 %v2106_v45 }
 0x551   : > { %v7514_v61 = vsub.f32 %v7513_v39, %v5437_v29  ;;  %7515 = vst [vmem:[#allocation31_spill] sm:$0xff] %v5950_v10  ;;  %v5954_v14 = vpop.eup %4261  ;;  %v1935_v39 = vsub.f32 %v7518_v52, %v5657_v24  ;;  %4271 = vpow2.f32 %v2110_v0 }
 0x552   : > { %v2345_v50 = vadd.f32 %v5934_v8, %v2344_v15  ;;  %v1933_v15 = vsub.f32 %v7380_v55, %v5657_v24  ;;  %v2114_v8 = vmul.f32 1.442695, %v1929_v43  ;;  %7516 = vst [vmem:[#allocation78_spill] sm:$0xff] %v5954_v14  ;;  %v5957_v7 = vpop.eup %4263  ;;  %v2312_v42 = vadd.f32 %v5954_v14, %v2311_v19 }
 0x553   : > { %v2236_v9 = vmul.f32 1.442695, %v7514_v61  ;;  %7517 = vst [vmem:[#allocation32_spill] sm:$0xff] %v5957_v7  ;;  %v7519_v61 = vld [vmem:[#allocation84_spill] sm:$0xff] }
 0x554   : > { %v2346_v3 = vadd.f32 %v5941_v12, %v2345_v50  ;;  %v2118_v50 = vmul.f32 1.442695, %v1931_v32  ;;  %v7520_v56 = vsub.f32 %v7519_v61, %v5437_v29  ;;  %v5966_v45 = vpop.eup %4265  ;;  %v2122_v12 = vmul.f32 1.442695, %v1933_v15  ;;  %v7525_v61 = vld [vmem:[#allocation85_spill] sm:$0xff] }
 0x555   : > { %4273 = vpow2.f32 %v2236_v9  ;;  %7521 = vst [vmem:[#allocation33_spill] sm:$0xff] %v5966_v45  ;;  %v5970_v19 = vpop.eup %4267  ;;  %v7524_v9 = vld [vmem:[#allocation47_spill] sm:$0xff]  ;;  %v7526_v14 = vsub.f32 %v7525_v61, %v5437_v29  ;;  %v7532_v61 = vld [vmem:[#allocation86_spill] sm:$0xff] }
 0x556   : > { %v2347_v33 = vadd.f32 %v5950_v10, %v2346_v3  ;;  %v2240_v55 = vmul.f32 1.442695, %v7520_v56  ;;  %v7522_v3 = vld [vmem:[#allocation46_spill] sm:$0xff]  ;;  %4275 = vpow2.f32 %v2114_v8  ;;  %7523 = vst [vmem:[#allocation80_spill] sm:$0xff] %v5970_v19  ;;  %v5973_v0 = vpop.eup %4269  ;;  %v2313_v32 = vadd.f32 %v5970_v19, %v2312_v42 }
 0x557   : > { %v1937_v10 = vsub.f32 %v7522_v3, %v5657_v24  ;;  %v1939_v56 = vsub.f32 %v7524_v9, %v5657_v24  ;;  %4277 = vpow2.f32 %v2118_v50  ;;  %v2244_v3 = vmul.f32 1.442695, %v7526_v14  ;;  %v5982_v15 = vpop.eup %4271 }
 0x558   : > { %v2348_v43 = vadd.f32 %v5957_v7, %v2347_v33  ;;  %v2126_v33 = vmul.f32 1.442695, %v1935_v39  ;;  %4279 = vpow2.f32 %v2240_v55  ;;  %7527 = vst [vmem:[#allocation34_spill] sm:$0xff] %v5982_v15  ;;  %v7531_v55 = vld [vmem:[#allocation50_spill] sm:$0xff]  ;;  %v7533_v19 = vsub.f32 %v7532_v61, %v5437_v29  ;;  %v7537_v61 = vld [vmem:[#allocation87_spill] sm:$0xff] }
 0x559   : > { %4281 = vpow2.f32 %v2122_v12  ;;  %v2130_v7 = vmul.f32 1.442695, %v1937_v10  ;;  %v1943_v14 = vsub.f32 %v7531_v55, %v5657_v24 }
 0x55a   : > { %v2349_v52 = vadd.f32 %v5966_v45, %v2348_v43  ;;  %v7528_v43 = vld [vmem:[#allocation48_spill] sm:$0xff]  ;;  %4283 = vpow2.f32 %v2126_v33 }
 0x55b   : > { %v1941_v45 = vsub.f32 %v7528_v43, %v5657_v24  ;;  %v5986_v42 = vpop.eup %4273  ;;  %4285 = vpow2.f32 %v2244_v3  ;;  %v2248_v43 = vmul.f32 1.442695, %v7533_v19  ;;  %v7536_v3 = vld [vmem:[#allocation54_spill] sm:$0xff] }
 0x55c   : > { %v2350_v8 = vadd.f32 %v5973_v0, %v2349_v52  ;;  %7529 = vst [vmem:[#allocation35_spill] sm:$0xff] %v5986_v42  ;;  %v5989_v50 = vpop.eup %4275  ;;  %v2314_v39 = vadd.f32 %v5986_v42, %v2313_v32  ;;  %v2134_v52 = vmul.f32 1.442695, %v1939_v56  ;;  %4287 = vpow2.f32 %v2130_v7 }
 0x55d   : > { %7530 = vst [vmem:[#allocation81_spill] sm:$0xff] %v5989_v50  ;;  %v5998_v10 = vpop.eup %4277  ;;  %v1947_v19 = vsub.f32 %v7536_v3, %v5657_v24  ;;  %v7538_v42 = vsub.f32 %v7537_v61, %v5437_v29  ;;  %v7541_v29 = vld [vmem:[#allocation59_spill] sm:$0xff] }
 0x55e   : > { %v2351_v9 = vadd.f32 %v5982_v15, %v2350_v8  ;;  %7534 = vst [vmem:[#allocation36_spill] sm:$0xff] %v5998_v10  ;;  %v1945_v8 = vsub.f32 %v7387_v21, %v5657_v24  ;;  %v2138_v15 = vmul.f32 1.442695, %v1941_v45  ;;  %v6002_v32 = vpop.eup %4279  ;;  %4289 = vpow2.f32 %v2134_v52 }
 0x55f   : > { %7535 = vst [vmem:[#allocation37_spill] sm:$0xff] %v6002_v32  ;;  %v6005_v33 = vpop.eup %4281  ;;  %v2315_v56 = vadd.f32 %v6002_v32, %v2314_v39  ;;  %4291 = vpow2.f32 %v2248_v43  ;;  %v2252_v21 = vmul.f32 1.442695, %v7538_v42  ;;  %v1951_v42 = vsub.f32 %v7541_v29, %v5657_v24 }
 0x560   : > { %v2352_v12 = vadd.f32 %v5989_v50, %v2351_v9  ;;  %v2142_v9 = vmul.f32 1.442695, %v1943_v14  ;;  %v6014_v45 = vpop.eup %4283  ;;  %4293 = vpow2.f32 %v2138_v15  ;;  %v2146_v50 = vmul.f32 1.442695, %v1945_v8  ;;  %v7543_v15 = vld [vmem:[#allocation61_spill] sm:$0xff] }
 0x561   : > { %v6018_v39 = vpop.eup %4285  ;;  %v2150_v43 = vmul.f32 1.442695, %v1947_v19  ;;  %v1953_v8 = vsub.f32 %v7543_v15, %v5657_v24  ;;  %v7545_v19 = vld [vmem:[#allocation63_spill] sm:$0xff] }
 0x562   : > { %v2353_v55 = vadd.f32 %v5998_v10, %v2352_v12  ;;  %v7539_v12 = vld [vmem:[#allocation56_spill] sm:$0xff]  ;;  %7540 = vst [vmem:[#allocation82_spill] sm:$0xff] %v6018_v39  ;;  %v6021_v52 = vpop.eup %4287  ;;  %v2316_v14 = vadd.f32 %v6018_v39, %v2315_v56  ;;  %4295 = vpow2.f32 %v2142_v9  ;;  %v1955_v9 = vsub.f32 %v7545_v19, %v5657_v24 }
 0x563   : > { %v1949_v10 = vsub.f32 %v7539_v12, %v5657_v24  ;;  %4297 = vpow2.f32 %v2252_v21  ;;  %v2158_v21 = vmul.f32 1.442695, %v1951_v42 }
 0x564   : > { %v2354_v7 = vadd.f32 %v6005_v33, %v2353_v55  ;;  %v6027_v61 = vpop.eup %4289  ;;  %4299 = vpow2.f32 %v2146_v50  ;;  %v1957_v50 = vsub.f32 %v7396_v2, %v5657_v24  ;;  %v1961_v2 = vsub.f32 %v7398_v20, %v5657_v24 }
 0x565   : > { %7542 = vst [vmem:[#allocation38_spill] sm:$0xff] %v6027_v61  ;;  %v2154_v12 = vmul.f32 1.442695, %v1949_v10  ;;  %4301 = vpow2.f32 %v2150_v43  ;;  %v2162_v10 = vmul.f32 1.442695, %v1953_v8  ;;  %v7549_v43 = vld [vmem:[#allocation68_spill] sm:$0xff] }
 0x566   : > { %v2355_v3 = vadd.f32 %v6014_v45, %v2354_v7  ;;  %v6031_v7 = vpop.eup %4291  ;;  %v1959_v42 = vsub.f32 %v7549_v43, %v5657_v24  ;;  %v2170_v8 = vmul.f32 1.442695, %v1957_v50  ;;  %v1965_v43 = vsub.f32 %v7401_v22, %v5657_v24 }
 0x567   : > { %7544 = vst [vmem:[#allocation40_spill] sm:$0xff] %v6031_v7  ;;  %v6034_v56 = vpop.eup %4293  ;;  %v2317_v29 = vadd.f32 %v6031_v7, %v2316_v14  ;;  %4303 = vpow2.f32 %v2154_v12  ;;  %v2178_v20 = vmul.f32 1.442695, %v1961_v2 }
 0x568   : > { %v2356_v55 = vadd.f32 %v6021_v52, %v2355_v3  ;;  %v6040_v39 = vpop.eup %4295  ;;  %4305 = vpow2.f32 %v2158_v21  ;;  %v2174_v21 = vmul.f32 1.442695, %v1959_v42  ;;  %v2186_v22 = vmul.f32 1.442695, %v1965_v43 }
 0x569   : > { %7546 = vst [vmem:[#allocation43_spill] sm:$0xff] %v6040_v39  ;;  %v6044_v15 = vpop.eup %4297  ;;  %4307 = vpow2.f32 %v2162_v10 }
 0x56a   : > { %v2357_v32 = vadd.f32 %v6027_v61, %v2356_v55  ;;  %7547 = vst [vmem:[#allocation83_spill] sm:$0xff] %v6044_v15  ;;  %v6047_v61 = vpop.eup %4299  ;;  %v2318_v14 = vadd.f32 %v6044_v15, %v2317_v29  ;;  %v7551_v29 = vld [vmem:[#allocation72_spill] sm:$0xff] }
 0x56b   : > { %7548 = vst [vmem:[#allocation45_spill] sm:$0xff] %v6047_v61  ;;  %v6053_v7 = vpop.eup %4301  ;;  %v1963_v15 = vsub.f32 %v7551_v29, %v5657_v24  ;;  %v1969_v29 = vsub.f32 %v7403_v31, %v5657_v24 }
 0x56c   : > { %v2358_v3 = vadd.f32 %v6034_v56, %v2357_v32  ;;  %v2166_v32 = vmul.f32 1.442695, %v1955_v9  ;;  %7550 = vst [vmem:[#allocation84_spill] sm:$0xff] %v6053_v7 }
 0x56d   : > { %v2194_v31 = vmul.f32 1.442695, %v1969_v29  ;;  %v1979_v29 = vsub.f32 %v5405_v28, %v5657_v24 }
 0x56e   : > { %v2359_v55 = vadd.f32 %v6040_v39, %v2358_v3  ;;  %v6058_v3 = vpop.eup %4303  ;;  %v2319_v39 = vrot.slane %v2318_v14, 4  ;;  %4309 = vpow2.f32 %v2166_v32  ;;  %v2182_v32 = vmul.f32 1.442695, %v1963_v15 }
 0x56f   : > { %4311 = vpow2.f32 %v2170_v8 }
 0x570   : > { %v2360_v19 = vadd.f32 %v6047_v61, %v2359_v55  ;;  %v6063_v55 = vpop.eup %4305  ;;  %4313 = vpow2.f32 %v2174_v21  ;;  %v1973_v21 = vsub.f32 %v5361_v41, %v5657_v24 }
 0x571   : > { %v6068_v10 = vpop.eup %4307  ;;  %4315 = vpow2.f32 %v2178_v20 }
 0x572   : > { %v2361_v12 = vadd.f32 %v6053_v7, %v2360_v19  ;;  %v2320_v19 = vadd.f32 %v2319_v39, %v2318_v14  ;;  %v7552_v7 = vld [vmem:[#allocation77_spill] sm:$0xff]  ;;  %v1971_v39 = vsub.f32 %v5347_v18, %v5657_v24  ;;  %4317 = vpow2.f32 %v2182_v32 }
 0x573   : > { %v1967_v61 = vsub.f32 %v7552_v7, %v5657_v24  ;;  %4319 = vpow2.f32 %v2186_v22  ;;  %v2202_v41 = vmul.f32 1.442695, %v1973_v21  ;;  %v2214_v21 = vmul.f32 1.442695, %v1979_v29 }
 0x574   : > { %v2362_v9 = vadd.f32 %v6058_v3, %v2361_v12  ;;  %v6073_v12 = vpop.eup %4309  ;;  %v2198_v18 = vmul.f32 1.442695, %v1971_v39 }
 0x575   : > { %v6078_v8 = vpop.eup %4311  ;;  %v2190_v7 = vmul.f32 1.442695, %v1967_v61 }
 0x576   : > { %v2363_v50 = vadd.f32 %v6063_v55, %v2362_v9  ;;  %v2321_v9 = vrot.slane %v2320_v19, 2  ;;  %v6083_v14 = vpop.eup %4313 }
 0x577   : > { %v6088_v20 = vpop.eup %4315  ;;  %4321 = vpow2.f32 %v2190_v7 }
 0x578   : > { %v2364_v42 = vadd.f32 %v6068_v10, %v2363_v50  ;;  %v2322_v50 = vadd.f32 %v2321_v9, %v2320_v19  ;;  %v6093_v32 = vpop.eup %4317  ;;  %4323 = vpow2.f32 %v2194_v31 }
 0x579   : > { %7553 = vst [vmem:[#allocation46_spill] sm:$0xff] %v6093_v32  ;;  %v6100_v19 = vpop.eup %4319  ;;  %4325 = vpow2.f32 %v2198_v18 }
 0x57a   : > { %v2365_v2 = vadd.f32 %v6073_v12, %v2364_v42  ;;  %v1975_v42 = vsub.f32 %v5377_v5, %v5657_v24  ;;  %7554 = vst [vmem:[#allocation47_spill] sm:$0xff] %v6100_v19  ;;  %v2323_v9 = vrot.slane %v2322_v50, 1  ;;  %4327 = vpow2.f32 %v2202_v41 }
 0x57c   : > { %v2366_v15 = vadd.f32 %v6078_v8, %v2365_v2  ;;  %v1977_v2 = vsub.f32 %v5391_v16, %v5657_v24  ;;  %v2206_v5 = vmul.f32 1.442695, %v1975_v42 }
 0x57d   : > { %v6103_v7 = vpop.eup %4321 }
 0x57e   : > { %v2367_v43 = vadd.f32 %v6083_v14, %v2366_v15  ;;  %7555 = vst [vmem:[#allocation85_spill] sm:$0xff] %v6103_v7  ;;  %v1981_v15 = vsub.f32 %v5417_v47, %v5657_v24  ;;  %v2210_v16 = vmul.f32 1.442695, %v1977_v2  ;;  %v6108_v28 = vpop.eup %4323  ;;  %4329 = vpow2.f32 %v2206_v5 }
 0x57f   : > { %7556 = vst [vmem:[#allocation48_spill] sm:$0xff] %v6108_v28  ;;  %v6113_v18 = vpop.eup %4325  ;;  %v1989_v5 = vsub.f32 %v5462_v38, %v5657_v24 }
 0x580   : > { %v2368_v61 = vadd.f32 %v6088_v20, %v2367_v43  ;;  %v2324_v43 = vadd.f32 %v2323_v9, %v2322_v50  ;;  %7557 = vst [vmem:[#allocation50_spill] sm:$0xff] %v6113_v18  ;;  %4331 = vpow2.f32 %v2210_v16  ;;  %v2218_v47 = vmul.f32 1.442695, %v1981_v15  ;;  %v6118_v41 = vpop.eup %4327 }
 0x581   : > { %4333 = vpow2.f32 %v2214_v21  ;;  %v1987_v50 = vsub.f32 %v5441_v23, %v5657_v24  ;;  %v1991_v16 = vsub.f32 %v5478_v46, %v5657_v24 }
 0x582   : > { %v2369_v22 = vadd.f32 %v6093_v32, %v2368_v61  ;;  %v1983_v61 = vsub.f32 %v5425_v30, %v5657_v24  ;;  %4335 = vrcp.f32 %v2324_v43  ;;  %v7566_v32 = vld [vmem:[#allocation44_spill] sm:$0xff] }
 0x583   : > { %4337 = vpow2.f32 %v2218_v47  ;;  %v2230_v21 = vmul.f32 1.442695, %v1987_v50  ;;  %v7559_v50 = vld [vmem:[#allocation12_spill] sm:$0xff] }
 0x584   : > { %v2370_v39 = vadd.f32 %v6100_v19, %v2369_v22  ;;  %v1985_v22 = vsub.f32 %v5427_v62, %v5657_v24  ;;  %v2222_v30 = vmul.f32 1.442695, %v1983_v61  ;;  %v6123_v9 = vpop.eup %4329  ;;  %v2234_v61 = vmul.f32 1.442695, %v1989_v5 }
 0x585   : > { %v7560_v5 = vsub.f32 %v5494_v26, %v5657_v24 }
 0x586   : > { %v2371_v31 = vadd.f32 %v6103_v7, %v2370_v39  ;;  %v2226_v62 = vmul.f32 1.442695, %v1985_v22  ;;  %v6128_v15 = vpop.eup %4331  ;;  %4339 = vpow2.f32 %v2222_v30  ;;  %v2238_v22 = vmul.f32 1.442695, %v1991_v16 }
 0x587   : > { %v6132_v23 = vpop.eup %4333  ;;  %v7561_v16 = vsub.f32 %v5516_v13, %v5657_v24 }
 0x588   : > { %v2372_v42 = vadd.f32 %v6108_v28, %v2371_v31  ;;  %v6135_v43 = vpop.eup %4335  ;;  %4341 = vpow2.f32 %v2226_v62  ;;  %v2242_v62 = vmul.f32 1.442695, %v7560_v5 }
 0x589   : > { %4343 = vpow2.f32 %v2230_v21  ;;  %v2398_v30 = vmul.f32 %v6135_v43, %v7559_v50 }
 0x58a   : > { %v2373_v2 = vadd.f32 %v6113_v18, %v2372_v42  ;;  %v6138_v42 = vpop.eup %4337  ;;  %4345 = vpow2.f32 %v2234_v61  ;;  %v7562_v61 = vsub.f32 %v5547_v27, %v5657_v24 }
 0x58b   : > { %4347 = vpow2.f32 %v2238_v22 }
 0x58c   : > { %v2374_v29 = vadd.f32 %v6118_v41, %v2373_v2  ;;  %v7558_v2 = vld [vmem:[#allocation11_spill] sm:$0xff]  ;;  %4349 = vpow2.f32 %v2242_v62  ;;  %v2250_v50 = vmul.f32 1.442695, %v7562_v61  ;;  %v7565_v61 = vld [vmem:[#allocation42_spill] sm:$0xff] }
 0x58d   : > { %v2396_v46 = vmul.f32 %v6135_v43, %v7558_v2 }
 0x58e   : > { %v2375_v39 = vadd.f32 %v6123_v9, %v2374_v29  ;;  %v6145_v29 = vpop.eup %4339 }
 0x58f   : > { %v4342_v21 = vpop.eup %4341 }
 0x590   : > { %v2376_v31 = vadd.f32 %v6128_v15, %v2375_v39  ;;  %v4344_v18 = vpop.eup %4343 }
 0x591   : > { %v4346_v26 = vpop.eup %4345 }
 0x592   : > { %v2377_v38 = vadd.f32 %v6132_v23, %v2376_v31  ;;  %v2524_v31 = vpack.c.bf16 %v2398_v30, %v2396_v46  ;;  %v4348_v30 = vpop.eup %4347 }
 0x593   : > { %v4350_v5 = vpop.eup %4349 }
 0x594   : > { %v2378_v47 = vadd.f32 %v6138_v42, %v2377_v38  ;;  %v2246_v38 = vmul.f32 1.442695, %v7561_v16  ;;  %2724 = vmatmul.bf16.vlgmr.msrb.gmra.mxu3 %v2524_v31  ;;  %v7564_v16 = vld [vmem:[#allocation4_spill] sm:$0xff] }
 0x595   : > { %v2400_v27 = vmul.f32 %v6135_v43, %v7564_v16  ;;  %v2406_v16 = vmul.f32 %v6135_v43, %v7566_v32 }
 0x596   : > { %v2379_v39 = vadd.f32 %v6145_v29, %v2378_v47  ;;  %4351 = vpow2.f32 %v2246_v38  ;;  %v7563_v47 = vsub.f32 %v5577_v49, %v5657_v24 }
 0x597   : > { %4353 = vpow2.f32 %v2250_v50 }
 0x598   : > { %v2380_v2 = vadd.f32 %v4342_v21, %v2379_v39  ;;  %v2254_v46 = vmul.f32 1.442695, %v7563_v47 }
 0x59a   : > { %v2381_v28 = vadd.f32 %v4344_v18, %v2380_v2  ;;  %4355 = vpow2.f32 %v2254_v46  ;;  %v2402_v2 = vmul.f32 %v6135_v43, %v7565_v61 }
 0x59c   : > { %v2382_v22 = vadd.f32 %v4346_v26, %v2381_v28  ;;  %v4352_v31 = vpop.eup %4351  ;;  %v2526_v24 = vpack.c.bf16 %v2402_v2, %v2400_v27 }
 0x59d   : > { %v4354_v38 = vpop.eup %4353 }
 0x59e   : > { %v2383_v13 = vadd.f32 %v4348_v30, %v2382_v22 }
 0x5a0   : > { %v2384_v39 = vadd.f32 %v4350_v5, %v2383_v13  ;;  %v4356_v19 = vpop.eup %4355 }
 0x5a2   : > { %v2385_v62 = vadd.f32 %v4352_v31, %v2384_v39  ;;  %v2404_v39 = vmul.f32 %v6135_v43, %v5535_v40  ;;  %v2410_v40 = vmul.f32 %v6135_v43, %v5558_v58 }
 0x5a4   : > { %v2386_v7 = vadd.f32 %v4354_v38, %v2385_v62  ;;  %2729 = vmatmul.bf16.gmra.mxu3 %v2526_v24  ;;  %v2528_v61 = vpack.c.bf16 %v2406_v16, %v2404_v39 }
 0x5a6   : > { %v2387_v49 = vadd.f32 %v4356_v19, %v2386_v7 }
 0x5a8   : > { %v2388_v28 = vrot.slane %v2387_v49, 4 }
 0x5aa   : > { %v2389_v50 = vadd.f32 %v2388_v28, %v2387_v49  ;;  %v2408_v49 = vmul.f32 %v6135_v43, %v5551_v36 }
 0x5ac   : > { %v2390_v47 = vrot.slane %v2389_v50, 2  ;;  %v2530_v32 = vpack.c.bf16 %v2410_v40, %v2408_v49 }
 0x5ae   : > { %v2391_v22 = vadd.f32 %v2390_v47, %v2389_v50 }
 0x5b0   : > { %v2392_v46 = vrot.slane %v2391_v22, 1 }
 0x5b2   : > { %v2393_v13 = vadd.f32 %v2392_v46, %v2391_v22 }
 0x5b4   : > { %4357 = vrcp.f32 %v2393_v13  ;;  %2734 = vmatmul.bf16.gmra.mxu3 %v2528_v61 }
 0x5ba   : > { %v6168_v62 = vpop.eup %4357 }
 0x5bb   : > { %v2397_v7 = vmul.f32 %v6168_v62, %v5777_v63  ;;  %v2399_v27 = vmul.f32 %v6168_v62, %v5780_v59  ;;  %v2401_v24 = vmul.f32 %v6168_v62, %v5793_v11  ;;  %v2403_v28 = vmul.f32 %v6168_v62, %v5801_v17 }
 0x5bc   : > { %v6184_v59 = vmul.f32 %v6168_v62, %v6118_v41  ;;  %v6188_v50 = vmul.f32 %v6168_v62, %v6123_v9  ;;  %v6192_v36 = vmul.f32 %v6168_v62, %v6128_v15  ;;  %v6196_v58 = vmul.f32 %v6168_v62, %v6132_v23 }
 0x5bd   : > { %v2525_v2 = vpack.c.bf16 %v2399_v27, %v2397_v7  ;;  %v2527_v63 = vpack.c.bf16 %v2403_v28, %v2401_v24  ;;  %v6200_v11 = vmul.f32 %v6168_v62, %v6138_v42  ;;  %v6206_v41 = vmul.f32 %v6168_v62, %v6145_v29  ;;  %v7568_v27 = vld [vmem:[#allocation52_spill] sm:$0xff] }
 0x5be   : > { %v2575_v17 = vpack.c.bf16 %v6188_v50, %v6184_v59  ;;  %v6209_v9 = vmul.f32 %v6168_v62, %v4342_v21  ;;  %v6212_v15 = vmul.f32 %v6168_v62, %v4344_v18  ;;  %v2577_v23 = vpack.c.bf16 %v6196_v58, %v6192_v36  ;;  %v2624_v59 = vld [vmem:[#allocation3 + $0x120] sm:$0xff]  ;;  %v2626_v36 = vld [vmem:[#allocation3 + $0x130] sm:$0xff] }
 0x5bf   : > { %2893 = vmatmul.bf16.vlgmr.msrb.gmra.mxu0 %v2525_v2  ;;  %v6217_v42 = vmul.f32 %v6168_v62, %v4346_v26  ;;  %v6220_v47 = vmul.f32 %v6168_v62, %v4348_v30  ;;  %v6223_v22 = vmul.f32 %v6168_v62, %v4350_v5  ;;  %v2579_v29 = vpack.c.bf16 %v6206_v41, %v6200_v11  ;;  %v7567_v30 = vld [vmem:[#allocation5_spill] sm:$0xff]  ;;  %v7569_v2 = vld [vmem:[#allocation7_spill] sm:$0xff]  ;;  %v2628_v11 = vld [vmem:[#allocation3 + $0x140] sm:$0xff] }
 0x5c0   : > { %v2581_v21 = vpack.c.bf16 %v6212_v15, %v6209_v9  ;;  %v6230_v18 = vmul.f32 %v6168_v62, %v4352_v31  ;;  %v6233_v46 = vmul.f32 %v6168_v62, %v4354_v38  ;;  %v2412_v26 = vmul.f32 %v6135_v43, %v5565_v51  ;;  %v2630_v9 = vld [vmem:[#allocation3 + $0x150] sm:$0xff] }
 0x5c1   : > { %v2414_v13 = vmul.f32 %v6135_v43, %v7567_v30  ;;  %v2583_v5 = vpack.c.bf16 %v6220_v47, %v6217_v42  ;;  %v6242_v39 = vmul.f32 %v6168_v62, %v4356_v19  ;;  %v2405_v51 = vmul.f32 %v6168_v62, %v5808_v6  ;;  %v2633_v42 = vld [vmem:[#allocation3 + $0x168] sm:$0xff] }
 0x5c2   : > { %v2585_v16 = vpack.c.bf16 %v6230_v18, %v6223_v22  ;;  %v2407_v61 = vmul.f32 %v6168_v62, %v5816_v60  ;;  %v2416_v19 = vmul.f32 %v6135_v43, %v7568_v27  ;;  %v2418_v49 = vmul.f32 %v6135_v43, %v7569_v2  ;;  %v7573_v27 = vld [vmem:[#allocation74_spill] sm:$0xff]  ;;  %v2635_v18 = vld [vmem:[#allocation3 + $0x178] sm:$0xff] }
 0x5c3   : > { %v2587_v31 = vpack.c.bf16 %v6242_v39, %v6233_v46  ;;  %v2532_v38 = vpack.c.bf16 %v2414_v13, %v2412_v26  ;;  %v2411_v24 = vmul.f32 %v6168_v62, %v5831_v53  ;;  %v2420_v60 = vmul.f32 %v6135_v43, %v5593_v54  ;;  %v7570_v13 = vld [vmem:[#allocation65_spill] sm:$0xff] }
 0x5c4   : > { %2739 = vmatmul.bf16.gmra.mxu3 %v2530_v32  ;;  %v2529_v7 = vpack.c.bf16 %v2407_v61, %v2405_v51  ;;  %v2534_v40 = vpack.c.bf16 %v2418_v49, %v2416_v19  ;;  %v2409_v32 = vmul.f32 %v6168_v62, %v5823_v4  ;;  %v2422_v28 = vmul.f32 %v6135_v43, %v5598_v37  ;;  %v7571_v51 = vld [vmem:[#allocation18_spill] sm:$0xff]  ;;  %v7574_v49 = vld [vmem:[#allocation19_spill] sm:$0xff] }
 0x5c5   : > { %v2413_v26 = vmul.f32 %v6168_v62, %v5838_v25  ;;  %v2415_v30 = vmul.f32 %v6168_v62, %v5846_v57  ;;  %v2424_v53 = vmul.f32 %v6135_v43, %v7570_v13  ;;  %v2417_v37 = vmul.f32 %v6168_v62, %v5853_v1 }
 0x5c6   : > { %v2531_v6 = vpack.c.bf16 %v2411_v24, %v2409_v32  ;;  %v2419_v61 = vmul.f32 %v6168_v62, %v7571_v51  ;;  %v2430_v19 = vmul.f32 %v6135_v43, %v7573_v27  ;;  %v7580_v51 = vld [vmem:[#allocation16_spill] sm:$0xff] }
 0x5c7   : > { %v2533_v4 = vpack.c.bf16 %v2415_v30, %v2413_v26 }
 0x5c8   : > { %v2535_v25 = vpack.c.bf16 %v2419_v61, %v2417_v37  ;;  %v2436_v61 = vmul.f32 %v6135_v43, %v7580_v51 }
 0x5cf   : > { %2898 = vmatmul.bf16.gmra.mxu0 %v2527_v63  ;;  %v2536_v63 = vpack.c.bf16 %v2422_v28, %v2420_v60  ;;  %v7577_v28 = vld [vmem:[#allocation14_spill] sm:$0xff] }
 0x5d4   : > { %2744 = vmatmul.bf16.gmra.mxu3 %v2532_v38  ;;  %v2426_v38 = vmul.f32 %v6135_v43, %v5608_v35  ;;  %v2421_v35 = vmul.f32 %v6168_v62, %v7574_v49  ;;  %v7583_v49 = vld [vmem:[#allocation24_spill] sm:$0xff] }
 0x5d6   : > { %v2538_v54 = vpack.c.bf16 %v2426_v38, %v2424_v53  ;;  %v7579_v53 = vld [vmem:[#allocation22_spill] sm:$0xff] }
 0x5d7   : > { %v2427_v38 = vmul.f32 %v6168_v62, %v7579_v53 }
 0x5df   : > { %2903 = vmatmul.bf16.gmra.mxu0 %v2529_v7  ;;  %v7572_v7 = vld [vmem:[#allocation70_spill] sm:$0xff] }
 0x5e0   : > { %v2428_v57 = vmul.f32 %v6135_v43, %v7572_v7 }
 0x5e2   : > { %v2540_v2 = vpack.c.bf16 %v2430_v19, %v2428_v57  ;;  %v7582_v19 = vld [vmem:[#allocation23_spill] sm:$0xff] }
 0x5e4   : > { %2749 = vmatmul.bf16.gmra.mxu3 %v2534_v40  ;;  %v7575_v40 = vld [vmem:[#allocation20_spill] sm:$0xff] }
 0x5e5   : > { %v2423_v32 = vmul.f32 %v6168_v62, %v7575_v40 }
 0x5e7   : > { %v2537_v24 = vpack.c.bf16 %v2423_v32, %v2421_v35  ;;  %v2431_v35 = vmul.f32 %v6168_v62, %v7583_v49  ;;  %v2588_v32 = vld [vmem:[#allocation3] sm:$0xff] }
 0x5ef   : > { %2908 = vmatmul.bf16.gmra.mxu0 %v2531_v6  ;;  %v7576_v6 = vld [vmem:[#allocation79_spill] sm:$0xff] }
 0x5f0   : > { %v2432_v60 = vmul.f32 %v6135_v43, %v7576_v6 }
 0x5f4   : > { %2754 = vmatmul.bf16.gmra.mxu3 %v2536_v63  ;;  %v2434_v63 = vmul.f32 %v6135_v43, %v7577_v28 }
 0x5f6   : > { %v2542_v30 = vpack.c.bf16 %v2434_v63, %v2432_v60  ;;  %v7584_v63 = vld [vmem:[#allocation27_spill] sm:$0xff] }
 0x5ff   : > { %2913 = vmatmul.bf16.gmra.mxu0 %v2533_v4  ;;  %v7578_v4 = vld [vmem:[#allocation21_spill] sm:$0xff] }
 0x600   : > { %v2425_v13 = vmul.f32 %v6168_v62, %v7578_v4  ;;  %v7585_v4 = vld [vmem:[#allocation29_spill] sm:$0xff] }
 0x602   : > { %v2539_v37 = vpack.c.bf16 %v2427_v38, %v2425_v13  ;;  %v2442_v13 = vmul.f32 %v6135_v43, %v7585_v4  ;;  %v2589_v38 = vld [vmem:[#allocation3 + $0x8] sm:$0xff] }
 0x604   : > { %2759 = vmatmul.bf16.gmra.mxu3 %v2538_v54 }
 0x60f   : > { %2918 = vmatmul.bf16.gmra.mxu0 %v2535_v25  ;;  %v7581_v25 = vld [vmem:[#allocation25_spill] sm:$0xff] }
 0x610   : > { %v2438_v7 = vmul.f32 %v6135_v43, %v7581_v25 }
 0x612   : > { %v2544_v27 = vpack.c.bf16 %v2438_v7, %v2436_v61  ;;  %v2435_v7 = vmul.f32 %v6168_v62, %v5921_v48 }
 0x614   : > { %2764 = vmatmul.bf16.gmra.mxu3 %v2540_v2  ;;  %v2429_v2 = vmul.f32 %v6168_v62, %v7582_v19  ;;  %v2590_v19 = vld [vmem:[#allocation3 + $0x10] sm:$0xff] }
 0x616   : > { %v2541_v60 = vpack.c.bf16 %v2431_v35, %v2429_v2 }
 0x617   : > { %v2725_v1 = vpop.f32.mrf.mxu3 }
 0x61f   : > { %2923 = vmatmul.bf16.gmra.mxu0 %v2537_v24  ;;  %v2727_v26 = vpop.f32.mrf.mxu3 }
 0x624   : > { %2769 = vmatmul.bf16.gmra.mxu3 %v2542_v30  ;;  %v2440_v30 = vmul.f32 %v6135_v43, %v7584_v63 }
 0x626   : > { %v2546_v61 = vpack.c.bf16 %v2442_v13, %v2440_v30  ;;  %v7588_v13 = vld [vmem:[#allocation28_spill] sm:$0xff] }
 0x627   : > { %v2730_v54 = vpop.f32.mrf.mxu3 }
 0x62f   : > { %2928 = vmatmul.bf16.gmra.mxu0 %v2539_v37  ;;  %v2732_v57 = vpop.f32.mrf.mxu3 }
 0x634   : > { %2774 = vmatmul.bf16.gmra.mxu3 %v2544_v27 }
 0x637   : > { %v2735_v40 = vpop.f32.mrf.mxu3 }
 0x63c   : > { %v2894_v24 = vpop.f32.mrf.mxu0 }
 0x63d   : > { %v2895_v6 = vadd.f32 %v2894_v24, %v2725_v1  ;;  %v2433_v1 = vmul.f32 %v6168_v62, %v5913_v34  ;;  %v2591_v34 = vld [vmem:[#allocation3 + $0x18] sm:$0xff] }
 0x63f   : > { %v3054_v28 = vadd.f32 %v2895_v6, %v2588_v32  ;;  %2933 = vmatmul.bf16.gmra.mxu0 %v2541_v60  ;;  %v2737_v53 = vpop.f32.mrf.mxu3  ;;  %v2543_v35 = vpack.c.bf16 %v2435_v7, %v2433_v1  ;;  %v7587_v6 = vld [vmem:[#allocation39_spill] sm:$0xff] }
 0x640   : > { %v2446_v60 = vmul.f32 %v6135_v43, %v7587_v6 }
 0x641   : > { %3118 = vst.msk [vmem:[#allocation3] sm:$0xff] %vm1251_vm6, %v3054_v28 }
 0x644   : > { %v2896_v37 = vpop.f32.mrf.mxu0  ;;  %2779 = vmatmul.bf16.gmra.mxu3 %v2546_v61 }
 0x645   : > { %v2897_v51 = vadd.f32 %v2896_v37, %v2727_v26  ;;  %v7586_v26 = vld [vmem:[#allocation88_spill] sm:$0xff] }
 0x646   : > { %v2444_v24 = vmul.f32 %v6135_v43, %v7586_v26 }
 0x647   : > { %v3055_v25 = vadd.f32 %v2897_v51, %v2589_v38  ;;  %v2740_v27 = vpop.f32.mrf.mxu3  ;;  %v2439_v38 = vmul.f32 %v6168_v62, %v7588_v13  ;;  %v2592_v51 = vld [vmem:[#allocation3 + $0x20] sm:$0xff] }
 0x648   : > { %v2548_v48 = vpack.c.bf16 %v2446_v60, %v2444_v24 }
 0x649   : > { %3119 = vst.msk [vmem:[#allocation3 + $0x8] sm:$0xff] %vm1251_vm6, %v3055_v25 }
 0x64c   : > { %v2899_v2 = vpop.f32.mrf.mxu0 }
 0x64d   : > { %v2900_v49 = vadd.f32 %v2899_v2, %v2730_v54  ;;  %v2437_v54 = vmul.f32 %v6168_v62, %v5928_v44  ;;  %v7590_v2 = vld [vmem:[#allocation89_spill] sm:$0xff] }
 0x64e   : > { %v2593_v44 = vld [vmem:[#allocation3 + $0x28] sm:$0xff] }
 0x64f   : > { %v3056_v32 = vadd.f32 %v2900_v49, %v2590_v19  ;;  %2938 = vmatmul.bf16.gmra.mxu0 %v2543_v35  ;;  %v2742_v28 = vpop.f32.mrf.mxu3  ;;  %v2545_v1 = vpack.c.bf16 %v2439_v38, %v2437_v54  ;;  %v2450_v49 = vmul.f32 %v6135_v43, %v7590_v2 }
 0x651   : > { %3120 = vst.msk [vmem:[#allocation3 + $0x10] sm:$0xff] %vm1251_vm6, %v3056_v32 }
 0x654   : > { %v2901_v63 = vpop.f32.mrf.mxu0  ;;  %2784 = vmatmul.bf16.gmra.mxu3 %v2548_v48  ;;  %v2594_v48 = vld [vmem:[#allocation3 + $0x30] sm:$0xff] }
 0x655   : > { %v2902_v30 = vadd.f32 %v2901_v63, %v2732_v57  ;;  %v7589_v57 = vld [vmem:[#allocation41_spill] sm:$0xff] }
 0x656   : > { %v2448_v19 = vmul.f32 %v6135_v43, %v7589_v57 }
 0x657   : > { %v3057_v4 = vadd.f32 %v2902_v30, %v2591_v34  ;;  %v2745_v37 = vpop.f32.mrf.mxu3  ;;  %v7592_v34 = vld [vmem:[#allocation31_spill] sm:$0xff] }
 0x658   : > { %v2550_v24 = vpack.c.bf16 %v2450_v49, %v2448_v19  ;;  %v2443_v63 = vmul.f32 %v6168_v62, %v7592_v34 }
 0x659   : > { %3121 = vst.msk [vmem:[#allocation3 + $0x18] sm:$0xff] %vm1251_vm6, %v3057_v4 }
 0x65c   : > { %v2904_v61 = vpop.f32.mrf.mxu0 }
 0x65d   : > { %v2905_v25 = vadd.f32 %v2904_v61, %v2735_v40  ;;  %v7591_v40 = vld [vmem:[#allocation30_spill] sm:$0xff]  ;;  %v7594_v61 = vld [vmem:[#allocation91_spill] sm:$0xff] }
 0x65e   : > { %v2441_v60 = vmul.f32 %v6168_v62, %v7591_v40 }
 0x65f   : > { %v3058_v7 = vadd.f32 %v2905_v25, %v2592_v51  ;;  %2943 = vmatmul.bf16.gmra.mxu0 %v2545_v1  ;;  %v2747_v35 = vpop.f32.mrf.mxu3  ;;  %v2454_v25 = vmul.f32 %v6135_v43, %v7594_v61 }
 0x660   : > { %v2547_v13 = vpack.c.bf16 %v2443_v63, %v2441_v60 }
 0x661   : > { %3122 = vst.msk [vmem:[#allocation3 + $0x20] sm:$0xff] %vm1251_vm6, %v3058_v7  ;;  %v2595_v7 = vld [vmem:[#allocation3 + $0x38] sm:$0xff] }
 0x664   : > { %v2906_v32 = vpop.f32.mrf.mxu0  ;;  %2789 = vmatmul.bf16.gmra.mxu3 %v2550_v24 }
 0x665   : > { %v2907_v26 = vadd.f32 %v2906_v32, %v2737_v53  ;;  %v7593_v53 = vld [vmem:[#allocation90_spill] sm:$0xff]  ;;  %v7596_v32 = vld [vmem:[#allocation33_spill] sm:$0xff] }
 0x666   : > { %v2452_v51 = vmul.f32 %v6135_v43, %v7593_v53 }
 0x667   : > { %v3059_v6 = vadd.f32 %v2907_v26, %v2593_v44  ;;  %v2750_v30 = vpop.f32.mrf.mxu3  ;;  %v2447_v26 = vmul.f32 %v6168_v62, %v7596_v32 }
 0x668   : > { %v2552_v2 = vpack.c.bf16 %v2454_v25, %v2452_v51 }
 0x669   : > { %3123 = vst.msk [vmem:[#allocation3 + $0x28] sm:$0xff] %vm1251_vm6, %v3059_v6  ;;  %v2596_v6 = vld [vmem:[#allocation3 + $0x40] sm:$0xff] }
 0x66c   : > { %v2909_v4 = vpop.f32.mrf.mxu0 }
 0x66d   : > { %v2910_v54 = vadd.f32 %v2909_v4, %v2740_v27  ;;  %v7595_v27 = vld [vmem:[#allocation32_spill] sm:$0xff]  ;;  %v7598_v4 = vld [vmem:[#allocation93_spill] sm:$0xff] }
 0x66e   : > { %v2445_v44 = vmul.f32 %v6168_v62, %v7595_v27 }
 0x66f   : > { %v3060_v38 = vadd.f32 %v2910_v54, %v2594_v48  ;;  %2948 = vmatmul.bf16.gmra.mxu0 %v2547_v13  ;;  %v2752_v1 = vpop.f32.mrf.mxu3  ;;  %v2458_v54 = vmul.f32 %v6135_v43, %v7598_v4 }
 0x670   : > { %v2549_v34 = vpack.c.bf16 %v2447_v26, %v2445_v44 }
 0x671   : > { %3124 = vst.msk [vmem:[#allocation3 + $0x30] sm:$0xff] %vm1251_vm6, %v3060_v38  ;;  %v2597_v38 = vld [vmem:[#allocation3 + $0x48] sm:$0xff] }
 0x674   : > { %v2911_v57 = vpop.f32.mrf.mxu0  ;;  %2794 = vmatmul.bf16.gmra.mxu3 %v2552_v2  ;;  %v2598_v2 = vld [vmem:[#allocation3 + $0x50] sm:$0xff] }
 0x675   : > { %v2912_v19 = vadd.f32 %v2911_v57, %v2742_v28  ;;  %v7597_v28 = vld [vmem:[#allocation92_spill] sm:$0xff] }
 0x676   : > { %v2456_v48 = vmul.f32 %v6135_v43, %v7597_v28 }
 0x677   : > { %v3061_v49 = vadd.f32 %v2912_v19, %v2595_v7  ;;  %v2755_v24 = vpop.f32.mrf.mxu3  ;;  %v7599_v7 = vld [vmem:[#allocation34_spill] sm:$0xff] }
 0x678   : > { %v2554_v61 = vpack.c.bf16 %v2458_v54, %v2456_v48  ;;  %v2451_v57 = vmul.f32 %v6168_v62, %v7599_v7  ;;  %v7603_v54 = vld [vmem:[#allocation36_spill] sm:$0xff] }
 0x679   : > { %3125 = vst.msk [vmem:[#allocation3 + $0x38] sm:$0xff] %vm1251_vm6, %v3061_v49 }
 0x67c   : > { %v2914_v40 = vpop.f32.mrf.mxu0 }
 0x67d   : > { %v2915_v60 = vadd.f32 %v2914_v40, %v2745_v37  ;;  %v2449_v37 = vmul.f32 %v6168_v62, %v5973_v0  ;;  %v2599_v0 = vld [vmem:[#allocation3 + $0x58] sm:$0xff] }
 0x67f   : > { %v3062_v63 = vadd.f32 %v2915_v60, %v2596_v6  ;;  %2953 = vmatmul.bf16.gmra.mxu0 %v2549_v34  ;;  %v2757_v13 = vpop.f32.mrf.mxu3  ;;  %v2551_v44 = vpack.c.bf16 %v2451_v57, %v2449_v37  ;;  %v7601_v6 = vld [vmem:[#allocation49_spill] sm:$0xff] }
 0x680   : > { %v2462_v40 = vmul.f32 %v6135_v43, %v7601_v6 }
 0x681   : > { %3126 = vst.msk [vmem:[#allocation3 + $0x40] sm:$0xff] %vm1251_vm6, %v3062_v63 }
 0x684   : > { %v2916_v53 = vpop.f32.mrf.mxu0  ;;  %2799 = vmatmul.bf16.gmra.mxu3 %v2554_v61 }
 0x685   : > { %v2917_v51 = vadd.f32 %v2916_v53, %v2747_v35  ;;  %v7600_v35 = vld [vmem:[#allocation94_spill] sm:$0xff] }
 0x686   : > { %v2460_v26 = vmul.f32 %v6135_v43, %v7600_v35 }
 0x687   : > { %v3063_v25 = vadd.f32 %v2917_v51, %v2597_v38  ;;  %v2760_v19 = vpop.f32.mrf.mxu3  ;;  %v2455_v38 = vmul.f32 %v6168_v62, %v7603_v54  ;;  %v2600_v51 = vld [vmem:[#allocation3 + $0x60] sm:$0xff]  ;;  %v7607_v54 = vld [vmem:[#allocation57_spill] sm:$0xff] }
 0x688   : > { %v2556_v28 = vpack.c.bf16 %v2462_v40, %v2460_v26  ;;  %v2459_v40 = vmul.f32 %v6168_v62, %v6014_v45 }
 0x689   : > { %3127 = vst.msk [vmem:[#allocation3 + $0x48] sm:$0xff] %vm1251_vm6, %v3063_v25 }
 0x68c   : > { %v2919_v49 = vpop.f32.mrf.mxu0 }
 0x68d   : > { %v2920_v27 = vadd.f32 %v2919_v49, %v2750_v30  ;;  %v7602_v30 = vld [vmem:[#allocation81_spill] sm:$0xff] }
 0x68e   : > { %v2453_v4 = vmul.f32 %v6168_v62, %v7602_v30 }
 0x68f   : > { %v3064_v32 = vadd.f32 %v2920_v27, %v2598_v2  ;;  %2958 = vmatmul.bf16.gmra.mxu0 %v2551_v44  ;;  %v2762_v60 = vpop.f32.mrf.mxu3  ;;  %v7605_v2 = vld [vmem:[#allocation53_spill] sm:$0xff] }
 0x690   : > { %v2553_v37 = vpack.c.bf16 %v2455_v38, %v2453_v4  ;;  %v2466_v49 = vmul.f32 %v6135_v43, %v7605_v2  ;;  %v2601_v44 = vld [vmem:[#allocation3 + $0x68] sm:$0xff]  ;;  %v2470_v38 = vmul.f32 %v6135_v43, %v7607_v54  ;;  %v2604_v2 = vld [vmem:[#allocation3 + $0x80] sm:$0xff]  ;;  %v2606_v54 = vld [vmem:[#allocation3 + $0x90] sm:$0xff] }
 0x691   : > { %3128 = vst.msk [vmem:[#allocation3 + $0x50] sm:$0xff] %vm1251_vm6, %v3064_v32 }
 0x694   : > { %v2921_v34 = vpop.f32.mrf.mxu0  ;;  %2804 = vmatmul.bf16.gmra.mxu3 %v2556_v28 }
 0x695   : > { %v2922_v63 = vadd.f32 %v2921_v34, %v2752_v1  ;;  %v7604_v1 = vld [vmem:[#allocation51_spill] sm:$0xff]  ;;  %v2602_v34 = vld [vmem:[#allocation3 + $0x70] sm:$0xff] }
 0x696   : > { %v2464_v57 = vmul.f32 %v6135_v43, %v7604_v1 }
 0x697   : > { %v3065_v48 = vadd.f32 %v2922_v63, %v2599_v0  ;;  %v2765_v53 = vpop.f32.mrf.mxu3 }
 0x698   : > { %v2558_v26 = vpack.c.bf16 %v2466_v49, %v2464_v57 }
 0x699   : > { %3129 = vst.msk [vmem:[#allocation3 + $0x58] sm:$0xff] %vm1251_vm6, %v3065_v48 }
 0x69c   : > { %v2924_v61 = vpop.f32.mrf.mxu0 }
 0x69d   : > { %v2925_v25 = vadd.f32 %v2924_v61, %v2755_v24  ;;  %v2457_v24 = vmul.f32 %v6168_v62, %v6005_v33  ;;  %v2603_v33 = vld [vmem:[#allocation3 + $0x78] sm:$0xff] }
 0x69f   : > { %v3066_v7 = vadd.f32 %v2925_v25, %v2600_v51  ;;  %2963 = vmatmul.bf16.gmra.mxu0 %v2553_v37  ;;  %v2767_v27 = vpop.f32.mrf.mxu3  ;;  %v2555_v48 = vpack.c.bf16 %v2459_v40, %v2457_v24 }
 0x6a1   : > { %3130 = vst.msk [vmem:[#allocation3 + $0x60] sm:$0xff] %vm1251_vm6, %v3066_v7  ;;  %v7608_v7 = vld [vmem:[#allocation38_spill] sm:$0xff] }
 0x6a2   : > { %v2463_v1 = vmul.f32 %v6168_v62, %v7608_v7 }
 0x6a4   : > { %v2926_v32 = vpop.f32.mrf.mxu0  ;;  %2809 = vmatmul.bf16.gmra.mxu3 %v2558_v26 }
 0x6a5   : > { %v2927_v35 = vadd.f32 %v2926_v32, %v2757_v13  ;;  %v7606_v13 = vld [vmem:[#allocation55_spill] sm:$0xff] }
 0x6a6   : > { %v2468_v4 = vmul.f32 %v6135_v43, %v7606_v13 }
 0x6a7   : > { %v3067_v6 = vadd.f32 %v2927_v35, %v2601_v44  ;;  %v2770_v0 = vpop.f32.mrf.mxu3 }
 0x6a8   : > { %v2560_v45 = vpack.c.bf16 %v2470_v38, %v2468_v4 }
 0x6a9   : > { %3131 = vst.msk [vmem:[#allocation3 + $0x68] sm:$0xff] %vm1251_vm6, %v3067_v6  ;;  %v7610_v6 = vld [vmem:[#allocation60_spill] sm:$0xff] }
 0x6aa   : > { %v2474_v24 = vmul.f32 %v6135_v43, %v7610_v6  ;;  %v2608_v6 = vld [vmem:[#allocation3 + $0xa0] sm:$0xff] }
 0x6ac   : > { %v2929_v63 = vpop.f32.mrf.mxu0 }
 0x6ad   : > { %v2930_v28 = vadd.f32 %v2929_v63, %v2760_v19  ;;  %v2461_v19 = vmul.f32 %v6168_v62, %v6021_v52  ;;  %v2605_v52 = vld [vmem:[#allocation3 + $0x88] sm:$0xff] }
 0x6af   : > { %v3068_v30 = vadd.f32 %v2930_v28, %v2602_v34  ;;  %2968 = vmatmul.bf16.gmra.mxu0 %v2555_v48  ;;  %v2772_v51 = vpop.f32.mrf.mxu3  ;;  %v2557_v32 = vpack.c.bf16 %v2463_v1, %v2461_v19 }
 0x6b1   : > { %3132 = vst.msk [vmem:[#allocation3 + $0x70] sm:$0xff] %vm1251_vm6, %v3068_v30  ;;  %v7611_v30 = vld [vmem:[#allocation43_spill] sm:$0xff] }
 0x6b2   : > { %v2467_v13 = vmul.f32 %v6168_v62, %v7611_v30 }
 0x6b4   : > { %v2931_v61 = vpop.f32.mrf.mxu0  ;;  %2814 = vmatmul.bf16.gmra.mxu3 %v2560_v45 }
 0x6b5   : > { %v2932_v25 = vadd.f32 %v2931_v61, %v2762_v60  ;;  %v7609_v60 = vld [vmem:[#allocation58_spill] sm:$0xff] }
 0x6b6   : > { %v2472_v26 = vmul.f32 %v6135_v43, %v7609_v60 }
 0x6b7   : > { %v3069_v37 = vadd.f32 %v2932_v25, %v2603_v33  ;;  %v2775_v57 = vpop.f32.mrf.mxu3 }
 0x6b8   : > { %v2562_v28 = vpack.c.bf16 %v2474_v24, %v2472_v26 }
 0x6b9   : > { %3133 = vst.msk [vmem:[#allocation3 + $0x78] sm:$0xff] %vm1251_vm6, %v3069_v37  ;;  %v7613_v37 = vld [vmem:[#allocation8_spill] sm:$0xff] }
 0x6ba   : > { %v2478_v19 = vmul.f32 %v6135_v43, %v7613_v37 }
 0x6bc   : > { %v2934_v49 = vpop.f32.mrf.mxu0 }
 0x6bd   : > { %v2935_v44 = vadd.f32 %v2934_v49, %v2765_v53  ;;  %v2465_v53 = vmul.f32 %v6168_v62, %v6034_v56  ;;  %v2607_v56 = vld [vmem:[#allocation3 + $0x98] sm:$0xff] }
 0x6bf   : > { %v3070_v35 = vadd.f32 %v2935_v44, %v2604_v2  ;;  %2973 = vmatmul.bf16.gmra.mxu0 %v2557_v32  ;;  %v2777_v40 = vpop.f32.mrf.mxu3  ;;  %v2559_v61 = vpack.c.bf16 %v2467_v13, %v2465_v53  ;;  %v2609_v13 = vld [vmem:[#allocation3 + $0xa8] sm:$0xff] }
 0x6c1   : > { %3134 = vst.msk [vmem:[#allocation3 + $0x80] sm:$0xff] %vm1251_vm6, %v3070_v35  ;;  %v7615_v35 = vld [vmem:[#allocation84_spill] sm:$0xff] }
 0x6c2   : > { %v2471_v60 = vmul.f32 %v6168_v62, %v7615_v35 }
 0x6c4   : > { %v2936_v34 = vpop.f32.mrf.mxu0  ;;  %2819 = vmatmul.bf16.gmra.mxu3 %v2562_v28 }
 0x6c5   : > { %v2937_v63 = vadd.f32 %v2936_v34, %v2767_v27  ;;  %v7612_v27 = vld [vmem:[#allocation6_spill] sm:$0xff] }
 0x6c6   : > { %v2476_v45 = vmul.f32 %v6135_v43, %v7612_v27 }
 0x6c7   : > { %v3071_v48 = vadd.f32 %v2937_v63, %v2605_v52  ;;  %v2780_v4 = vpop.f32.mrf.mxu3 }
 0x6c8   : > { %v2564_v49 = vpack.c.bf16 %v2478_v19, %v2476_v45  ;;  %v2610_v45 = vld [vmem:[#allocation3 + $0xb0] sm:$0xff] }
 0x6c9   : > { %3135 = vst.msk [vmem:[#allocation3 + $0x88] sm:$0xff] %vm1251_vm6, %v3071_v48  ;;  %v7617_v48 = vld [vmem:[#allocation9_spill] sm:$0xff] }
 0x6ca   : > { %v2482_v53 = vmul.f32 %v6135_v43, %v7617_v48 }
 0x6cc   : > { %v2939_v38 = vpop.f32.mrf.mxu0 }
 0x6cd   : > { %v2940_v33 = vadd.f32 %v2939_v38, %v2770_v0  ;;  %v7614_v0 = vld [vmem:[#allocation45_spill] sm:$0xff] }
 0x6ce   : > { %v2469_v32 = vmul.f32 %v6168_v62, %v7614_v0 }
 0x6cf   : > { %v3072_v25 = vadd.f32 %v2940_v33, %v2606_v54  ;;  %2978 = vmatmul.bf16.gmra.mxu0 %v2559_v61  ;;  %v2782_v7 = vpop.f32.mrf.mxu3 }
 0x6d0   : > { %v2561_v34 = vpack.c.bf16 %v2471_v60, %v2469_v32 }
 0x6d1   : > { %3136 = vst.msk [vmem:[#allocation3 + $0x90] sm:$0xff] %vm1251_vm6, %v3072_v25  ;;  %v2475_v25 = vmul.f32 %v6168_v62, %v6063_v55 }
 0x6d4   : > { %v2941_v1 = vpop.f32.mrf.mxu0  ;;  %2824 = vmatmul.bf16.gmra.mxu3 %v2564_v49  ;;  %v7619_v49 = vld [vmem:[#allocation64_spill] sm:$0xff] }
 0x6d5   : > { %v2942_v2 = vadd.f32 %v2941_v1, %v2772_v51  ;;  %v7616_v51 = vld [vmem:[#allocation62_spill] sm:$0xff] }
 0x6d6   : > { %v2480_v28 = vmul.f32 %v6135_v43, %v7616_v51 }
 0x6d7   : > { %v3073_v44 = vadd.f32 %v2942_v2, %v2607_v56  ;;  %v2785_v26 = vpop.f32.mrf.mxu3 }
 0x6d8   : > { %v2566_v33 = vpack.c.bf16 %v2482_v53, %v2480_v28  ;;  %v7621_v53 = vld [vmem:[#allocation13_spill] sm:$0xff] }
 0x6d9   : > { %3137 = vst.msk [vmem:[#allocation3 + $0x98] sm:$0xff] %vm1251_vm6, %v3073_v44  ;;  %v2486_v44 = vmul.f32 %v6135_v43, %v7619_v49 }
 0x6dc   : > { %v2944_v24 = vpop.f32.mrf.mxu0 }
 0x6dd   : > { %v2945_v52 = vadd.f32 %v2944_v24, %v2775_v57  ;;  %v2473_v57 = vmul.f32 %v6168_v62, %v6058_v3  ;;  %v2611_v3 = vld [vmem:[#allocation3 + $0xb8] sm:$0xff] }
 0x6df   : > { %v3074_v63 = vadd.f32 %v2945_v52, %v2608_v6  ;;  %2983 = vmatmul.bf16.gmra.mxu0 %v2561_v34  ;;  %v2787_v30 = vpop.f32.mrf.mxu3  ;;  %v2563_v56 = vpack.c.bf16 %v2475_v25, %v2473_v57  ;;  %v2479_v6 = vmul.f32 %v6168_v62, %v6073_v12  ;;  %v2612_v52 = vld [vmem:[#allocation3 + $0xc0] sm:$0xff]  ;;  %v2483_v57 = vmul.f32 %v6168_v62, %v6083_v14 }
 0x6e1   : > { %3138 = vst.msk [vmem:[#allocation3 + $0xa0] sm:$0xff] %vm1251_vm6, %v3074_v63 }
 0x6e4   : > { %v2946_v54 = vpop.f32.mrf.mxu0  ;;  %2829 = vmatmul.bf16.gmra.mxu3 %v2566_v33 }
 0x6e5   : > { %v2947_v38 = vadd.f32 %v2946_v54, %v2777_v40  ;;  %v7618_v40 = vld [vmem:[#allocation10_spill] sm:$0xff] }
 0x6e6   : > { %v2484_v2 = vmul.f32 %v6135_v43, %v7618_v40 }
 0x6e7   : > { %v3075_v61 = vadd.f32 %v2947_v38, %v2609_v13  ;;  %v2790_v27 = vpop.f32.mrf.mxu3  ;;  %v2490_v13 = vmul.f32 %v6135_v43, %v7621_v53 }
 0x6e8   : > { %v2568_v55 = vpack.c.bf16 %v2486_v44, %v2484_v2  ;;  %v7623_v2 = vld [vmem:[#allocation67_spill] sm:$0xff] }
 0x6e9   : > { %3139 = vst.msk [vmem:[#allocation3 + $0xa8] sm:$0xff] %vm1251_vm6, %v3075_v61  ;;  %v2494_v49 = vmul.f32 %v6135_v43, %v7623_v2 }
 0x6ec   : > { %v2949_v37 = vpop.f32.mrf.mxu0 }
 0x6ed   : > { %v2950_v19 = vadd.f32 %v2949_v37, %v2780_v4  ;;  %v2477_v4 = vmul.f32 %v6168_v62, %v6068_v10  ;;  %v2613_v10 = vld [vmem:[#allocation3 + $0xc8] sm:$0xff] }
 0x6ef   : > { %v3076_v1 = vadd.f32 %v2950_v19, %v2610_v45  ;;  %2988 = vmatmul.bf16.gmra.mxu0 %v2563_v56  ;;  %v2792_v0 = vpop.f32.mrf.mxu3  ;;  %v2565_v51 = vpack.c.bf16 %v2479_v6, %v2477_v4  ;;  %v2614_v45 = vld [vmem:[#allocation3 + $0xd0] sm:$0xff]  ;;  %v2616_v6 = vld [vmem:[#allocation3 + $0xe0] sm:$0xff] }
 0x6f1   : > { %3140 = vst.msk [vmem:[#allocation3 + $0xb0] sm:$0xff] %vm1251_vm6, %v3076_v1 }
 0x6f4   : > { %v2951_v32 = vpop.f32.mrf.mxu0  ;;  %2834 = vmatmul.bf16.gmra.mxu3 %v2568_v55  ;;  %v7624_v55 = vld [vmem:[#allocation46_spill] sm:$0xff] }
 0x6f5   : > { %v2952_v35 = vadd.f32 %v2951_v32, %v2782_v7  ;;  %v7620_v7 = vld [vmem:[#allocation66_spill] sm:$0xff] }
 0x6f6   : > { %v2488_v48 = vmul.f32 %v6135_v43, %v7620_v7  ;;  %v7626_v7 = vld [vmem:[#allocation69_spill] sm:$0xff] }
 0x6f7   : > { %v3077_v60 = vadd.f32 %v2952_v35, %v2611_v3  ;;  %v2795_v24 = vpop.f32.mrf.mxu3 }
 0x6f8   : > { %v2570_v12 = vpack.c.bf16 %v2490_v13, %v2488_v48  ;;  %v2498_v48 = vmul.f32 %v6135_v43, %v7626_v7  ;;  %v7634_v7 = vld [vmem:[#allocation26_spill] sm:$0xff] }
 0x6f9   : > { %3141 = vst.msk [vmem:[#allocation3 + $0xb8] sm:$0xff] %vm1251_vm6, %v3077_v60  ;;  %v2487_v60 = vmul.f32 %v6168_v62, %v7624_v55  ;;  %v7632_v55 = vld [vmem:[#allocation50_spill] sm:$0xff] }
 0x6fc   : > { %v2954_v34 = vpop.f32.mrf.mxu0 }
 0x6fd   : > { %v2955_v63 = vadd.f32 %v2954_v34, %v2785_v26  ;;  %v2481_v26 = vmul.f32 %v6168_v62, %v6078_v8  ;;  %v2615_v8 = vld [vmem:[#allocation3 + $0xd8] sm:$0xff] }
 0x6ff   : > { %v3078_v28 = vadd.f32 %v2955_v63, %v2612_v52  ;;  %2993 = vmatmul.bf16.gmra.mxu0 %v2565_v51  ;;  %v2797_v54 = vpop.f32.mrf.mxu3  ;;  %v2567_v56 = vpack.c.bf16 %v2483_v57, %v2481_v26 }
 0x701   : > { %3142 = vst.msk [vmem:[#allocation3 + $0xc0] sm:$0xff] %vm1251_vm6, %v3078_v28 }
 0x704   : > { %v2956_v38 = vpop.f32.mrf.mxu0  ;;  %2839 = vmatmul.bf16.gmra.mxu3 %v2570_v12 }
 0x705   : > { %v2957_v33 = vadd.f32 %v2956_v38, %v2787_v30  ;;  %v7622_v30 = vld [vmem:[#allocation15_spill] sm:$0xff] }
 0x706   : > { %v2492_v40 = vmul.f32 %v6135_v43, %v7622_v30 }
 0x707   : > { %v3079_v61 = vadd.f32 %v2957_v33, %v2613_v10  ;;  %v2800_v25 = vpop.f32.mrf.mxu3 }
 0x708   : > { %v2572_v14 = vpack.c.bf16 %v2494_v49, %v2492_v40  ;;  %v7630_v40 = vld [vmem:[#allocation73_spill] sm:$0xff] }
 0x709   : > { %3143 = vst.msk [vmem:[#allocation3 + $0xc8] sm:$0xff] %vm1251_vm6, %v3079_v61  ;;  %v7628_v61 = vld [vmem:[#allocation85_spill] sm:$0xff]  ;;  %v2502_v2 = vmul.f32 %v6135_v43, %v7630_v40 }
 0x70a   : > { %v2491_v26 = vmul.f32 %v6168_v62, %v7628_v61 }
 0x70c   : > { %v2959_v37 = vpop.f32.mrf.mxu0 }
 0x70d   : > { %v2960_v19 = vadd.f32 %v2959_v37, %v2790_v27  ;;  %v2485_v27 = vmul.f32 %v6168_v62, %v6088_v20  ;;  %v2617_v20 = vld [vmem:[#allocation3 + $0xe8] sm:$0xff] }
 0x70f   : > { %v3080_v1 = vadd.f32 %v2960_v19, %v2614_v45  ;;  %2998 = vmatmul.bf16.gmra.mxu0 %v2567_v56  ;;  %v2802_v44 = vpop.f32.mrf.mxu3  ;;  %v2569_v63 = vpack.c.bf16 %v2487_v60, %v2485_v27  ;;  %v2618_v45 = vld [vmem:[#allocation3 + $0xf0] sm:$0xff]  ;;  %v2495_v60 = vmul.f32 %v6168_v62, %v7632_v55 }
 0x711   : > { %3144 = vst.msk [vmem:[#allocation3 + $0xd0] sm:$0xff] %vm1251_vm6, %v3080_v1 }
 0x714   : > { %v2961_v3 = vpop.f32.mrf.mxu0  ;;  %2844 = vmatmul.bf16.gmra.mxu3 %v2572_v14 }
 0x715   : > { %v2962_v32 = vadd.f32 %v2961_v3, %v2792_v0  ;;  %v7625_v0 = vld [vmem:[#allocation17_spill] sm:$0xff] }
 0x716   : > { %v2496_v28 = vmul.f32 %v6135_v43, %v7625_v0 }
 0x717   : > { %v3081_v35 = vadd.f32 %v2962_v32, %v2615_v8  ;;  %v2805_v4 = vpop.f32.mrf.mxu3  ;;  %v2619_v8 = vld [vmem:[#allocation3 + $0xf8] sm:$0xff] }
 0x718   : > { %v2574_v38 = vpack.c.bf16 %v2498_v48, %v2496_v28  ;;  %v2506_v48 = vmul.f32 %v6135_v43, %v7634_v7  ;;  %v2627_v7 = vld [vmem:[#allocation3 + $0x138] sm:$0xff] }
 0x719   : > { %3145 = vst.msk [vmem:[#allocation3 + $0xd8] sm:$0xff] %vm1251_vm6, %v3081_v35 }
 0x71c   : > { %v2964_v52 = vpop.f32.mrf.mxu0 }
 0x71d   : > { %v2965_v34 = vadd.f32 %v2964_v52, %v2795_v24  ;;  %v7627_v24 = vld [vmem:[#allocation47_spill] sm:$0xff]  ;;  %v2620_v52 = vld [vmem:[#allocation3 + $0x100] sm:$0xff] }
 0x71e   : > { %v2489_v12 = vmul.f32 %v6168_v62, %v7627_v24  ;;  %v2622_v24 = vld [vmem:[#allocation3 + $0x110] sm:$0xff] }
 0x71f   : > { %v3082_v51 = vadd.f32 %v2965_v34, %v2616_v6  ;;  %3003 = vmatmul.bf16.gmra.mxu0 %v2569_v63  ;;  %v2807_v53 = vpop.f32.mrf.mxu3 }
 0x720   : > { %v2571_v56 = vpack.c.bf16 %v2491_v26, %v2489_v12 }
 0x721   : > { %3146 = vst.msk [vmem:[#allocation3 + $0xe0] sm:$0xff] %vm1251_vm6, %v3082_v51 }
 0x724   : > { %v2966_v13 = vpop.f32.mrf.mxu0  ;;  %2849 = vmatmul.bf16.gmra.mxu3 %v2574_v38 }
 0x725   : > { %v2967_v10 = vadd.f32 %v2966_v13, %v2797_v54  ;;  %v7629_v54 = vld [vmem:[#allocation71_spill] sm:$0xff]  ;;  %v2621_v13 = vld [vmem:[#allocation3 + $0x108] sm:$0xff] }
 0x726   : > { %v2500_v30 = vmul.f32 %v6135_v43, %v7629_v54 }
 0x727   : > { %v3083_v33 = vadd.f32 %v2967_v10, %v2617_v20  ;;  %v2810_v57 = vpop.f32.mrf.mxu3 }
 0x728   : > { %v2576_v14 = vpack.c.bf16 %v2502_v2, %v2500_v30 }
 0x729   : > { %3147 = vst.msk [vmem:[#allocation3 + $0xe8] sm:$0xff] %vm1251_vm6, %v3083_v33 }
 0x72c   : > { %v2969_v37 = vpop.f32.mrf.mxu0 }
 0x72d   : > { %v2970_v19 = vadd.f32 %v2969_v37, %v2800_v25  ;;  %v7631_v25 = vld [vmem:[#allocation48_spill] sm:$0xff] }
 0x72e   : > { %v2493_v27 = vmul.f32 %v6168_v62, %v7631_v25  ;;  %v2625_v25 = vld [vmem:[#allocation3 + $0x128] sm:$0xff] }
 0x72f   : > { %v3084_v1 = vadd.f32 %v2970_v19, %v2618_v45  ;;  %3008 = vmatmul.bf16.gmra.mxu0 %v2571_v56  ;;  %v2812_v49 = vpop.f32.mrf.mxu3  ;;  %v7635_v45 = vld [vmem:[#allocation76_spill] sm:$0xff] }
 0x730   : > { %v2573_v51 = vpack.c.bf16 %v2495_v60, %v2493_v27  ;;  %v2508_v37 = vmul.f32 %v6135_v43, %v7635_v45 }
 0x731   : > { %3148 = vst.msk [vmem:[#allocation3 + $0xf0] sm:$0xff] %vm1251_vm6, %v3084_v1  ;;  %v2623_v1 = vld [vmem:[#allocation3 + $0x118] sm:$0xff] }
 0x734   : > { %v2971_v3 = vpop.f32.mrf.mxu0  ;;  %2854 = vmatmul.bf16.gmra.mxu3 %v2576_v14 }
 0x735   : > { %v2972_v32 = vadd.f32 %v2971_v3, %v2802_v44  ;;  %v7633_v44 = vld [vmem:[#allocation75_spill] sm:$0xff]  ;;  %v7637_v3 = vld [vmem:[#allocation80_spill] sm:$0xff] }
 0x736   : > { %v2504_v28 = vmul.f32 %v6135_v43, %v7633_v44 }
 0x737   : > { %v3085_v35 = vadd.f32 %v2972_v32, %v2619_v8  ;;  %v2815_v6 = vpop.f32.mrf.mxu3  ;;  %v2512_v32 = vmul.f32 %v6135_v43, %v7637_v3 }
 0x738   : > { %v2578_v62 = vpack.c.bf16 %v2506_v48, %v2504_v28 }
 0x739   : > { %3149 = vst.msk [vmem:[#allocation3 + $0xf8] sm:$0xff] %vm1251_vm6, %v3085_v35 }
 0x73c   : > { %v2974_v34 = vpop.f32.mrf.mxu0 }
 0x73d   : > { %v2975_v63 = vadd.f32 %v2974_v34, %v2805_v4 }
 0x73f   : > { %v3086_v0 = vadd.f32 %v2975_v63, %v2620_v52  ;;  %3013 = vmatmul.bf16.gmra.mxu0 %v2573_v51  ;;  %v2817_v20 = vpop.f32.mrf.mxu3  ;;  %v7639_v63 = vld [vmem:[#allocation37_spill] sm:$0xff] }
 0x740   : > { %v2516_v51 = vmul.f32 %v6135_v43, %v7639_v63  ;;  %v2638_v63 = vld [vmem:[#allocation3 + $0x190] sm:$0xff] }
 0x741   : > { %3150 = vst.msk [vmem:[#allocation3 + $0x100] sm:$0xff] %vm1251_vm6, %v3086_v0  ;;  %v7640_v0 = vld [vmem:[#allocation82_spill] sm:$0xff] }
 0x742   : > { %v2518_v44 = vmul.f32 %v6135_v43, %v7640_v0 }
 0x744   : > { %v2976_v10 = vpop.f32.mrf.mxu0  ;;  %2859 = vmatmul.bf16.gmra.mxu3 %v2578_v62 }
 0x745   : > { %v2977_v38 = vadd.f32 %v2976_v10, %v2807_v53  ;;  %v7636_v53 = vld [vmem:[#allocation78_spill] sm:$0xff] }
 0x746   : > { %v2510_v19 = vmul.f32 %v6135_v43, %v7636_v53 }
 0x747   : > { %v3087_v33 = vadd.f32 %v2977_v38, %v2621_v13  ;;  %v2820_v4 = vpop.f32.mrf.mxu3  ;;  %v2584_v13 = vpack.c.bf16 %v2518_v44, %v2516_v51 }
 0x748   : > { %v2580_v40 = vpack.c.bf16 %v2510_v19, %v2508_v37 }
 0x749   : > { %3151 = vst.msk [vmem:[#allocation3 + $0x108] sm:$0xff] %vm1251_vm6, %v3087_v33  ;;  %v7641_v33 = vld [vmem:[#allocation40_spill] sm:$0xff] }
 0x74c   : > { %v2979_v12 = vpop.f32.mrf.mxu0 }
 0x74d   : > { %v2980_v61 = vadd.f32 %v2979_v12, %v2810_v57 }
 0x74f   : > { %v3088_v26 = vadd.f32 %v2980_v61, %v2622_v24  ;;  %3018 = vmatmul.bf16.gmra.mxu0 %v2575_v17  ;;  %v2822_v56 = vpop.f32.mrf.mxu3  ;;  %v7642_v24 = vld [vmem:[#allocation83_spill] sm:$0xff] }
 0x750   : > { %v2522_v12 = vmul.f32 %v6135_v43, %v7642_v24 }
 0x751   : > { %3152 = vst.msk [vmem:[#allocation3 + $0x110] sm:$0xff] %vm1251_vm6, %v3088_v26  ;;  %v2629_v26 = vld [vmem:[#allocation3 + $0x148] sm:$0xff] }
 0x754   : > { %v2981_v54 = vpop.f32.mrf.mxu0  ;;  %2864 = vmatmul.bf16.gmra.mxu3 %v2580_v40 }
 0x755   : > { %v2982_v30 = vadd.f32 %v2981_v54, %v2812_v49  ;;  %v7638_v49 = vld [vmem:[#allocation35_spill] sm:$0xff] }
 0x756   : > { %v2514_v14 = vmul.f32 %v6135_v43, %v7638_v49  ;;  %v2634_v49 = vld [vmem:[#allocation3 + $0x170] sm:$0xff] }
 0x757   : > { %v3089_v2 = vadd.f32 %v2982_v30, %v2623_v1  ;;  %v2825_v57 = vpop.f32.mrf.mxu3 }
 0x758   : > { %v2582_v60 = vpack.c.bf16 %v2514_v14, %v2512_v32 }
 0x759   : > { %3153 = vst.msk [vmem:[#allocation3 + $0x118] sm:$0xff] %vm1251_vm6, %v3089_v2 }
 0x75c   : > { %v2984_v50 = vpop.f32.mrf.mxu0 }
 0x75d   : > { %v2985_v17 = vadd.f32 %v2984_v50, %v2815_v6 }
 0x75f   : > { %v3090_v8 = vadd.f32 %v2985_v17, %v2624_v59  ;;  %3023 = vmatmul.bf16.gmra.mxu0 %v2577_v23  ;;  %v2827_v35 = vpop.f32.mrf.mxu3 }
 0x761   : > { %3154 = vst.msk [vmem:[#allocation3 + $0x120] sm:$0xff] %vm1251_vm6, %v3090_v8 }
 0x764   : > { %v2986_v27 = vpop.f32.mrf.mxu0  ;;  %2869 = vmatmul.bf16.gmra.mxu3 %v2582_v60 }
 0x765   : > { %v2987_v55 = vadd.f32 %v2986_v27, %v2817_v20 }
 0x767   : > { %v3091_v52 = vadd.f32 %v2987_v55, %v2625_v25  ;;  %v2830_v6 = vpop.f32.mrf.mxu3 }
 0x769   : > { %3155 = vst.msk [vmem:[#allocation3 + $0x128] sm:$0xff] %vm1251_vm6, %v3091_v52  ;;  %v2636_v52 = vld [vmem:[#allocation3 + $0x180] sm:$0xff] }
 0x76c   : > { %v2989_v58 = vpop.f32.mrf.mxu0 }
 0x76d   : > { %v2990_v23 = vadd.f32 %v2989_v58, %v2820_v4  ;;  %v2520_v4 = vmul.f32 %v6135_v43, %v7641_v33  ;;  %v2631_v43 = vld [vmem:[#allocation3 + $0x158] sm:$0xff]  ;;  %v2641_v33 = vld [vmem:[#allocation3 + $0x1a8] sm:$0xff] }
 0x76f   : > { %v3092_v34 = vadd.f32 %v2990_v23, %v2626_v36  ;;  %3028 = vmatmul.bf16.gmra.mxu0 %v2579_v29  ;;  %v2832_v28 = vpop.f32.mrf.mxu3  ;;  %v2586_v53 = vpack.c.bf16 %v2522_v12, %v2520_v4  ;;  %v2637_v23 = vld [vmem:[#allocation3 + $0x188] sm:$0xff] }
 0x771   : > { %3156 = vst.msk [vmem:[#allocation3 + $0x130] sm:$0xff] %vm1251_vm6, %v3092_v34 }
 0x774   : > { %v2991_v48 = vpop.f32.mrf.mxu0  ;;  %2874 = vmatmul.bf16.gmra.mxu3 %v2584_v13 }
 0x775   : > { %v2992_v20 = vadd.f32 %v2991_v48, %v2822_v56 }
 0x777   : > { %v3093_v10 = vadd.f32 %v2992_v20, %v2627_v7  ;;  %v2835_v38 = vpop.f32.mrf.mxu3  ;;  %v2639_v7 = vld [vmem:[#allocation3 + $0x198] sm:$0xff] }
 0x779   : > { %3157 = vst.msk [vmem:[#allocation3 + $0x138] sm:$0xff] %vm1251_vm6, %v3093_v10 }
 0x77c   : > { %v2994_v41 = vpop.f32.mrf.mxu0 }
 0x77d   : > { %v2995_v29 = vadd.f32 %v2994_v41, %v2825_v57  ;;  %v2632_v57 = vld [vmem:[#allocation3 + $0x160] sm:$0xff] }
 0x77f   : > { %v3094_v62 = vadd.f32 %v2995_v29, %v2628_v11  ;;  %3033 = vmatmul.bf16.gmra.mxu0 %v2581_v21  ;;  %v2837_v61 = vpop.f32.mrf.mxu3 }
 0x781   : > { %3158 = vst.msk [vmem:[#allocation3 + $0x140] sm:$0xff] %vm1251_vm6, %v3094_v62 }
 0x784   : > { %v2996_v45 = vpop.f32.mrf.mxu0  ;;  %2879 = vmatmul.bf16.gmra.mxu3 %v2586_v53 }
 0x785   : > { %v2997_v37 = vadd.f32 %v2996_v45, %v2827_v35 }
 0x787   : > { %v3095_v19 = vadd.f32 %v2997_v37, %v2629_v26  ;;  %v2840_v56 = vpop.f32.mrf.mxu3 }
 0x789   : > { %3159 = vst.msk [vmem:[#allocation3 + $0x148] sm:$0xff] %vm1251_vm6, %v3095_v19  ;;  %v2643_v19 = vld [vmem:[#allocation3 + $0x1b8] sm:$0xff] }
 0x78c   : > { %v2999_v15 = vpop.f32.mrf.mxu0 }
 0x78d   : > { %v3000_v21 = vadd.f32 %v2999_v15, %v2830_v6 }
 0x78f   : > { %v3096_v1 = vadd.f32 %v3000_v21, %v2630_v9  ;;  %3038 = vmatmul.bf16.gmra.mxu0 %v2583_v5  ;;  %v2842_v30 = vpop.f32.mrf.mxu3 }
 0x791   : > { %3160 = vst.msk [vmem:[#allocation3 + $0x150] sm:$0xff] %vm1251_vm6, %v3096_v1  ;;  %v2644_v1 = vld [vmem:[#allocation3 + $0x1c0] sm:$0xff] }
 0x794   : > { %v3001_v54 = vpop.f32.mrf.mxu0 }
 0x795   : > { %v3002_v40 = vadd.f32 %v3001_v54, %v2832_v28 }
 0x797   : > { %v3097_v2 = vadd.f32 %v3002_v40, %v2631_v43  ;;  %v2845_v17 = vpop.f32.mrf.mxu3 }
 0x799   : > { %3161 = vst.msk [vmem:[#allocation3 + $0x158] sm:$0xff] %vm1251_vm6, %v3097_v2  ;;  %v2645_v2 = vld [vmem:[#allocation3 + $0x1c8] sm:$0xff] }
 0x79c   : > { %v3004_v59 = vpop.f32.mrf.mxu0 }
 0x79d   : > { %v3005_v50 = vadd.f32 %v3004_v59, %v2835_v38  ;;  %v2640_v38 = vld [vmem:[#allocation3 + $0x1a0] sm:$0xff] }
 0x79f   : > { %v3098_v8 = vadd.f32 %v3005_v50, %v2632_v57  ;;  %3043 = vmatmul.bf16.gmra.mxu0 %v2585_v16  ;;  %v2847_v32 = vpop.f32.mrf.mxu3 }
 0x7a1   : > { %3162 = vst.msk [vmem:[#allocation3 + $0x160] sm:$0xff] %vm1251_vm6, %v3098_v8  ;;  %v2646_v8 = vld [vmem:[#allocation3 + $0x1d0] sm:$0xff] }
 0x7a4   : > { %v3006_v47 = vpop.f32.mrf.mxu0 }
 0x7a5   : > { %v3007_v5 = vadd.f32 %v3006_v47, %v2837_v61  ;;  %v2642_v61 = vld [vmem:[#allocation3 + $0x1b0] sm:$0xff] }
 0x7a7   : > { %v3099_v3 = vadd.f32 %v3007_v5, %v2633_v42  ;;  %v2850_v22 = vpop.f32.mrf.mxu3 }
 0x7a9   : > { %3163 = vst.msk [vmem:[#allocation3 + $0x168] sm:$0xff] %vm1251_vm6, %v3099_v3  ;;  %v2647_v3 = vld [vmem:[#allocation3 + $0x1d8] sm:$0xff] }
 0x7ac   : > { %v3009_v14 = vpop.f32.mrf.mxu0 }
 0x7ad   : > { %v3010_v35 = vadd.f32 %v3009_v14, %v2840_v56 }
 0x7af   : > { %v3100_v25 = vadd.f32 %v3010_v35, %v2634_v49  ;;  %3048 = vmatmul.bf16.gmra.mxu0 %v2587_v31  ;;  %v2852_v60 = vpop.f32.mrf.mxu3 }
 0x7b1   : > { %3164 = vst.msk [vmem:[#allocation3 + $0x170] sm:$0xff] %vm1251_vm6, %v3100_v25  ;;  %v2648_v25 = vld [vmem:[#allocation3 + $0x1e0] sm:$0xff] }
 0x7b4   : > { %v3011_v16 = vpop.f32.mrf.mxu0 }
 0x7b5   : > { %v3012_v27 = vadd.f32 %v3011_v16, %v2842_v30 }
 0x7b7   : > { %v3101_v55 = vadd.f32 %v3012_v27, %v2635_v18  ;;  %v2855_v39 = vpop.f32.mrf.mxu3 }
 0x7b9   : > { %3165 = vst.msk [vmem:[#allocation3 + $0x178] sm:$0xff] %vm1251_vm6, %v3101_v55  ;;  %v2649_v55 = vld [vmem:[#allocation3 + $0x1e8] sm:$0xff] }
 0x7bc   : > { %v3014_v6 = vpop.f32.mrf.mxu0 }
 0x7bd   : > { %v3015_v36 = vadd.f32 %v3014_v6, %v2845_v17 }
 0x7bf   : > { %v3102_v58 = vadd.f32 %v3015_v36, %v2636_v52  ;;  %v2857_v28 = vpop.f32.mrf.mxu3 }
 0x7c1   : > { %3166 = vst.msk [vmem:[#allocation3 + $0x180] sm:$0xff] %vm1251_vm6, %v3102_v58  ;;  %v2650_v58 = vld [vmem:[#allocation3 + $0x1f0] sm:$0xff] }
 0x7c4   : > { %v3016_v34 = vpop.f32.mrf.mxu0 }
 0x7c5   : > { %v3017_v46 = vadd.f32 %v3016_v34, %v2847_v32 }
 0x7c7   : > { %v3103_v31 = vadd.f32 %v3017_v46, %v2637_v23  ;;  %v2860_v10 = vpop.f32.mrf.mxu3 }
 0x7c9   : > { %3167 = vst.msk [vmem:[#allocation3 + $0x188] sm:$0xff] %vm1251_vm6, %v3103_v31  ;;  %v2651_v31 = vld [vmem:[#allocation3 + $0x1f8] sm:$0xff] }
 0x7cc   : > { %v3019_v51 = vpop.f32.mrf.mxu0 }
 0x7cd   : > { %v3020_v0 = vadd.f32 %v3019_v51, %v2850_v22 }
 0x7cf   : > { %v3104_v44 = vadd.f32 %v3020_v0, %v2638_v63  ;;  %v2862_v62 = vpop.f32.mrf.mxu3 }
 0x7d1   : > { %3168 = vst.msk [vmem:[#allocation3 + $0x190] sm:$0xff] %vm1251_vm6, %v3104_v44 }
 0x7d4   : > { %v3021_v48 = vpop.f32.mrf.mxu0 }
 0x7d5   : > { %v3022_v20 = vadd.f32 %v3021_v48, %v2852_v60 }
 0x7d7   : > { %v3105_v13 = vadd.f32 %v3022_v20, %v2639_v7  ;;  %v2865_v37 = vpop.f32.mrf.mxu3 }
 0x7d9   : > { %3169 = vst.msk [vmem:[#allocation3 + $0x198] sm:$0xff] %vm1251_vm6, %v3105_v13 }
 0x7dc   : > { %v3024_v11 = vpop.f32.mrf.mxu0 }
 0x7dd   : > { %v3025_v41 = vadd.f32 %v3024_v11, %v2855_v39 }
 0x7df   : > { %v3106_v29 = vadd.f32 %v3025_v41, %v2640_v38  ;;  %v2867_v21 = vpop.f32.mrf.mxu3 }
 0x7e1   : > { %3170 = vst.msk [vmem:[#allocation3 + $0x1a0] sm:$0xff] %vm1251_vm6, %v3106_v29 }
 0x7e4   : > { %v3026_v4 = vpop.f32.mrf.mxu0 }
 0x7e5   : > { %v3027_v24 = vadd.f32 %v3026_v4, %v2857_v28 }
 0x7e7   : > { %v3107_v12 = vadd.f32 %v3027_v24, %v2641_v33  ;;  %v2870_v40 = vpop.f32.mrf.mxu3 }
 0x7e9   : > { %3171 = vst.msk [vmem:[#allocation3 + $0x1a8] sm:$0xff] %vm1251_vm6, %v3107_v12 }
 0x7ec   : > { %v3029_v26 = vpop.f32.mrf.mxu0 }
 0x7ed   : > { %v3030_v45 = vadd.f32 %v3029_v26, %v2860_v10 }
 0x7ef   : > { %v3108_v53 = vadd.f32 %v3030_v45, %v2642_v61  ;;  %v2872_v17 = vpop.f32.mrf.mxu3 }
 0x7f1   : > { %3172 = vst.msk [vmem:[#allocation3 + $0x1b0] sm:$0xff] %vm1251_vm6, %v3108_v53 }
 0x7f4   : > { %v3031_v56 = vpop.f32.mrf.mxu0 }
 0x7f5   : > { %v3032_v9 = vadd.f32 %v3031_v56, %v2862_v62 }
 0x7f7   : > { %v3109_v15 = vadd.f32 %v3032_v9, %v2643_v19  ;;  %v2875_v14 = vpop.f32.mrf.mxu3 }
 0x7f9   : > { %3173 = vst.msk [vmem:[#allocation3 + $0x1b8] sm:$0xff] %vm1251_vm6, %v3109_v15 }
 0x7fc   : > { %v3034_v43 = vpop.f32.mrf.mxu0 }
 0x7fd   : > { %v3035_v54 = vadd.f32 %v3034_v43, %v2865_v37 }
 0x7ff   : > { %v3110_v30 = vadd.f32 %v3035_v54, %v2644_v1  ;;  %v2877_v27 = vpop.f32.mrf.mxu3 }
 0x801   : > { %3174 = vst.msk [vmem:[#allocation3 + $0x1c0] sm:$0xff] %vm1251_vm6, %v3110_v30 }
 0x804   : > { %v3036_v57 = vpop.f32.mrf.mxu0 }
 0x805   : > { %v3037_v59 = vadd.f32 %v3036_v57, %v2867_v21 }
 0x807   : > { %v3111_v50 = vadd.f32 %v3037_v59, %v2645_v2  ;;  %v2880_v36 = vpop.f32.mrf.mxu3 }
 0x809   : > { %3175 = vst.msk [vmem:[#allocation3 + $0x1c8] sm:$0xff] %vm1251_vm6, %v3111_v50 }
 0x80c   : > { %v3039_v42 = vpop.f32.mrf.mxu0 }
 0x80d   : > { %v3040_v47 = vadd.f32 %v3039_v42, %v2870_v40 }
 0x80f   : > { %v3112_v5 = vadd.f32 %v3040_v47, %v2646_v8  ;;  %v2882_v39 = vpop.f32.mrf.mxu3 }
 0x811   : > { %3176 = vst.msk [vmem:[#allocation3 + $0x1d0] sm:$0xff] %vm1251_vm6, %v3112_v5 }
 0x814   : > { %v3041_v32 = vpop.f32.mrf.mxu0 }
 0x815   : > { %v3042_v49 = vadd.f32 %v3041_v32, %v2872_v17 }
 0x817   : > { %v3113_v35 = vadd.f32 %v3042_v49, %v2647_v3 }
 0x819   : > { %3177 = vst.msk [vmem:[#allocation3 + $0x1d8] sm:$0xff] %vm1251_vm6, %v3113_v35 }
 0x81c   : > { %v3044_v22 = vpop.f32.mrf.mxu0 }
 0x81d   : > { %v3045_v18 = vadd.f32 %v3044_v22, %v2875_v14 }
 0x81f   : > { %v3114_v16 = vadd.f32 %v3045_v18, %v2648_v25 }
 0x821   : > { %3178 = vst.msk [vmem:[#allocation3 + $0x1e0] sm:$0xff] %vm1251_vm6, %v3114_v16 }
 0x824   : > { %v3046_v60 = vpop.f32.mrf.mxu0 }
 0x825   : > { %v3047_v52 = vadd.f32 %v3046_v60, %v2877_v27 }
 0x827   : > { %v3115_v6 = vadd.f32 %v3047_v52, %v2649_v55 }
 0x829   : > { %3179 = vst.msk [vmem:[#allocation3 + $0x1e8] sm:$0xff] %vm1251_vm6, %v3115_v6 }
 0x82c   : > { %v3049_v23 = vpop.f32.mrf.mxu0 }
 0x82d   : > { %v3050_v34 = vadd.f32 %v3049_v23, %v2880_v36 }
 0x82f   : > { %v3116_v46 = vadd.f32 %v3050_v34, %v2650_v58 }
 0x831   : > { %3180 = vst.msk [vmem:[#allocation3 + $0x1f0] sm:$0xff] %vm1251_vm6, %v3116_v46 }
 0x834   : > { %v3051_v63 = vpop.f32.mrf.mxu0 }
 0x835   : > { %v3052_v51 = vadd.f32 %v3051_v63, %v2882_v39  ;;  %3185 = sbr.rel (%p4011_p4) target bundleno = 2370 (0x942), region = 56 }
 0x837   : > { %v3117_v0 = vadd.f32 %v3052_v51, %v2651_v31 }
 0x839   : > { %3181 = vst.msk [vmem:[#allocation3 + $0x1f8] sm:$0xff] %vm1251_vm6, %v3117_v0 }
 0x83a   : > { %v3282_v44 = vld [vmem:[%s7094_s5] sm:$0x1]  ;;  %vm3383_vm7 = vcmask 1040384   ;;  %v3187_v7 = vld [vmem:[#allocation3 + $0x8] sm:$0xff]  ;;  %v3188_v24 = vld [vmem:[#allocation3 + $0x10] sm:$0xff] }
 0x83b   : > { %v3186_v28 = vld [vmem:[#allocation3] sm:$0xff]  ;;  %v3385_v48 = vsel %vm3383_vm7, %v3282_v44, 0  ;;  %v3203_v10 = vld [vmem:[#allocation3 + $0x88] sm:$0xff]  ;;  %v3189_v12 = vld [vmem:[#allocation3 + $0x18] sm:$0xff] }
 0x83c   : > { %v3250_v20 = vpack.c.bf16 %v3187_v7, %v3186_v28  ;;  %v3202_v13 = vld [vmem:[#allocation3 + $0x80] sm:$0xff]  ;;  %3394 = vmatpush.bf16.msra.mxu0 %v3385_v48  ;;  %4084 = vmatpush.bf16.msra.mxu1 %v3385_v48  ;;  %v3219_v41 = vld [vmem:[#allocation3 + $0x108] sm:$0xff]  ;;  %v3204_v61 = vld [vmem:[#allocation3 + $0x90] sm:$0xff]  ;;  %v3251_v56 = vpack.c.bf16 %v3189_v12, %v3188_v24 }
 0x83d   : > { %v3218_v38 = vld [vmem:[#allocation3 + $0x100] sm:$0xff]  ;;  %v3258_v11 = vpack.c.bf16 %v3203_v10, %v3202_v13  ;;  %v3235_v62 = vld [vmem:[#allocation3 + $0x188] sm:$0xff]  ;;  %4085 = vmatpush.bf16.msra.mxu2 %v3385_v48  ;;  %4086 = vmatpush.bf16.msra.mxu3 %v3385_v48  ;;  %v3205_v26 = vld [vmem:[#allocation3 + $0x98] sm:$0xff] }
 0x83e   : > { %v3234_v29 = vld [vmem:[#allocation3 + $0x180] sm:$0xff]  ;;  %v3266_v33 = vpack.c.bf16 %v3219_v41, %v3218_v38  ;;  %v3220_v45 = vld [vmem:[#allocation3 + $0x110] sm:$0xff]  ;;  %v3221_v37 = vld [vmem:[#allocation3 + $0x118] sm:$0xff]  ;;  %v3259_v9 = vpack.c.bf16 %v3205_v26, %v3204_v61 }
 0x83f   : > { %v3274_v4 = vpack.c.bf16 %v3235_v62, %v3234_v29  ;;  %4012 = vmatmul.msk.bf16.vlgmr.msra.gmra.mxu0 %vm1251_vm6, %v3250_v20  ;;  %4020 = vmatmul.msk.bf16.vlgmr.msra.gmra.mxu1 %vm1251_vm6, %v3258_v11  ;;  %v3236_v53 = vld [vmem:[#allocation3 + $0x190] sm:$0xff]  ;;  %v3237_v19 = vld [vmem:[#allocation3 + $0x198] sm:$0xff]  ;;  %v3267_v15 = vpack.c.bf16 %v3221_v37, %v3220_v45  ;;  %v3190_v1 = vld [vmem:[#allocation3 + $0x20] sm:$0xff] }
 0x840   : > { %4028 = vmatmul.msk.bf16.vlgmr.msra.gmra.mxu2 %vm1251_vm6, %v3266_v33  ;;  %v3275_v21 = vpack.c.bf16 %v3237_v19, %v3236_v53  ;;  %v3191_v43 = vld [vmem:[#allocation3 + $0x28] sm:$0xff]  ;;  %v3206_v54 = vld [vmem:[#allocation3 + $0xa0] sm:$0xff]  ;;  %v3192_v47 = vld [vmem:[#allocation3 + $0x30] sm:$0xff] }
 0x841   : > { %4036 = vmatmul.msk.bf16.vlgmr.msra.gmra.mxu3 %vm1251_vm6, %v3274_v4  ;;  %v3207_v30 = vld [vmem:[#allocation3 + $0xa8] sm:$0xff]  ;;  %v3222_v40 = vld [vmem:[#allocation3 + $0x120] sm:$0xff]  ;;  %v3252_v50 = vpack.c.bf16 %v3191_v43, %v3190_v1  ;;  %v3193_v5 = vld [vmem:[#allocation3 + $0x38] sm:$0xff] }
 0x842   : > { %v3223_v2 = vld [vmem:[#allocation3 + $0x128] sm:$0xff]  ;;  %v3238_v57 = vld [vmem:[#allocation3 + $0x1a0] sm:$0xff]  ;;  %v3260_v17 = vpack.c.bf16 %v3207_v30, %v3206_v54  ;;  %v3208_v3 = vld [vmem:[#allocation3 + $0xb0] sm:$0xff]  ;;  %v3253_v22 = vpack.c.bf16 %v3193_v5, %v3192_v47 }
 0x843   : > { %v3239_v59 = vld [vmem:[#allocation3 + $0x1a8] sm:$0xff]  ;;  %v3268_v8 = vpack.c.bf16 %v3223_v2, %v3222_v40  ;;  %v3209_v32 = vld [vmem:[#allocation3 + $0xb8] sm:$0xff]  ;;  %v3224_v49 = vld [vmem:[#allocation3 + $0x130] sm:$0xff] }
 0x844   : > { %v3276_v42 = vpack.c.bf16 %v3239_v59, %v3238_v57  ;;  %v3225_v14 = vld [vmem:[#allocation3 + $0x138] sm:$0xff]  ;;  %v3240_v35 = vld [vmem:[#allocation3 + $0x1b0] sm:$0xff]  ;;  %v3261_v18 = vpack.c.bf16 %v3209_v32, %v3208_v3  ;;  %v3194_v55 = vld [vmem:[#allocation3 + $0x40] sm:$0xff] }
 0x845   : > { %v3241_v25 = vld [vmem:[#allocation3 + $0x1b8] sm:$0xff]  ;;  %v3269_v16 = vpack.c.bf16 %v3225_v14, %v3224_v49  ;;  %v3195_v60 = vld [vmem:[#allocation3 + $0x48] sm:$0xff]  ;;  %v3210_v52 = vld [vmem:[#allocation3 + $0xc0] sm:$0xff] }
 0x846   : > { %v3277_v27 = vpack.c.bf16 %v3241_v25, %v3240_v35  ;;  %v3211_v6 = vld [vmem:[#allocation3 + $0xc8] sm:$0xff]  ;;  %v3226_v36 = vld [vmem:[#allocation3 + $0x140] sm:$0xff]  ;;  %v3254_v46 = vpack.c.bf16 %v3195_v60, %v3194_v55  ;;  %v3196_v51 = vld [vmem:[#allocation3 + $0x50] sm:$0xff] }
 0x847   : > { %v3227_v58 = vld [vmem:[#allocation3 + $0x148] sm:$0xff]  ;;  %v3242_v23 = vld [vmem:[#allocation3 + $0x1c0] sm:$0xff]  ;;  %v3262_v39 = vpack.c.bf16 %v3211_v6, %v3210_v52  ;;  %v3197_v0 = vld [vmem:[#allocation3 + $0x58] sm:$0xff] }
 0x848   : > { %v3243_v34 = vld [vmem:[#allocation3 + $0x1c8] sm:$0xff]  ;;  %v3270_v31 = vpack.c.bf16 %v3227_v58, %v3226_v36  ;;  %v3212_v44 = vld [vmem:[#allocation3 + $0xd0] sm:$0xff]  ;;  %v3213_v28 = vld [vmem:[#allocation3 + $0xd8] sm:$0xff]  ;;  %v3255_v10 = vpack.c.bf16 %v3197_v0, %v3196_v51 }
 0x849   : > { %v3278_v63 = vpack.c.bf16 %v3243_v34, %v3242_v23  ;;  %v3228_v7 = vld [vmem:[#allocation3 + $0x150] sm:$0xff]  ;;  %v3229_v48 = vld [vmem:[#allocation3 + $0x158] sm:$0xff]  ;;  %v3263_v38 = vpack.c.bf16 %v3213_v28, %v3212_v44  ;;  %v3198_v29 = vld [vmem:[#allocation3 + $0x60] sm:$0xff] }
 0x84a   : > { %v3244_v20 = vld [vmem:[#allocation3 + $0x1d0] sm:$0xff]  ;;  %v3245_v13 = vld [vmem:[#allocation3 + $0x1d8] sm:$0xff]  ;;  %v3271_v11 = vpack.c.bf16 %v3229_v48, %v3228_v7  ;;  %v3199_v62 = vld [vmem:[#allocation3 + $0x68] sm:$0xff] }
 0x84b   : > { %v3279_v41 = vpack.c.bf16 %v3245_v13, %v3244_v20  ;;  %v3214_v33 = vld [vmem:[#allocation3 + $0xe0] sm:$0xff]  ;;  %v3215_v4 = vld [vmem:[#allocation3 + $0xe8] sm:$0xff]  ;;  %v3256_v45 = vpack.c.bf16 %v3199_v62, %v3198_v29  ;;  %v3232_v1 = vld [vmem:[#allocation3 + $0x170] sm:$0xff] }
 0x84c   : > { %v3230_v24 = vld [vmem:[#allocation3 + $0x160] sm:$0xff]  ;;  %v3231_v12 = vld [vmem:[#allocation3 + $0x168] sm:$0xff]  ;;  %v3264_v37 = vpack.c.bf16 %v3215_v4, %v3214_v33  ;;  %v3233_v43 = vld [vmem:[#allocation3 + $0x178] sm:$0xff] }
 0x84d   : > { %v3246_v61 = vld [vmem:[#allocation3 + $0x1e0] sm:$0xff]  ;;  %v3247_v26 = vld [vmem:[#allocation3 + $0x1e8] sm:$0xff]  ;;  %v3272_v53 = vpack.c.bf16 %v3231_v12, %v3230_v24  ;;  %v3248_v54 = vld [vmem:[#allocation3 + $0x1f0] sm:$0xff]  ;;  %v3273_v57 = vpack.c.bf16 %v3233_v43, %v3232_v1 }
 0x84e   : > { %v3280_v19 = vpack.c.bf16 %v3247_v26, %v3246_v61  ;;  %v3249_v30 = vld [vmem:[#allocation3 + $0x1f8] sm:$0xff]  ;;  %v3572_v47 = vld [vmem:[%s7089_s0 + $0x80] sm:$0xff]  ;;  %v3557_v55 = vld [vmem:[%s7089_s0 + $0x8] sm:$0xff] }
 0x84f   : > { %4013 = vmatmul.msk.bf16.gmra.mxu0 %vm1251_vm6, %v3251_v56  ;;  %4021 = vmatmul.msk.bf16.gmra.mxu1 %vm1251_vm6, %v3259_v9  ;;  %v3200_v56 = vld [vmem:[#allocation3 + $0x70] sm:$0xff]  ;;  %v3201_v9 = vld [vmem:[#allocation3 + $0x78] sm:$0xff]  ;;  %v3281_v59 = vpack.c.bf16 %v3249_v30, %v3248_v54  ;;  %v3588_v35 = vld [vmem:[%s7089_s0 + $0x100] sm:$0xff] }
 0x850   : > { %4029 = vmatmul.msk.bf16.gmra.mxu2 %vm1251_vm6, %v3267_v15  ;;  %v3216_v15 = vld [vmem:[#allocation3 + $0xf0] sm:$0xff]  ;;  %v3257_v40 = vpack.c.bf16 %v3201_v9, %v3200_v56  ;;  %v3573_v52 = vld [vmem:[%s7089_s0 + $0x88] sm:$0xff]  ;;  %v3591_v54 = vld [vmem:[%s7089_s0 + $0x118] sm:$0xff] }
 0x851   : > { %4037 = vmatmul.msk.bf16.gmra.mxu3 %vm1251_vm6, %v3275_v21  ;;  %v3217_v21 = vld [vmem:[#allocation3 + $0xf8] sm:$0xff]  ;;  %v3605_v51 = vld [vmem:[%s7089_s0 + $0x188] sm:$0xff]  ;;  %v3558_v7 = vld [vmem:[%s7089_s0 + $0x10] sm:$0xff] }
 0x852   : > { %v3265_v2 = vpack.c.bf16 %v3217_v21, %v3216_v15  ;;  %v3574_v20 = vld [vmem:[%s7089_s0 + $0x90] sm:$0xff] }
 0x853   : > { %v3590_v33 = vld [vmem:[%s7089_s0 + $0x110] sm:$0xff] }
 0x854   : > { %v3606_v24 = vld [vmem:[%s7089_s0 + $0x190] sm:$0xff] }
 0x85f   : > { %4014 = vmatmul.msk.bf16.gmra.mxu0 %vm1251_vm6, %v3252_v50  ;;  %4022 = vmatmul.msk.bf16.gmra.mxu1 %vm1251_vm6, %v3260_v17  ;;  %v6572_v50 = vld [vmem:[%s7095_s6] ss:$0 sm:$0xff] }
 0x860   : > { %4030 = vmatmul.msk.bf16.gmra.mxu2 %vm1251_vm6, %v3268_v8  ;;  %v3556_v8 = vld [vmem:[%s7089_s0] sm:$0xff] }
 0x861   : > { %4038 = vmatmul.msk.bf16.gmra.mxu3 %vm1251_vm6, %v3276_v42 }
 0x86f   : > { %4015 = vmatmul.msk.bf16.gmra.mxu0 %vm1251_vm6, %v3253_v22  ;;  %4023 = vmatmul.msk.bf16.gmra.mxu1 %vm1251_vm6, %v3261_v18  ;;  %v3604_v22 = vld [vmem:[%s7089_s0 + $0x180] sm:$0xff] }
 0x870   : > { %4031 = vmatmul.msk.bf16.gmra.mxu2 %vm1251_vm6, %v3269_v16 }
 0x871   : > { %4039 = vmatmul.msk.bf16.gmra.mxu3 %vm1251_vm6, %v3277_v27 }
 0x87f   : > { %4016 = vmatmul.msk.bf16.gmra.mxu0 %vm1251_vm6, %v3254_v46  ;;  %4024 = vmatmul.msk.bf16.gmra.mxu1 %vm1251_vm6, %v3262_v39 }
 0x880   : > { %4032 = vmatmul.msk.bf16.gmra.mxu2 %vm1251_vm6, %v3270_v31  ;;  %v3589_v31 = vld [vmem:[%s7089_s0 + $0x108] sm:$0xff] }
 0x881   : > { %4040 = vmatmul.msk.bf16.gmra.mxu3 %vm1251_vm6, %v3278_v63 }
 0x88f   : > { %4017 = vmatmul.msk.bf16.gmra.mxu0 %vm1251_vm6, %v3255_v10  ;;  %4025 = vmatmul.msk.bf16.gmra.mxu1 %vm1251_vm6, %v3263_v38 }
 0x890   : > { %4033 = vmatmul.msk.bf16.gmra.mxu2 %vm1251_vm6, %v3271_v11 }
 0x891   : > { %4041 = vmatmul.msk.bf16.gmra.mxu3 %vm1251_vm6, %v3279_v41 }
 0x89f   : > { %4018 = vmatmul.msk.bf16.gmra.mxu0 %vm1251_vm6, %v3256_v45  ;;  %4026 = vmatmul.msk.bf16.gmra.mxu1 %vm1251_vm6, %v3264_v37  ;;  %v3559_v45 = vld [vmem:[%s7089_s0 + $0x18] sm:$0xff] }
 0x8a0   : > { %4034 = vmatmul.msk.bf16.gmra.mxu2 %vm1251_vm6, %v3272_v53  ;;  %v3575_v53 = vld [vmem:[%s7089_s0 + $0x98] sm:$0xff] }
 0x8a1   : > { %4042 = vmatmul.msk.bf16.gmra.mxu3 %vm1251_vm6, %v3280_v19 }
 0x8af   : > { %4019 = vmatmul.msk.bf16.gmra.mxu0 %vm1251_vm6, %v3257_v40  ;;  %4027 = vmatmul.msk.bf16.gmra.mxu1 %vm1251_vm6, %v3265_v2  ;;  %v3607_v40 = vld [vmem:[%s7089_s0 + $0x198] sm:$0xff] }
 0x8b0   : > { %4035 = vmatmul.msk.bf16.gmra.mxu2 %vm1251_vm6, %v3273_v57 }
 0x8b1   : > { %4043 = vmatmul.msk.bf16.gmra.mxu3 %vm1251_vm6, %v3281_v59 }
 0x8bc   : > { %v3396_v17 = vpop.f32.mrf.mxu0  ;;  %v3436_v42 = vpop.f32.mrf.mxu1 }
 0x8bd   : > { %v3397_v5 = vadd.f32 %v6572_v50, %v3396_v17  ;;  %v3437_v3 = vadd.f32 %v6572_v50, %v3436_v42  ;;  %v3560_v17 = vld [vmem:[%s7089_s0 + $0x20] sm:$0xff] }
 0x8be   : > { %v3576_v42 = vld [vmem:[%s7089_s0 + $0xa0] sm:$0xff] }
 0x8bf   : > { %v3620_v32 = vadd.f32 %v3556_v8, %v3397_v5  ;;  %v3636_v49 = vadd.f32 %v3572_v47, %v3437_v3 }
 0x8c1   : > { %3684 = vst.msk [vmem:[%s7096_s7] sm:$0xff] %vm869_vm5, %v3620_v32 }
 0x8c2   : > { %3700 = vst.msk [vmem:[%s7096_s7 + $0x80] sm:$0xff] %vm869_vm5, %v3636_v49 }
 0x8c3   : > { %v3476_v14 = vpop.f32.mrf.mxu2 }
 0x8c4   : > { %v3516_v25 = vpop.f32.mrf.mxu3  ;;  %v3477_v18 = vadd.f32 %v6572_v50, %v3476_v14  ;;  %v3398_v27 = vpop.f32.mrf.mxu0 }
 0x8c5   : > { %v3517_v16 = vadd.f32 %v6572_v50, %v3516_v25  ;;  %v3438_v60 = vpop.f32.mrf.mxu1  ;;  %v3399_v6 = vadd.f32 %v6572_v50, %v3398_v27  ;;  %v3592_v25 = vld [vmem:[%s7089_s0 + $0x120] sm:$0xff] }
 0x8c6   : > { %v3439_v36 = vadd.f32 %v6572_v50, %v3438_v60  ;;  %v3652_v58 = vadd.f32 %v3588_v35, %v3477_v18  ;;  %v3608_v18 = vld [vmem:[%s7089_s0 + $0x1a0] sm:$0xff]  ;;  %v3561_v60 = vld [vmem:[%s7089_s0 + $0x28] sm:$0xff] }
 0x8c7   : > { %v3668_v23 = vadd.f32 %v3604_v22, %v3517_v16  ;;  %v3621_v34 = vadd.f32 %v3557_v55, %v3399_v6  ;;  %v3577_v6 = vld [vmem:[%s7089_s0 + $0xa8] sm:$0xff] }
 0x8c8   : > { %v3637_v46 = vadd.f32 %v3573_v52, %v3439_v36  ;;  %3716 = vst.msk [vmem:[%s7096_s7 + $0x100] sm:$0xff] %vm869_vm5, %v3652_v58 }
 0x8c9   : > { %3732 = vst.msk [vmem:[%s7096_s7 + $0x180] sm:$0xff] %vm869_vm5, %v3668_v23 }
 0x8ca   : > { %3685 = vst.msk [vmem:[%s7096_s7 + $0x8] sm:$0xff] %vm869_vm5, %v3621_v34 }
 0x8cb   : > { %3701 = vst.msk [vmem:[%s7096_s7 + $0x88] sm:$0xff] %vm869_vm5, %v3637_v46  ;;  %v3478_v39 = vpop.f32.mrf.mxu2 }
 0x8cc   : > { %v3518_v63 = vpop.f32.mrf.mxu3  ;;  %v3479_v0 = vadd.f32 %v6572_v50, %v3478_v39  ;;  %v3401_v28 = vpop.f32.mrf.mxu0 }
 0x8cd   : > { %v3519_v44 = vadd.f32 %v6572_v50, %v3518_v63  ;;  %v3441_v48 = vpop.f32.mrf.mxu1  ;;  %v3402_v13 = vadd.f32 %v6572_v50, %v3401_v28  ;;  %v3593_v63 = vld [vmem:[%s7089_s0 + $0x128] sm:$0xff] }
 0x8ce   : > { %v3442_v10 = vadd.f32 %v6572_v50, %v3441_v48  ;;  %v3653_v38 = vadd.f32 %v3589_v31, %v3479_v0  ;;  %v3609_v0 = vld [vmem:[%s7089_s0 + $0x1a8] sm:$0xff]  ;;  %v3562_v48 = vld [vmem:[%s7089_s0 + $0x30] sm:$0xff] }
 0x8cf   : > { %v3669_v11 = vadd.f32 %v3605_v51, %v3519_v44  ;;  %v3622_v41 = vadd.f32 %v3558_v7, %v3402_v13  ;;  %v3578_v13 = vld [vmem:[%s7089_s0 + $0xb0] sm:$0xff] }
 0x8d0   : > { %v3638_v29 = vadd.f32 %v3574_v20, %v3442_v10  ;;  %3717 = vst.msk [vmem:[%s7096_s7 + $0x108] sm:$0xff] %vm869_vm5, %v3653_v38 }
 0x8d1   : > { %3733 = vst.msk [vmem:[%s7096_s7 + $0x188] sm:$0xff] %vm869_vm5, %v3669_v11 }
 0x8d2   : > { %3686 = vst.msk [vmem:[%s7096_s7 + $0x10] sm:$0xff] %vm869_vm5, %v3622_v41 }
 0x8d3   : > { %3702 = vst.msk [vmem:[%s7096_s7 + $0x90] sm:$0xff] %vm869_vm5, %v3638_v29  ;;  %v3481_v62 = vpop.f32.mrf.mxu2 }
 0x8d4   : > { %v3521_v4 = vpop.f32.mrf.mxu3  ;;  %v3482_v12 = vadd.f32 %v6572_v50, %v3481_v62  ;;  %v3403_v26 = vpop.f32.mrf.mxu0 }
 0x8d5   : > { %v3522_v61 = vadd.f32 %v6572_v50, %v3521_v4  ;;  %v3443_v37 = vpop.f32.mrf.mxu1  ;;  %v3404_v19 = vadd.f32 %v6572_v50, %v3403_v26  ;;  %v3594_v4 = vld [vmem:[%s7089_s0 + $0x130] sm:$0xff] }
 0x8d6   : > { %v3444_v56 = vadd.f32 %v6572_v50, %v3443_v37  ;;  %v3654_v9 = vadd.f32 %v3590_v33, %v3482_v12  ;;  %v3610_v12 = vld [vmem:[%s7089_s0 + $0x1b0] sm:$0xff]  ;;  %v3563_v37 = vld [vmem:[%s7089_s0 + $0x38] sm:$0xff] }
 0x8d7   : > { %v3670_v15 = vadd.f32 %v3606_v24, %v3522_v61  ;;  %v3623_v21 = vadd.f32 %v3559_v45, %v3404_v19  ;;  %v3579_v19 = vld [vmem:[%s7089_s0 + $0xb8] sm:$0xff] }
 0x8d8   : > { %v3639_v1 = vadd.f32 %v3575_v53, %v3444_v56  ;;  %3718 = vst.msk [vmem:[%s7096_s7 + $0x110] sm:$0xff] %vm869_vm5, %v3654_v9 }
 0x8d9   : > { %3734 = vst.msk [vmem:[%s7096_s7 + $0x190] sm:$0xff] %vm869_vm5, %v3670_v15 }
 0x8da   : > { %3687 = vst.msk [vmem:[%s7096_s7 + $0x18] sm:$0xff] %vm869_vm5, %v3623_v21 }
 0x8db   : > { %3703 = vst.msk [vmem:[%s7096_s7 + $0x98] sm:$0xff] %vm869_vm5, %v3639_v1  ;;  %v3483_v43 = vpop.f32.mrf.mxu2 }
 0x8dc   : > { %v3523_v30 = vpop.f32.mrf.mxu3  ;;  %v3484_v2 = vadd.f32 %v6572_v50, %v3483_v43  ;;  %v3406_v59 = vpop.f32.mrf.mxu0 }
 0x8dd   : > { %v3524_v57 = vadd.f32 %v6572_v50, %v3523_v30  ;;  %v3446_v8 = vpop.f32.mrf.mxu1  ;;  %v3407_v47 = vadd.f32 %v6572_v50, %v3406_v59  ;;  %v3595_v30 = vld [vmem:[%s7089_s0 + $0x138] sm:$0xff] }
 0x8de   : > { %v3447_v5 = vadd.f32 %v6572_v50, %v3446_v8  ;;  %v3655_v3 = vadd.f32 %v3591_v54, %v3484_v2  ;;  %v3611_v2 = vld [vmem:[%s7089_s0 + $0x1b8] sm:$0xff]  ;;  %v3564_v8 = vld [vmem:[%s7089_s0 + $0x40] sm:$0xff] }
 0x8df   : > { %v3671_v32 = vadd.f32 %v3607_v40, %v3524_v57  ;;  %v3624_v49 = vadd.f32 %v3560_v17, %v3407_v47  ;;  %v3580_v47 = vld [vmem:[%s7089_s0 + $0xc0] sm:$0xff] }
 0x8e0   : > { %v3640_v14 = vadd.f32 %v3576_v42, %v3447_v5  ;;  %3719 = vst.msk [vmem:[%s7096_s7 + $0x118] sm:$0xff] %vm869_vm5, %v3655_v3 }
 0x8e1   : > { %3735 = vst.msk [vmem:[%s7096_s7 + $0x198] sm:$0xff] %vm869_vm5, %v3671_v32 }
 0x8e2   : > { %3688 = vst.msk [vmem:[%s7096_s7 + $0x20] sm:$0xff] %vm869_vm5, %v3624_v49 }
 0x8e3   : > { %3704 = vst.msk [vmem:[%s7096_s7 + $0xa0] sm:$0xff] %vm869_vm5, %v3640_v14  ;;  %v3486_v35 = vpop.f32.mrf.mxu2 }
 0x8e4   : > { %v3526_v22 = vpop.f32.mrf.mxu3  ;;  %v3487_v16 = vadd.f32 %v6572_v50, %v3486_v35  ;;  %v3408_v55 = vpop.f32.mrf.mxu0 }
 0x8e5   : > { %v3527_v27 = vadd.f32 %v6572_v50, %v3526_v22  ;;  %v3448_v52 = vpop.f32.mrf.mxu1  ;;  %v3409_v36 = vadd.f32 %v6572_v50, %v3408_v55  ;;  %v3596_v22 = vld [vmem:[%s7089_s0 + $0x140] sm:$0xff] }
 0x8e6   : > { %v3449_v58 = vadd.f32 %v6572_v50, %v3448_v52  ;;  %v3656_v23 = vadd.f32 %v3592_v25, %v3487_v16  ;;  %v3612_v16 = vld [vmem:[%s7089_s0 + $0x1c0] sm:$0xff]  ;;  %v3565_v52 = vld [vmem:[%s7089_s0 + $0x48] sm:$0xff] }
 0x8e7   : > { %v3672_v34 = vadd.f32 %v3608_v18, %v3527_v27  ;;  %v3625_v46 = vadd.f32 %v3561_v60, %v3409_v36  ;;  %v3581_v36 = vld [vmem:[%s7089_s0 + $0xc8] sm:$0xff] }
 0x8e8   : > { %v3641_v39 = vadd.f32 %v3577_v6, %v3449_v58  ;;  %3720 = vst.msk [vmem:[%s7096_s7 + $0x120] sm:$0xff] %vm869_vm5, %v3656_v23 }
 0x8e9   : > { %3736 = vst.msk [vmem:[%s7096_s7 + $0x1a0] sm:$0xff] %vm869_vm5, %v3672_v34 }
 0x8ea   : > { %3689 = vst.msk [vmem:[%s7096_s7 + $0x28] sm:$0xff] %vm869_vm5, %v3625_v46 }
 0x8eb   : > { %3705 = vst.msk [vmem:[%s7096_s7 + $0xa8] sm:$0xff] %vm869_vm5, %v3641_v39  ;;  %v3488_v31 = vpop.f32.mrf.mxu2 }
 0x8ec   : > { %v3528_v51 = vpop.f32.mrf.mxu3  ;;  %v3489_v44 = vadd.f32 %v6572_v50, %v3488_v31  ;;  %v3411_v7 = vpop.f32.mrf.mxu0 }
 0x8ed   : > { %v3529_v28 = vadd.f32 %v6572_v50, %v3528_v51  ;;  %v3451_v20 = vpop.f32.mrf.mxu1  ;;  %v3412_v10 = vadd.f32 %v6572_v50, %v3411_v7  ;;  %v3597_v51 = vld [vmem:[%s7089_s0 + $0x148] sm:$0xff] }
 0x8ee   : > { %v3452_v38 = vadd.f32 %v6572_v50, %v3451_v20  ;;  %v3657_v11 = vadd.f32 %v3593_v63, %v3489_v44  ;;  %v3613_v44 = vld [vmem:[%s7089_s0 + $0x1c8] sm:$0xff]  ;;  %v3566_v20 = vld [vmem:[%s7089_s0 + $0x50] sm:$0xff] }
 0x8ef   : > { %v3673_v41 = vadd.f32 %v3609_v0, %v3529_v28  ;;  %v3626_v29 = vadd.f32 %v3562_v48, %v3412_v10  ;;  %v3582_v10 = vld [vmem:[%s7089_s0 + $0xd0] sm:$0xff] }
 0x8f0   : > { %v3642_v62 = vadd.f32 %v3578_v13, %v3452_v38  ;;  %3721 = vst.msk [vmem:[%s7096_s7 + $0x128] sm:$0xff] %vm869_vm5, %v3657_v11 }
 0x8f1   : > { %3737 = vst.msk [vmem:[%s7096_s7 + $0x1a8] sm:$0xff] %vm869_vm5, %v3673_v41 }
 0x8f2   : > { %3690 = vst.msk [vmem:[%s7096_s7 + $0x30] sm:$0xff] %vm869_vm5, %v3626_v29 }
 0x8f3   : > { %3706 = vst.msk [vmem:[%s7096_s7 + $0xb0] sm:$0xff] %vm869_vm5, %v3642_v62  ;;  %v3491_v33 = vpop.f32.mrf.mxu2 }
 0x8f4   : > { %v3531_v24 = vpop.f32.mrf.mxu3  ;;  %v3492_v61 = vadd.f32 %v6572_v50, %v3491_v33  ;;  %v3413_v45 = vpop.f32.mrf.mxu0 }
 0x8f5   : > { %v3532_v26 = vadd.f32 %v6572_v50, %v3531_v24  ;;  %v3453_v53 = vpop.f32.mrf.mxu1  ;;  %v3414_v56 = vadd.f32 %v6572_v50, %v3413_v45  ;;  %v3598_v24 = vld [vmem:[%s7089_s0 + $0x150] sm:$0xff] }
 0x8f6   : > { %v3454_v9 = vadd.f32 %v6572_v50, %v3453_v53  ;;  %v3658_v15 = vadd.f32 %v3594_v4, %v3492_v61  ;;  %v3614_v61 = vld [vmem:[%s7089_s0 + $0x1d0] sm:$0xff]  ;;  %v3567_v53 = vld [vmem:[%s7089_s0 + $0x58] sm:$0xff] }
 0x8f7   : > { %v3674_v21 = vadd.f32 %v3610_v12, %v3532_v26  ;;  %v3627_v1 = vadd.f32 %v3563_v37, %v3414_v56  ;;  %v3583_v56 = vld [vmem:[%s7089_s0 + $0xd8] sm:$0xff] }
 0x8f8   : > { %v3643_v43 = vadd.f32 %v3579_v19, %v3454_v9  ;;  %3722 = vst.msk [vmem:[%s7096_s7 + $0x130] sm:$0xff] %vm869_vm5, %v3658_v15 }
 0x8f9   : > { %3738 = vst.msk [vmem:[%s7096_s7 + $0x1b0] sm:$0xff] %vm869_vm5, %v3674_v21 }
 0x8fa   : > { %3691 = vst.msk [vmem:[%s7096_s7 + $0x38] sm:$0xff] %vm869_vm5, %v3627_v1 }
 0x8fb   : > { %3707 = vst.msk [vmem:[%s7096_s7 + $0xb8] sm:$0xff] %vm869_vm5, %v3643_v43  ;;  %v3493_v54 = vpop.f32.mrf.mxu2 }
 0x8fc   : > { %v3533_v40 = vpop.f32.mrf.mxu3  ;;  %v3494_v57 = vadd.f32 %v6572_v50, %v3493_v54  ;;  %v3416_v17 = vpop.f32.mrf.mxu0 }
 0x8fd   : > { %v3534_v59 = vadd.f32 %v6572_v50, %v3533_v40  ;;  %v3456_v42 = vpop.f32.mrf.mxu1  ;;  %v3417_v5 = vadd.f32 %v6572_v50, %v3416_v17  ;;  %v3599_v40 = vld [vmem:[%s7089_s0 + $0x158] sm:$0xff] }
 0x8fe   : > { %v3457_v3 = vadd.f32 %v6572_v50, %v3456_v42  ;;  %v3659_v32 = vadd.f32 %v3595_v30, %v3494_v57  ;;  %v3615_v57 = vld [vmem:[%s7089_s0 + $0x1d8] sm:$0xff]  ;;  %v3568_v42 = vld [vmem:[%s7089_s0 + $0x60] sm:$0xff] }
 0x8ff   : > { %v3675_v49 = vadd.f32 %v3611_v2, %v3534_v59  ;;  %v3628_v14 = vadd.f32 %v3564_v8, %v3417_v5  ;;  %v3584_v5 = vld [vmem:[%s7089_s0 + $0xe0] sm:$0xff] }
 0x900   : > { %v3644_v35 = vadd.f32 %v3580_v47, %v3457_v3  ;;  %3723 = vst.msk [vmem:[%s7096_s7 + $0x138] sm:$0xff] %vm869_vm5, %v3659_v32 }
 0x901   : > { %3739 = vst.msk [vmem:[%s7096_s7 + $0x1b8] sm:$0xff] %vm869_vm5, %v3675_v49 }
 0x902   : > { %3692 = vst.msk [vmem:[%s7096_s7 + $0x40] sm:$0xff] %vm869_vm5, %v3628_v14 }
 0x903   : > { %3708 = vst.msk [vmem:[%s7096_s7 + $0xc0] sm:$0xff] %vm869_vm5, %v3644_v35  ;;  %v3496_v25 = vpop.f32.mrf.mxu2 }
 0x904   : > { %v3536_v18 = vpop.f32.mrf.mxu3  ;;  %v3497_v27 = vadd.f32 %v6572_v50, %v3496_v25  ;;  %v3418_v60 = vpop.f32.mrf.mxu0 }
 0x905   : > { %v3537_v55 = vadd.f32 %v6572_v50, %v3536_v18  ;;  %v3458_v6 = vpop.f32.mrf.mxu1  ;;  %v3419_v58 = vadd.f32 %v6572_v50, %v3418_v60  ;;  %v3600_v18 = vld [vmem:[%s7089_s0 + $0x160] sm:$0xff] }
 0x906   : > { %v3459_v23 = vadd.f32 %v6572_v50, %v3458_v6  ;;  %v3660_v34 = vadd.f32 %v3596_v22, %v3497_v27  ;;  %v3616_v27 = vld [vmem:[%s7089_s0 + $0x1e0] sm:$0xff]  ;;  %v3569_v6 = vld [vmem:[%s7089_s0 + $0x68] sm:$0xff] }
 0x907   : > { %v3676_v46 = vadd.f32 %v3612_v16, %v3537_v55  ;;  %v3629_v39 = vadd.f32 %v3565_v52, %v3419_v58  ;;  %v3585_v58 = vld [vmem:[%s7089_s0 + $0xe8] sm:$0xff] }
 0x908   : > { %v3645_v31 = vadd.f32 %v3581_v36, %v3459_v23  ;;  %3724 = vst.msk [vmem:[%s7096_s7 + $0x140] sm:$0xff] %vm869_vm5, %v3660_v34 }
 0x909   : > { %3740 = vst.msk [vmem:[%s7096_s7 + $0x1c0] sm:$0xff] %vm869_vm5, %v3676_v46 }
 0x90a   : > { %3693 = vst.msk [vmem:[%s7096_s7 + $0x48] sm:$0xff] %vm869_vm5, %v3629_v39 }
 0x90b   : > { %3709 = vst.msk [vmem:[%s7096_s7 + $0xc8] sm:$0xff] %vm869_vm5, %v3645_v31  ;;  %v3498_v63 = vpop.f32.mrf.mxu2 }
 0x90c   : > { %v3538_v0 = vpop.f32.mrf.mxu3  ;;  %v3499_v28 = vadd.f32 %v6572_v50, %v3498_v63  ;;  %v3421_v48 = vpop.f32.mrf.mxu0 }
 0x90d   : > { %v3539_v7 = vadd.f32 %v6572_v50, %v3538_v0  ;;  %v3461_v13 = vpop.f32.mrf.mxu1  ;;  %v3422_v38 = vadd.f32 %v6572_v50, %v3421_v48  ;;  %v3601_v0 = vld [vmem:[%s7089_s0 + $0x168] sm:$0xff] }
 0x90e   : > { %v3462_v11 = vadd.f32 %v6572_v50, %v3461_v13  ;;  %v3661_v41 = vadd.f32 %v3597_v51, %v3499_v28  ;;  %v3617_v28 = vld [vmem:[%s7089_s0 + $0x1e8] sm:$0xff]  ;;  %v3570_v13 = vld [vmem:[%s7089_s0 + $0x70] sm:$0xff] }
 0x90f   : > { %v3677_v29 = vadd.f32 %v3613_v44, %v3539_v7  ;;  %v3630_v62 = vadd.f32 %v3566_v20, %v3422_v38  ;;  %v3586_v38 = vld [vmem:[%s7089_s0 + $0xf0] sm:$0xff] }
 0x910   : > { %v3646_v33 = vadd.f32 %v3582_v10, %v3462_v11  ;;  %3725 = vst.msk [vmem:[%s7096_s7 + $0x148] sm:$0xff] %vm869_vm5, %v3661_v41 }
 0x911   : > { %3741 = vst.msk [vmem:[%s7096_s7 + $0x1c8] sm:$0xff] %vm869_vm5, %v3677_v29 }
 0x912   : > { %3694 = vst.msk [vmem:[%s7096_s7 + $0x50] sm:$0xff] %vm869_vm5, %v3630_v62 }
 0x913   : > { %3710 = vst.msk [vmem:[%s7096_s7 + $0xd0] sm:$0xff] %vm869_vm5, %v3646_v33  ;;  %v3501_v4 = vpop.f32.mrf.mxu2 }
 0x914   : > { %v3541_v12 = vpop.f32.mrf.mxu3  ;;  %v3502_v26 = vadd.f32 %v6572_v50, %v3501_v4  ;;  %v3423_v37 = vpop.f32.mrf.mxu0 }
 0x915   : > { %v3542_v45 = vadd.f32 %v6572_v50, %v3541_v12  ;;  %v3463_v19 = vpop.f32.mrf.mxu1  ;;  %v3424_v9 = vadd.f32 %v6572_v50, %v3423_v37  ;;  %v3602_v12 = vld [vmem:[%s7089_s0 + $0x170] sm:$0xff] }
 0x916   : > { %v3464_v15 = vadd.f32 %v6572_v50, %v3463_v19  ;;  %v3662_v21 = vadd.f32 %v3598_v24, %v3502_v26  ;;  %v3618_v26 = vld [vmem:[%s7089_s0 + $0x1f0] sm:$0xff]  ;;  %v3571_v19 = vld [vmem:[%s7089_s0 + $0x78] sm:$0xff] }
 0x917   : > { %v3678_v1 = vadd.f32 %v3614_v61, %v3542_v45  ;;  %v3631_v43 = vadd.f32 %v3567_v53, %v3424_v9  ;;  %v3587_v9 = vld [vmem:[%s7089_s0 + $0xf8] sm:$0xff] }
 0x918   : > { %v3647_v54 = vadd.f32 %v3583_v56, %v3464_v15  ;;  %3726 = vst.msk [vmem:[%s7096_s7 + $0x150] sm:$0xff] %vm869_vm5, %v3662_v21 }
 0x919   : > { %3742 = vst.msk [vmem:[%s7096_s7 + $0x1d0] sm:$0xff] %vm869_vm5, %v3678_v1 }
 0x91a   : > { %3695 = vst.msk [vmem:[%s7096_s7 + $0x58] sm:$0xff] %vm869_vm5, %v3631_v43 }
 0x91b   : > { %3711 = vst.msk [vmem:[%s7096_s7 + $0xd8] sm:$0xff] %vm869_vm5, %v3647_v54  ;;  %v3503_v30 = vpop.f32.mrf.mxu2 }
 0x91c   : > { %v3543_v2 = vpop.f32.mrf.mxu3  ;;  %v3504_v59 = vadd.f32 %v6572_v50, %v3503_v30  ;;  %v3426_v8 = vpop.f32.mrf.mxu0 }
 0x91d   : > { %v3544_v17 = vadd.f32 %v6572_v50, %v3543_v2  ;;  %v3466_v47 = vpop.f32.mrf.mxu1  ;;  %v3427_v3 = vadd.f32 %v6572_v50, %v3426_v8  ;;  %v3603_v2 = vld [vmem:[%s7089_s0 + $0x178] sm:$0xff] }
 0x91e   : > { %v3467_v32 = vadd.f32 %v6572_v50, %v3466_v47  ;;  %v3663_v49 = vadd.f32 %v3599_v40, %v3504_v59  ;;  %v3619_v59 = vld [vmem:[%s7089_s0 + $0x1f8] sm:$0xff] }
 0x91f   : > { %v3679_v14 = vadd.f32 %v3615_v57, %v3544_v17  ;;  %v3632_v35 = vadd.f32 %v3568_v42, %v3427_v3 }
 0x920   : > { %v3648_v25 = vadd.f32 %v3584_v5, %v3467_v32  ;;  %3727 = vst.msk [vmem:[%s7096_s7 + $0x158] sm:$0xff] %vm869_vm5, %v3663_v49 }
 0x921   : > { %3743 = vst.msk [vmem:[%s7096_s7 + $0x1d8] sm:$0xff] %vm869_vm5, %v3679_v14 }
 0x922   : > { %3696 = vst.msk [vmem:[%s7096_s7 + $0x60] sm:$0xff] %vm869_vm5, %v3632_v35 }
 0x923   : > { %3712 = vst.msk [vmem:[%s7096_s7 + $0xe0] sm:$0xff] %vm869_vm5, %v3648_v25  ;;  %v3506_v22 = vpop.f32.mrf.mxu2 }
 0x924   : > { %v3546_v16 = vpop.f32.mrf.mxu3  ;;  %v3507_v55 = vadd.f32 %v6572_v50, %v3506_v22  ;;  %v3428_v52 = vpop.f32.mrf.mxu0 }
 0x925   : > { %v3547_v60 = vadd.f32 %v6572_v50, %v3546_v16  ;;  %v3468_v36 = vpop.f32.mrf.mxu1  ;;  %v3429_v23 = vadd.f32 %v6572_v50, %v3428_v52 }
 0x926   : > { %v3469_v34 = vadd.f32 %v6572_v50, %v3468_v36  ;;  %v3664_v46 = vadd.f32 %v3600_v18, %v3507_v55 }
 0x927   : > { %v3680_v39 = vadd.f32 %v3616_v27, %v3547_v60  ;;  %v3633_v31 = vadd.f32 %v3569_v6, %v3429_v23 }
 0x928   : > { %v3649_v63 = vadd.f32 %v3585_v58, %v3469_v34  ;;  %3728 = vst.msk [vmem:[%s7096_s7 + $0x160] sm:$0xff] %vm869_vm5, %v3664_v46 }
 0x929   : > { %3744 = vst.msk [vmem:[%s7096_s7 + $0x1e0] sm:$0xff] %vm869_vm5, %v3680_v39 }
 0x92a   : > { %3697 = vst.msk [vmem:[%s7096_s7 + $0x68] sm:$0xff] %vm869_vm5, %v3633_v31 }
 0x92b   : > { %3713 = vst.msk [vmem:[%s7096_s7 + $0xe8] sm:$0xff] %vm869_vm5, %v3649_v63  ;;  %v3508_v51 = vpop.f32.mrf.mxu2 }
 0x92c   : > { %v3548_v44 = vpop.f32.mrf.mxu3  ;;  %v3509_v7 = vadd.f32 %v6572_v50, %v3508_v51  ;;  %v3431_v20 = vpop.f32.mrf.mxu0 }
 0x92d   : > { %v3549_v48 = vadd.f32 %v6572_v50, %v3548_v44  ;;  %v3471_v10 = vpop.f32.mrf.mxu1  ;;  %v3432_v11 = vadd.f32 %v6572_v50, %v3431_v20 }
 0x92e   : > { %v3472_v41 = vadd.f32 %v6572_v50, %v3471_v10  ;;  %v3665_v29 = vadd.f32 %v3601_v0, %v3509_v7 }
 0x92f   : > { %v3681_v62 = vadd.f32 %v3617_v28, %v3549_v48  ;;  %v3634_v33 = vadd.f32 %v3570_v13, %v3432_v11 }
 0x930   : > { %v3650_v4 = vadd.f32 %v3586_v38, %v3472_v41  ;;  %3729 = vst.msk [vmem:[%s7096_s7 + $0x168] sm:$0xff] %vm869_vm5, %v3665_v29 }
 0x931   : > { %3745 = vst.msk [vmem:[%s7096_s7 + $0x1e8] sm:$0xff] %vm869_vm5, %v3681_v62 }
 0x932   : > { %3698 = vst.msk [vmem:[%s7096_s7 + $0x70] sm:$0xff] %vm869_vm5, %v3634_v33 }
 0x933   : > { %3714 = vst.msk [vmem:[%s7096_s7 + $0xf0] sm:$0xff] %vm869_vm5, %v3650_v4  ;;  %v3511_v24 = vpop.f32.mrf.mxu2 }
 0x934   : > { %v3551_v61 = vpop.f32.mrf.mxu3  ;;  %v3512_v45 = vadd.f32 %v6572_v50, %v3511_v24  ;;  %v3433_v53 = vpop.f32.mrf.mxu0 }
 0x935   : > { %v3552_v37 = vadd.f32 %v6572_v50, %v3551_v61  ;;  %v3473_v56 = vpop.f32.mrf.mxu1  ;;  %v3434_v15 = vadd.f32 %v6572_v50, %v3433_v53 }
 0x936   : > { %v3474_v21 = vadd.f32 %v6572_v50, %v3473_v56  ;;  %v3666_v1 = vadd.f32 %v3602_v12, %v3512_v45 }
 0x937   : > { %v3682_v43 = vadd.f32 %v3618_v26, %v3552_v37  ;;  %v3635_v54 = vadd.f32 %v3571_v19, %v3434_v15 }
 0x938   : > { %v3651_v30 = vadd.f32 %v3587_v9, %v3474_v21  ;;  %3730 = vst.msk [vmem:[%s7096_s7 + $0x170] sm:$0xff] %vm869_vm5, %v3666_v1 }
 0x939   : > { %3746 = vst.msk [vmem:[%s7096_s7 + $0x1f0] sm:$0xff] %vm869_vm5, %v3682_v43 }
 0x93a   : > { %3699 = vst.msk [vmem:[%s7096_s7 + $0x78] sm:$0xff] %vm869_vm5, %v3635_v54 }
 0x93b   : > { %3715 = vst.msk [vmem:[%s7096_s7 + $0xf8] sm:$0xff] %vm869_vm5, %v3651_v30  ;;  %v3513_v40 = vpop.f32.mrf.mxu2 }
 0x93c   : > { %v3553_v57 = vpop.f32.mrf.mxu3  ;;  %v3514_v17 = vadd.f32 %v6572_v50, %v3513_v40 }
 0x93d   : > { %v3554_v8 = vadd.f32 %v6572_v50, %v3553_v57 }
 0x93e   : > { %v3667_v42 = vadd.f32 %v3603_v2, %v3514_v17 }
 0x93f   : > { %v3683_v47 = vadd.f32 %v3619_v59, %v3554_v8 }
 0x940   : > { %3731 = vst.msk [vmem:[%s7096_s7 + $0x178] sm:$0xff] %vm869_vm5, %v3667_v42 }
 0x941   : > { %3747 = vst.msk [vmem:[%s7096_s7 + $0x1f8] sm:$0xff] %vm869_vm5, %v3683_v47 }
 0x942 PF: > { %s17_s24 = sadd.s32 1, %s4366_s24  }
 0x943   : > { %p14_p5 = scmp.ge.s32.totalorder %s17_s24, 4  }
 0x945   :  { %16 = sbr.rel (!%p14_p5) target bundleno = 1 (0x1), region = 80 }

</bundles_post_ra>
